<compile_context>
chip_gen: v6e
topology: v6e:2x2x1
jax: 0.10.0
libtpu: 0.0.40
codegen_flags: <defaults>
</compile_context>

<pallas_src>
import math
import functools

import jax
import jax.numpy as jnp
from jax.experimental import pallas as pl
from jax.experimental.pallas import tpu as pltpu


# ----------------------------- Pallas kernel -------------------------------

def _stack_kernel(x_ref, mask_ref,
                  ga_ref, ba_ref, wqkv_ref, bqkv_ref, wo_ref, bo_ref,
                  gf_ref, bf_ref, w1_ref, b1_ref, w2_ref, b2_ref,
                  gn_ref, bn_ref, o_ref,
                  *, num_layers, attn_per_layer, num_heads):
    """Whole (pre-LN) transformer stack + final LN for one batch element."""
    x = x_ref[...].astype(jnp.float32)                    # (S, D) residual stream
    S, D = x.shape
    Dh = D // num_heads
    mask = mask_ref[...]                                   # (S, S) additive, f32

    def layernorm(v, g, b):
        mean = jnp.mean(v, axis=-1, keepdims=True)
        var = jnp.mean(jnp.square(v - mean), axis=-1, keepdims=True)
        return (v - mean) * jax.lax.rsqrt(var + 1e-5) * g + b

    for l in range(num_layers):                            # static unroll
        # ---------------- attention sublayer(s) ----------------
        for a in range(attn_per_layer):
            i = l * attn_per_layer + a
            normed = layernorm(x, ga_ref[i], ba_ref[i])
            # fused Q/K/V projection; 1/sqrt(Dh) folded into the Q columns.
            qkv = jnp.dot(normed.astype(jnp.bfloat16), wqkv_ref[i],
                          preferred_element_type=jnp.float32) + bqkv_ref[i]
            qkv_bf = qkv.astype(jnp.bfloat16)              # single cast
            attn_out = jnp.zeros((S, D), jnp.float32)
            for h in range(num_heads):                     # static unroll (tiny H)
                q_h = qkv_bf[:, h * Dh:(h + 1) * Dh]
                k_h = qkv_bf[:, D + h * Dh:D + (h + 1) * Dh]
                v_h = qkv_bf[:, 2 * D + h * Dh:2 * D + (h + 1) * Dh]
                s = jnp.einsum('qd,kd->qk', q_h, k_h,
                               preferred_element_type=jnp.float32) + mask
                s = s - jnp.max(s, axis=-1, keepdims=True)
                p = jnp.exp(s)
                p = p * pl.reciprocal(jnp.sum(p, axis=-1, keepdims=True),
                                      approx=True)         # EUP slot
                ctx = jnp.dot(p.astype(jnp.bfloat16), v_h,
                              preferred_element_type=jnp.float32)
                # per-head accumulation into the output projection (no concat)
                attn_out = attn_out + jnp.dot(
                    ctx.astype(jnp.bfloat16), wo_ref[i * num_heads + h],
                    preferred_element_type=jnp.float32)
            x = x + attn_out + bo_ref[i]                   # fused residual add

        # ---------------------- FFN sublayer -------------------
        normed = layernorm(x, gf_ref[l], bf_ref[l])
        h1 = jnp.dot(normed.astype(jnp.bfloat16), w1_ref[l],
                     preferred_element_type=jnp.float32) + b1_ref[l]
        h1 = jnp.maximum(h1, 0.0)
        y = jnp.dot(h1.astype(jnp.bfloat16), w2_ref[l],
                    preferred_element_type=jnp.float32) + b2_ref[l]
        x = x + y                                          # fused residual add

    o_ref[...] = layernorm(x, gn_ref[...], bn_ref[...]).astype(o_ref.dtype)


def _const_spec(shape):
    n = len(shape)
    return pl.BlockSpec(shape, lambda b, _n=n: (0,) * _n)


def _run_stack(x, mask, sp, *, num_heads, attn_per_layer):
    """x: (B, S, D) -> full stack output (B, S, D); one pallas_call, grid=(B,)."""
    B, S, D = x.shape
    L = sp['w1'].shape[0]

    weight_args = (sp['ga'], sp['ba'], sp['wqkv'], sp['bqkv'], sp['wo'], sp['bo'],
                   sp['gf'], sp['bf'], sp['w1'], sp['b1'], sp['w2'], sp['b2'],
                   sp['gn'], sp['bn'])

    kern = functools.partial(_stack_kernel, num_layers=L,
                             attn_per_layer=attn_per_layer, num_heads=num_heads)
    out = pl.pallas_call(
        kern,
        out_shape=jax.ShapeDtypeStruct((B * S, D), x.dtype),
        grid=(B,),
        in_specs=[pl.BlockSpec((S, D), lambda b: (b, 0)),    # x (per batch)
                  _const_spec(mask.shape)]                   # additive mask
                 + [_const_spec(w.shape) for w in weight_args],
        out_specs=pl.BlockSpec((S, D), lambda b: (b, 0)),
        compiler_params=pltpu.CompilerParams(
            dimension_semantics=("parallel",)),              # megacore on v7x
    )(x.reshape(B * S, D), mask, *weight_args)
    return out.reshape(B, S, D)


# ------------------------ Parameter preparation -----------------------------
# Done ONCE (outside the jitted forward): fuse Q/K/V, fold the attention scale
# into Q, split Wo per head, stack across layers, cast matmul weights to bf16.

def _prep_stack(layers, norm, attn_keys, num_heads):
    D = norm['g'].shape[0]
    H = num_heads
    Dh = D // H
    scale = 1.0 / math.sqrt(Dh)

    ga, ba, wqkv, bqkv, wo, bo = [], [], [], [], [], []
    gf, bf, w1, b1, w2, b2 = [], [], [], [], [], []
    for lp in layers:
        for (ln_key, mha_key) in attn_keys:
            ln, m = lp[ln_key], lp[mha_key]
            ga.append(ln['g'].reshape(1, D))
            ba.append(ln['b'].reshape(1, D))
            wqkv.append(jnp.concatenate(
                [m['q']['w'] * scale, m['k']['w'], m['v']['w']], axis=1))
            bqkv.append(jnp.concatenate(
                [m['q']['b'] * scale, m['k']['b'], m['v']['b']]).reshape(1, 3 * D))
            wo.append(m['o']['w'].reshape(H, Dh, D))
            bo.append(m['o']['b'].reshape(1, D))
        gf.append(lp['ln_ff']['g'].reshape(1, D))
        bf.append(lp['ln_ff']['b'].reshape(1, D))
        w1.append(lp['ff']['w1']['w'])
        b1.append(lp['ff']['w1']['b'].reshape(1, -1))
        w2.append(lp['ff']['w2']['w'])
        b2.append(lp['ff']['w2']['b'].reshape(1, D))

    st = lambda xs: jnp.stack(xs, axis=0)
    return {
        'ga': st(ga), 'ba': st(ba),
        'wqkv': st(wqkv).astype(jnp.bfloat16), 'bqkv': st(bqkv),
        'wo': jnp.concatenate(wo, axis=0).astype(jnp.bfloat16),  # (A*H, Dh, D)
        'bo': st(bo),
        'gf': st(gf), 'bf': st(bf),
        'w1': st(w1).astype(jnp.bfloat16), 'b1': st(b1),
        'w2': st(w2).astype(jnp.bfloat16), 'b2': st(b2),
        'gn': norm['g'].reshape(1, D), 'bn': norm['b'].reshape(1, D),
    }


def prepare_params(params, num_heads):
    enc, dec = params['encoder'], params['decoder']
    return {
        'src_embed': params['src_embed'],
        'tgt_embed': params['tgt_embed'],
        'encoder': _prep_stack(enc['layers'], enc['norm'],
                               [('ln', 'mha')], num_heads),
        'decoder': _prep_stack(dec['layers'], dec['norm'],
                               [('ln1', 'mha1'), ('ln2', 'mha2')], num_heads),
    }


# ----------------------------- Model (JAX glue) ----------------------------

def sinusoidal_pe(S, D):
    pos = jnp.arange(S, dtype=jnp.float32)[:, None]
    div = jnp.exp(jnp.arange(0, D, 2, dtype=jnp.float32) * (-math.log(10000.0) / D))
    pe = jnp.zeros((S, D), jnp.float32)
    pe = pe.at[:, 0::2].set(jnp.sin(pos * div))
    pe = pe.at[:, 1::2].set(jnp.cos(pos * div))
    return pe


def transformer_forward(prep, src, tgt, src_mask, tgt_mask, *, num_heads):
    D = prep['src_embed'].shape[1]
    scale = math.sqrt(D)
    # Embedding gather + positional encoding: plain JAX glue (gather has no
    # clean Pallas win at these sizes).
    src_emb = prep['src_embed'][src] * scale + sinusoidal_pe(src.shape[1], D)[None]
    enc = _run_stack(src_emb, src_mask, prep['encoder'],
                     num_heads=num_heads, attn_per_layer=1)
    tgt_emb = prep['tgt_embed'][tgt] * scale + sinusoidal_pe(tgt.shape[1], D)[None]
    # TODO(synk): reference decoder layers ignore `memory` -> enc is unused.
    del enc
    out = _run_stack(tgt_emb, tgt_mask, prep['decoder'],
                     num_heads=num_heads, attn_per_layer=2)
    return out


# -------------------------- Pure-JAX reference ------------------------------

def _ref_ln(x, g, b):
    mean = x.mean(-1, keepdims=True)
    var = ((x - mean) ** 2).mean(-1, keepdims=True)
    return (x - mean) / jnp.sqrt(var + 1e-5) * g + b


def _ref_mha(x, p, mask, H):
    B, S, D = x.shape
    Dh = D // H
    split = lambda t: t.reshape(B, S, H, Dh).transpose(0, 2, 1, 3)
    q = split(x @ p['q']['w'] + p['q']['b'])
    k = split(x @ p['k']['w'] + p['k']['b'])
    v = split(x @ p['v']['w'] + p['v']['b'])
    s = jnp.einsum('bhqd,bhkd->bhqk', q, k) / math.sqrt(Dh) + mask
    ctx = jnp.einsum('bhqk,bhkd->bhqd', jax.nn.softmax(s, axis=-1), v)
    ctx = ctx.transpose(0, 2, 1, 3).reshape(B, S, D)
    return ctx @ p['o']['w'] + p['o']['b']


def _ref_ffn(x, p):
    return jnp.maximum(x @ p['w1']['w'] + p['w1']['b'], 0.0) @ p['w2']['w'] + p['w2']['b']


def ref_encoder(p, x, mask, H):
    for lp in p['layers']:
        x = x + _ref_mha(_ref_ln(x, lp['ln']['g'], lp['ln']['b']), lp['mha'], mask, H)
        x = x + _ref_ffn(_ref_ln(x, lp['ln_ff']['g'], lp['ln_ff']['b']), lp['ff'])
    return _ref_ln(x, p['norm']['g'], p['norm']['b'])


def ref_decoder(p, x, mask, H):
    for lp in p['layers']:
        x = x + _ref_mha(_ref_ln(x, lp['ln1']['g'], lp['ln1']['b']), lp['mha1'], mask, H)
        x = x + _ref_mha(_ref_ln(x, lp['ln2']['g'], lp['ln2']['b']), lp['mha2'], mask, H)
        x = x + _ref_ffn(_ref_ln(x, lp['ln_ff']['g'], lp['ln_ff']['b']), lp['ff'])
    return _ref_ln(x, p['norm']['g'], p['norm']['b'])


# ----------------------------- Parameter init ------------------------------

def xavier_uniform(key, shape):
    fan_in, fan_out = shape[0], shape[1]
    limit = math.sqrt(6.0 / (fan_in + fan_out))
    return jax.random.uniform(key, shape, jnp.float32, -limit, limit)


def init_params(key, dim_model, num_heads, num_layers, n_tok_enc, n_tok_dec):
    keys = iter(jax.random.split(key, 512))
    D = dim_model

    def lin(din, dout):
        return {'w': xavier_uniform(next(keys), (din, dout)),
                'b': jnp.zeros((dout,), jnp.float32)}

    def mha():
        return {'q': lin(D, D), 'k': lin(D, D), 'v': lin(D, D), 'o': lin(D, D)}

    def ln():
        return {'g': jnp.ones((D,), jnp.float32), 'b': jnp.zeros((D,), jnp.float32)}

    def ff():
        return {'w1': lin(D, 2 * D), 'w2': lin(2 * D, D)}

    enc_layers = [{'ln': ln(), 'mha': mha(), 'ln_ff': ln(), 'ff': ff()}
                  for _ in range(num_layers)]
    dec_layers = [{'ln1': ln(), 'mha1': mha(), 'ln2': ln(), 'mha2': mha(),
                   'ln_ff': ln(), 'ff': ff()}
                  for _ in range(num_layers)]

    return {
        'src_embed': xavier_uniform(next(keys), (n_tok_enc, D)),
        'tgt_embed': xavier_uniform(next(keys), (n_tok_dec, D)),
        'encoder': {'layers': enc_layers, 'norm': ln()},
        'decoder': {'layers': dec_layers, 'norm': ln()},
    }


# ----------------------------- Main -----------------------------

if __name__ == "__main__":
    B = 2
    S_SRC, S_TGT = 8, 8
    DIM, HEADS, LAYERS = 32, 4, 2
    N_TOK_ENC, N_TOK_DEC = 50, 60

    root = jax.random.PRNGKey(0)
    kp, ks, kt = jax.random.split(root, 3)

    params = init_params(kp, DIM, HEADS, LAYERS, N_TOK_ENC, N_TOK_DEC)
    prep = prepare_params(params, HEADS)      # one-time weight fusion / bf16 cast

    src = jax.random.randint(ks, (B, S_SRC), 0, N_TOK_ENC)
    tgt = jax.random.randint(kt, (B, S_TGT), 0, N_TOK_DEC)

    # src_mask: no masking (zeros, additive). tgt_mask: causal, -inf above diag.
    src_mask = jnp.zeros((S_SRC, S_SRC), jnp.float32)
    tgt_mask = jnp.triu(jnp.full((S_TGT, S_TGT), -jnp.inf, jnp.float32), k=1)

    fwd = jax.jit(functools.partial(transformer_forward, num_heads=HEADS))
    out = jax.block_until_ready(fwd(prep, src, tgt, src_mask, tgt_mask))

    # Exercise the encoder kernel explicitly (the decoder never reads `memory`,
    # so jit would DCE the encoder inside fwd) and check both against pure-JAX.
    enc_fn = jax.jit(functools.partial(_run_stack, num_heads=HEADS, attn_per_layer=1))
    src_emb = params['src_embed'][src] * math.sqrt(DIM) + sinusoidal_pe(S_SRC, DIM)[None]
    tgt_emb = params['tgt_embed'][tgt] * math.sqrt(DIM) + sinusoidal_pe(S_TGT, DIM)[None]
    enc = jax.block_until_ready(enc_fn(src_emb, src_mask, prep['encoder']))

    enc_ref = ref_encoder(params['encoder'], src_emb, src_mask, HEADS)
    out_ref = ref_decoder(params['decoder'], tgt_emb, tgt_mask, HEADS)

    assert out.shape == (B, S_TGT, DIM)
    assert bool(jnp.all(jnp.isfinite(out)))
    err_enc = float(jnp.max(jnp.abs(enc - enc_ref)))
    err_dec = float(jnp.max(jnp.abs(out - out_ref)))
    # bf16 MXU weights + approx reciprocal => small fp deviation from f32 ref.
    assert err_enc < 0.25 and err_dec < 0.25, (err_enc, err_dec)
    print("KERNEL_OK")
</pallas_src>

<mosaic_0001>
module attributes {stable_mosaic.version = 11 : i64} {
  func.func @_stack_kernel(%arg0: i32, %arg1: memref<8x32xf32, #tpu.memory_space<vmem>>, %arg2: memref<8x8xf32, #tpu.memory_space<vmem>>, %arg3: memref<4x1x32xf32, #tpu.memory_space<vmem>>, %arg4: memref<4x1x32xf32, #tpu.memory_space<vmem>>, %arg5: memref<4x32x96xbf16, #tpu.memory_space<vmem>>, %arg6: memref<4x1x96xf32, #tpu.memory_space<vmem>>, %arg7: memref<16x8x32xbf16, #tpu.memory_space<vmem>>, %arg8: memref<4x1x32xf32, #tpu.memory_space<vmem>>, %arg9: memref<2x1x32xf32, #tpu.memory_space<vmem>>, %arg10: memref<2x1x32xf32, #tpu.memory_space<vmem>>, %arg11: memref<2x32x64xbf16, #tpu.memory_space<vmem>>, %arg12: memref<2x1x64xf32, #tpu.memory_space<vmem>>, %arg13: memref<2x64x32xbf16, #tpu.memory_space<vmem>>, %arg14: memref<2x1x32xf32, #tpu.memory_space<vmem>>, %arg15: memref<1x32xf32, #tpu.memory_space<vmem>>, %arg16: memref<1x32xf32, #tpu.memory_space<vmem>>, %arg17: memref<8x32xf32, #tpu.memory_space<vmem>>) attributes {dimension_semantics = [#tpu.dimension_semantics<parallel>], iteration_bounds = array<i64: 2>, scalar_prefetch = 0 : i64, scratch_operands = 0 : i64, tpu.core_type = #tpu.core_type<tc>, window_params = [{transform_indices = @transform_0, window_bounds = array<i64: 8, 32>}, {pipeline_mode = #tpu.pipeline_mode<synchronous>, transform_indices = @transform_1, window_bounds = array<i64: 8, 8>}, {pipeline_mode = #tpu.pipeline_mode<synchronous>, transform_indices = @transform_2, window_bounds = array<i64: 4, 1, 32>}, {pipeline_mode = #tpu.pipeline_mode<synchronous>, transform_indices = @transform_3, window_bounds = array<i64: 4, 1, 32>}, {pipeline_mode = #tpu.pipeline_mode<synchronous>, transform_indices = @transform_4, window_bounds = array<i64: 4, 32, 96>}, {pipeline_mode = #tpu.pipeline_mode<synchronous>, transform_indices = @transform_5, window_bounds = array<i64: 4, 1, 96>}, {pipeline_mode = #tpu.pipeline_mode<synchronous>, transform_indices = @transform_6, window_bounds = array<i64: 16, 8, 32>}, {pipeline_mode = #tpu.pipeline_mode<synchronous>, transform_indices = @transform_7, window_bounds = array<i64: 4, 1, 32>}, {pipeline_mode = #tpu.pipeline_mode<synchronous>, transform_indices = @transform_8, window_bounds = array<i64: 2, 1, 32>}, {pipeline_mode = #tpu.pipeline_mode<synchronous>, transform_indices = @transform_9, window_bounds = array<i64: 2, 1, 32>}, {pipeline_mode = #tpu.pipeline_mode<synchronous>, transform_indices = @transform_10, window_bounds = array<i64: 2, 32, 64>}, {pipeline_mode = #tpu.pipeline_mode<synchronous>, transform_indices = @transform_11, window_bounds = array<i64: 2, 1, 64>}, {pipeline_mode = #tpu.pipeline_mode<synchronous>, transform_indices = @transform_12, window_bounds = array<i64: 2, 64, 32>}, {pipeline_mode = #tpu.pipeline_mode<synchronous>, transform_indices = @transform_13, window_bounds = array<i64: 2, 1, 32>}, {pipeline_mode = #tpu.pipeline_mode<synchronous>, transform_indices = @transform_14, window_bounds = array<i64: 1, 32>}, {pipeline_mode = #tpu.pipeline_mode<synchronous>, transform_indices = @transform_15, window_bounds = array<i64: 1, 32>}, {transform_indices = @transform_16, window_bounds = array<i64: 8, 32>}]} {
    %c0 = arith.constant 0 : index
    %c0_0 = arith.constant 0 : index
    %0 = vector.load %arg1[%c0, %c0_0] : memref<8x32xf32, #tpu.memory_space<vmem>>, vector<8x32xf32>
    %c0_1 = arith.constant 0 : index
    %c0_2 = arith.constant 0 : index
    %1 = vector.load %arg2[%c0_1, %c0_2] : memref<8x8xf32, #tpu.memory_space<vmem>>, vector<8x8xf32>
    %c0_3 = arith.constant 0 : index
    %c0_4 = arith.constant 0 : index
    %c0_5 = arith.constant 0 : index
    %2 = vector.load %arg3[%c0_3, %c0_4, %c0_5] : memref<4x1x32xf32, #tpu.memory_space<vmem>>, vector<1x1x32xf32>
    %3 = vector.shape_cast %2 : vector<1x1x32xf32> to vector<1x32xf32>
    %c0_6 = arith.constant 0 : index
    %c0_7 = arith.constant 0 : index
    %c0_8 = arith.constant 0 : index
    %4 = vector.load %arg4[%c0_6, %c0_7, %c0_8] : memref<4x1x32xf32, #tpu.memory_space<vmem>>, vector<1x1x32xf32>
    %5 = vector.shape_cast %4 : vector<1x1x32xf32> to vector<1x32xf32>
    %cst = arith.constant dense<0.000000e+00> : vector<8xf32>
    %6 = vector.multi_reduction <add>, %0, %cst [1] : vector<8x32xf32> to vector<8xf32>
    %7 = vector.shape_cast %6 : vector<8xf32> to vector<8x1xf32>
    %cst_9 = arith.constant 3.200000e+01 : f32
    %8 = vector.broadcast %cst_9 : f32 to vector<8x1xf32>
    %9 = arith.divf %7, %8 : vector<8x1xf32>
    %10 = vector.broadcast %9 : vector<8x1xf32> to vector<8x32xf32>
    %11 = arith.subf %0, %10 : vector<8x32xf32>
    %12 = arith.mulf %11, %11 : vector<8x32xf32>
    %cst_10 = arith.constant dense<0.000000e+00> : vector<8xf32>
    %13 = vector.multi_reduction <add>, %12, %cst_10 [1] : vector<8x32xf32> to vector<8xf32>
    %14 = vector.shape_cast %13 : vector<8xf32> to vector<8x1xf32>
    %cst_11 = arith.constant 3.200000e+01 : f32
    %15 = vector.broadcast %cst_11 : f32 to vector<8x1xf32>
    %16 = arith.divf %14, %15 : vector<8x1xf32>
    %17 = vector.broadcast %9 : vector<8x1xf32> to vector<8x32xf32>
    %18 = arith.subf %0, %17 : vector<8x32xf32>
    %cst_12 = arith.constant 9.99999974E-6 : f32
    %19 = vector.broadcast %cst_12 : f32 to vector<8x1xf32>
    %20 = arith.addf %16, %19 : vector<8x1xf32>
    %21 = math.rsqrt %20 : vector<8x1xf32>
    %22 = vector.broadcast %21 : vector<8x1xf32> to vector<8x32xf32>
    %23 = arith.mulf %18, %22 : vector<8x32xf32>
    %24 = vector.broadcast %3 : vector<1x32xf32> to vector<8x32xf32>
    %25 = arith.mulf %23, %24 : vector<8x32xf32>
    %26 = vector.broadcast %5 : vector<1x32xf32> to vector<8x32xf32>
    %27 = arith.addf %25, %26 : vector<8x32xf32>
    %28 = arith.truncf %27 : vector<8x32xf32> to vector<8x32xbf16>
    %c0_13 = arith.constant 0 : index
    %c0_14 = arith.constant 0 : index
    %c0_15 = arith.constant 0 : index
    %29 = vector.load %arg5[%c0_13, %c0_14, %c0_15] : memref<4x32x96xbf16, #tpu.memory_space<vmem>>, vector<1x32x96xbf16>
    %30 = vector.shape_cast %29 : vector<1x32x96xbf16> to vector<32x96xbf16>
    %cst_16 = arith.constant dense<0.000000e+00> : vector<8x96xf32>
    %31 = tpu.matmul %28, %30, %cst_16 {dimension_numbers = #tpu.dot_dimension_numbers<[1], [0], [0], [1], [0, 0, 1, 1], [], []>} : vector<8x32xbf16>, vector<32x96xbf16>, vector<8x96xf32> -> vector<8x96xf32>
    %c0_17 = arith.constant 0 : index
    %c0_18 = arith.constant 0 : index
    %c0_19 = arith.constant 0 : index
    %32 = vector.load %arg6[%c0_17, %c0_18, %c0_19] : memref<4x1x96xf32, #tpu.memory_space<vmem>>, vector<1x1x96xf32>
    %33 = vector.shape_cast %32 : vector<1x1x96xf32> to vector<1x96xf32>
    %34 = vector.broadcast %33 : vector<1x96xf32> to vector<8x96xf32>
    %35 = arith.addf %31, %34 : vector<8x96xf32>
    %36 = arith.truncf %35 : vector<8x96xf32> to vector<8x96xbf16>
    %cst_20 = arith.constant 0.000000e+00 : f32
    %37 = vector.broadcast %cst_20 : f32 to vector<8x32xf32>
    %38 = vector.extract_strided_slice %36 {offsets = [0, 0], sizes = [8, 8], strides = [1, 1]} : vector<8x96xbf16> to vector<8x8xbf16>
    %39 = vector.extract_strided_slice %36 {offsets = [0, 32], sizes = [8, 8], strides = [1, 1]} : vector<8x96xbf16> to vector<8x8xbf16>
    %40 = vector.extract_strided_slice %36 {offsets = [0, 64], sizes = [8, 8], strides = [1, 1]} : vector<8x96xbf16> to vector<8x8xbf16>
    "tpu.trace_start"() <{level = 10 : i32, message = "qd,kd->qk"}> : () -> ()
    %cst_21 = arith.constant dense<0.000000e+00> : vector<8x8xf32>
    %41 = tpu.matmul %38, %39, %cst_21 {dimension_numbers = #tpu.dot_dimension_numbers<[1], [1], [0], [0], [0, 0, 1, 0], [], []>} : vector<8x8xbf16>, vector<8x8xbf16>, vector<8x8xf32> -> vector<8x8xf32>
    "tpu.trace_stop"() : () -> ()
    %42 = arith.addf %41, %1 : vector<8x8xf32>
    %cst_22 = arith.constant dense<0xFF800000> : vector<8xf32>
    %43 = vector.multi_reduction <maximumf>, %42, %cst_22 [1] : vector<8x8xf32> to vector<8xf32>
    %44 = vector.shape_cast %43 : vector<8xf32> to vector<8x1xf32>
    %45 = vector.broadcast %44 : vector<8x1xf32> to vector<8x8xf32>
    %46 = arith.subf %42, %45 : vector<8x8xf32>
    %47 = math.exp %46 : vector<8x8xf32>
    %cst_23 = arith.constant dense<0.000000e+00> : vector<8xf32>
    %48 = vector.multi_reduction <add>, %47, %cst_23 [1] : vector<8x8xf32> to vector<8xf32>
    %49 = vector.shape_cast %48 : vector<8xf32> to vector<8x1xf32>
    %50 = tpu.reciprocal %49 {approx = true} : vector<8x1xf32> -> vector<8x1xf32>
    %51 = vector.broadcast %50 : vector<8x1xf32> to vector<8x8xf32>
    %52 = arith.mulf %47, %51 : vector<8x8xf32>
    %53 = arith.truncf %52 : vector<8x8xf32> to vector<8x8xbf16>
    %cst_24 = arith.constant dense<0.000000e+00> : vector<8x8xf32>
    %54 = tpu.matmul %53, %40, %cst_24 {dimension_numbers = #tpu.dot_dimension_numbers<[1], [0], [0], [1], [0, 0, 1, 1], [], []>} : vector<8x8xbf16>, vector<8x8xbf16>, vector<8x8xf32> -> vector<8x8xf32>
    %55 = arith.truncf %54 : vector<8x8xf32> to vector<8x8xbf16>
    %c0_25 = arith.constant 0 : index
    %c0_26 = arith.constant 0 : index
    %c0_27 = arith.constant 0 : index
    %56 = vector.load %arg7[%c0_25, %c0_26, %c0_27] : memref<16x8x32xbf16, #tpu.memory_space<vmem>>, vector<1x8x32xbf16>
    %57 = vector.shape_cast %56 : vector<1x8x32xbf16> to vector<8x32xbf16>
    %cst_28 = arith.constant dense<0.000000e+00> : vector<8x32xf32>
    %58 = tpu.matmul %55, %57, %cst_28 {dimension_numbers = #tpu.dot_dimension_numbers<[1], [0], [0], [1], [0, 0, 1, 1], [], []>} : vector<8x8xbf16>, vector<8x32xbf16>, vector<8x32xf32> -> vector<8x32xf32>
    %59 = arith.addf %37, %58 : vector<8x32xf32>
    %60 = vector.extract_strided_slice %36 {offsets = [0, 8], sizes = [8, 8], strides = [1, 1]} : vector<8x96xbf16> to vector<8x8xbf16>
    %61 = vector.extract_strided_slice %36 {offsets = [0, 40], sizes = [8, 8], strides = [1, 1]} : vector<8x96xbf16> to vector<8x8xbf16>
    %62 = vector.extract_strided_slice %36 {offsets = [0, 72], sizes = [8, 8], strides = [1, 1]} : vector<8x96xbf16> to vector<8x8xbf16>
    "tpu.trace_start"() <{level = 10 : i32, message = "qd,kd->qk"}> : () -> ()
    %cst_29 = arith.constant dense<0.000000e+00> : vector<8x8xf32>
    %63 = tpu.matmul %60, %61, %cst_29 {dimension_numbers = #tpu.dot_dimension_numbers<[1], [1], [0], [0], [0, 0, 1, 0], [], []>} : vector<8x8xbf16>, vector<8x8xbf16>, vector<8x8xf32> -> vector<8x8xf32>
    "tpu.trace_stop"() : () -> ()
    %64 = arith.addf %63, %1 : vector<8x8xf32>
    %cst_30 = arith.constant dense<0xFF800000> : vector<8xf32>
    %65 = vector.multi_reduction <maximumf>, %64, %cst_30 [1] : vector<8x8xf32> to vector<8xf32>
    %66 = vector.shape_cast %65 : vector<8xf32> to vector<8x1xf32>
    %67 = vector.broadcast %66 : vector<8x1xf32> to vector<8x8xf32>
    %68 = arith.subf %64, %67 : vector<8x8xf32>
    %69 = math.exp %68 : vector<8x8xf32>
    %cst_31 = arith.constant dense<0.000000e+00> : vector<8xf32>
    %70 = vector.multi_reduction <add>, %69, %cst_31 [1] : vector<8x8xf32> to vector<8xf32>
    %71 = vector.shape_cast %70 : vector<8xf32> to vector<8x1xf32>
    %72 = tpu.reciprocal %71 {approx = true} : vector<8x1xf32> -> vector<8x1xf32>
    %73 = vector.broadcast %72 : vector<8x1xf32> to vector<8x8xf32>
    %74 = arith.mulf %69, %73 : vector<8x8xf32>
    %75 = arith.truncf %74 : vector<8x8xf32> to vector<8x8xbf16>
    %cst_32 = arith.constant dense<0.000000e+00> : vector<8x8xf32>
    %76 = tpu.matmul %75, %62, %cst_32 {dimension_numbers = #tpu.dot_dimension_numbers<[1], [0], [0], [1], [0, 0, 1, 1], [], []>} : vector<8x8xbf16>, vector<8x8xbf16>, vector<8x8xf32> -> vector<8x8xf32>
    %77 = arith.truncf %76 : vector<8x8xf32> to vector<8x8xbf16>
    %c1 = arith.constant 1 : index
    %c0_33 = arith.constant 0 : index
    %c0_34 = arith.constant 0 : index
    %78 = vector.load %arg7[%c1, %c0_33, %c0_34] : memref<16x8x32xbf16, #tpu.memory_space<vmem>>, vector<1x8x32xbf16>
    %79 = vector.shape_cast %78 : vector<1x8x32xbf16> to vector<8x32xbf16>
    %cst_35 = arith.constant dense<0.000000e+00> : vector<8x32xf32>
    %80 = tpu.matmul %77, %79, %cst_35 {dimension_numbers = #tpu.dot_dimension_numbers<[1], [0], [0], [1], [0, 0, 1, 1], [], []>} : vector<8x8xbf16>, vector<8x32xbf16>, vector<8x32xf32> -> vector<8x32xf32>
    %81 = arith.addf %59, %80 : vector<8x32xf32>
    %82 = vector.extract_strided_slice %36 {offsets = [0, 16], sizes = [8, 8], strides = [1, 1]} : vector<8x96xbf16> to vector<8x8xbf16>
    %83 = vector.extract_strided_slice %36 {offsets = [0, 48], sizes = [8, 8], strides = [1, 1]} : vector<8x96xbf16> to vector<8x8xbf16>
    %84 = vector.extract_strided_slice %36 {offsets = [0, 80], sizes = [8, 8], strides = [1, 1]} : vector<8x96xbf16> to vector<8x8xbf16>
    "tpu.trace_start"() <{level = 10 : i32, message = "qd,kd->qk"}> : () -> ()
    %cst_36 = arith.constant dense<0.000000e+00> : vector<8x8xf32>
    %85 = tpu.matmul %82, %83, %cst_36 {dimension_numbers = #tpu.dot_dimension_numbers<[1], [1], [0], [0], [0, 0, 1, 0], [], []>} : vector<8x8xbf16>, vector<8x8xbf16>, vector<8x8xf32> -> vector<8x8xf32>
    "tpu.trace_stop"() : () -> ()
    %86 = arith.addf %85, %1 : vector<8x8xf32>
    %cst_37 = arith.constant dense<0xFF800000> : vector<8xf32>
    %87 = vector.multi_reduction <maximumf>, %86, %cst_37 [1] : vector<8x8xf32> to vector<8xf32>
    %88 = vector.shape_cast %87 : vector<8xf32> to vector<8x1xf32>
    %89 = vector.broadcast %88 : vector<8x1xf32> to vector<8x8xf32>
    %90 = arith.subf %86, %89 : vector<8x8xf32>
    %91 = math.exp %90 : vector<8x8xf32>
    %cst_38 = arith.constant dense<0.000000e+00> : vector<8xf32>
    %92 = vector.multi_reduction <add>, %91, %cst_38 [1] : vector<8x8xf32> to vector<8xf32>
    %93 = vector.shape_cast %92 : vector<8xf32> to vector<8x1xf32>
    %94 = tpu.reciprocal %93 {approx = true} : vector<8x1xf32> -> vector<8x1xf32>
    %95 = vector.broadcast %94 : vector<8x1xf32> to vector<8x8xf32>
    %96 = arith.mulf %91, %95 : vector<8x8xf32>
    %97 = arith.truncf %96 : vector<8x8xf32> to vector<8x8xbf16>
    %cst_39 = arith.constant dense<0.000000e+00> : vector<8x8xf32>
    %98 = tpu.matmul %97, %84, %cst_39 {dimension_numbers = #tpu.dot_dimension_numbers<[1], [0], [0], [1], [0, 0, 1, 1], [], []>} : vector<8x8xbf16>, vector<8x8xbf16>, vector<8x8xf32> -> vector<8x8xf32>
    %99 = arith.truncf %98 : vector<8x8xf32> to vector<8x8xbf16>
    %c2 = arith.constant 2 : index
    %c0_40 = arith.constant 0 : index
    %c0_41 = arith.constant 0 : index
    %100 = vector.load %arg7[%c2, %c0_40, %c0_41] : memref<16x8x32xbf16, #tpu.memory_space<vmem>>, vector<1x8x32xbf16>
    %101 = vector.shape_cast %100 : vector<1x8x32xbf16> to vector<8x32xbf16>
    %cst_42 = arith.constant dense<0.000000e+00> : vector<8x32xf32>
    %102 = tpu.matmul %99, %101, %cst_42 {dimension_numbers = #tpu.dot_dimension_numbers<[1], [0], [0], [1], [0, 0, 1, 1], [], []>} : vector<8x8xbf16>, vector<8x32xbf16>, vector<8x32xf32> -> vector<8x32xf32>
    %103 = arith.addf %81, %102 : vector<8x32xf32>
    %104 = vector.extract_strided_slice %36 {offsets = [0, 24], sizes = [8, 8], strides = [1, 1]} : vector<8x96xbf16> to vector<8x8xbf16>
    %105 = vector.extract_strided_slice %36 {offsets = [0, 56], sizes = [8, 8], strides = [1, 1]} : vector<8x96xbf16> to vector<8x8xbf16>
    %106 = vector.extract_strided_slice %36 {offsets = [0, 88], sizes = [8, 8], strides = [1, 1]} : vector<8x96xbf16> to vector<8x8xbf16>
    "tpu.trace_start"() <{level = 10 : i32, message = "qd,kd->qk"}> : () -> ()
    %cst_43 = arith.constant dense<0.000000e+00> : vector<8x8xf32>
    %107 = tpu.matmul %104, %105, %cst_43 {dimension_numbers = #tpu.dot_dimension_numbers<[1], [1], [0], [0], [0, 0, 1, 0], [], []>} : vector<8x8xbf16>, vector<8x8xbf16>, vector<8x8xf32> -> vector<8x8xf32>
    "tpu.trace_stop"() : () -> ()
    %108 = arith.addf %107, %1 : vector<8x8xf32>
    %cst_44 = arith.constant dense<0xFF800000> : vector<8xf32>
    %109 = vector.multi_reduction <maximumf>, %108, %cst_44 [1] : vector<8x8xf32> to vector<8xf32>
    %110 = vector.shape_cast %109 : vector<8xf32> to vector<8x1xf32>
    %111 = vector.broadcast %110 : vector<8x1xf32> to vector<8x8xf32>
    %112 = arith.subf %108, %111 : vector<8x8xf32>
    %113 = math.exp %112 : vector<8x8xf32>
    %cst_45 = arith.constant dense<0.000000e+00> : vector<8xf32>
    %114 = vector.multi_reduction <add>, %113, %cst_45 [1] : vector<8x8xf32> to vector<8xf32>
    %115 = vector.shape_cast %114 : vector<8xf32> to vector<8x1xf32>
    %116 = tpu.reciprocal %115 {approx = true} : vector<8x1xf32> -> vector<8x1xf32>
    %117 = vector.broadcast %116 : vector<8x1xf32> to vector<8x8xf32>
    %118 = arith.mulf %113, %117 : vector<8x8xf32>
    %119 = arith.truncf %118 : vector<8x8xf32> to vector<8x8xbf16>
    %cst_46 = arith.constant dense<0.000000e+00> : vector<8x8xf32>
    %120 = tpu.matmul %119, %106, %cst_46 {dimension_numbers = #tpu.dot_dimension_numbers<[1], [0], [0], [1], [0, 0, 1, 1], [], []>} : vector<8x8xbf16>, vector<8x8xbf16>, vector<8x8xf32> -> vector<8x8xf32>
    %121 = arith.truncf %120 : vector<8x8xf32> to vector<8x8xbf16>
    %c3 = arith.constant 3 : index
    %c0_47 = arith.constant 0 : index
    %c0_48 = arith.constant 0 : index
    %122 = vector.load %arg7[%c3, %c0_47, %c0_48] : memref<16x8x32xbf16, #tpu.memory_space<vmem>>, vector<1x8x32xbf16>
    %123 = vector.shape_cast %122 : vector<1x8x32xbf16> to vector<8x32xbf16>
    %cst_49 = arith.constant dense<0.000000e+00> : vector<8x32xf32>
    %124 = tpu.matmul %121, %123, %cst_49 {dimension_numbers = #tpu.dot_dimension_numbers<[1], [0], [0], [1], [0, 0, 1, 1], [], []>} : vector<8x8xbf16>, vector<8x32xbf16>, vector<8x32xf32> -> vector<8x32xf32>
    %125 = arith.addf %103, %124 : vector<8x32xf32>
    %126 = arith.addf %0, %125 : vector<8x32xf32>
    %c0_50 = arith.constant 0 : index
    %c0_51 = arith.constant 0 : index
    %c0_52 = arith.constant 0 : index
    %127 = vector.load %arg8[%c0_50, %c0_51, %c0_52] : memref<4x1x32xf32, #tpu.memory_space<vmem>>, vector<1x1x32xf32>
    %128 = vector.shape_cast %127 : vector<1x1x32xf32> to vector<1x32xf32>
    %129 = vector.broadcast %128 : vector<1x32xf32> to vector<8x32xf32>
    %130 = arith.addf %126, %129 : vector<8x32xf32>
    %c1_53 = arith.constant 1 : index
    %c0_54 = arith.constant 0 : index
    %c0_55 = arith.constant 0 : index
    %131 = vector.load %arg3[%c1_53, %c0_54, %c0_55] : memref<4x1x32xf32, #tpu.memory_space<vmem>>, vector<1x1x32xf32>
    %132 = vector.shape_cast %131 : vector<1x1x32xf32> to vector<1x32xf32>
    %c1_56 = arith.constant 1 : index
    %c0_57 = arith.constant 0 : index
    %c0_58 = arith.constant 0 : index
    %133 = vector.load %arg4[%c1_56, %c0_57, %c0_58] : memref<4x1x32xf32, #tpu.memory_space<vmem>>, vector<1x1x32xf32>
    %134 = vector.shape_cast %133 : vector<1x1x32xf32> to vector<1x32xf32>
    %cst_59 = arith.constant dense<0.000000e+00> : vector<8xf32>
    %135 = vector.multi_reduction <add>, %130, %cst_59 [1] : vector<8x32xf32> to vector<8xf32>
    %136 = vector.shape_cast %135 : vector<8xf32> to vector<8x1xf32>
    %cst_60 = arith.constant 3.200000e+01 : f32
    %137 = vector.broadcast %cst_60 : f32 to vector<8x1xf32>
    %138 = arith.divf %136, %137 : vector<8x1xf32>
    %139 = vector.broadcast %138 : vector<8x1xf32> to vector<8x32xf32>
    %140 = arith.subf %130, %139 : vector<8x32xf32>
    %141 = arith.mulf %140, %140 : vector<8x32xf32>
    %cst_61 = arith.constant dense<0.000000e+00> : vector<8xf32>
    %142 = vector.multi_reduction <add>, %141, %cst_61 [1] : vector<8x32xf32> to vector<8xf32>
    %143 = vector.shape_cast %142 : vector<8xf32> to vector<8x1xf32>
    %cst_62 = arith.constant 3.200000e+01 : f32
    %144 = vector.broadcast %cst_62 : f32 to vector<8x1xf32>
    %145 = arith.divf %143, %144 : vector<8x1xf32>
    %146 = vector.broadcast %138 : vector<8x1xf32> to vector<8x32xf32>
    %147 = arith.subf %130, %146 : vector<8x32xf32>
    %cst_63 = arith.constant 9.99999974E-6 : f32
    %148 = vector.broadcast %cst_63 : f32 to vector<8x1xf32>
    %149 = arith.addf %145, %148 : vector<8x1xf32>
    %150 = math.rsqrt %149 : vector<8x1xf32>
    %151 = vector.broadcast %150 : vector<8x1xf32> to vector<8x32xf32>
    %152 = arith.mulf %147, %151 : vector<8x32xf32>
    %153 = vector.broadcast %132 : vector<1x32xf32> to vector<8x32xf32>
    %154 = arith.mulf %152, %153 : vector<8x32xf32>
    %155 = vector.broadcast %134 : vector<1x32xf32> to vector<8x32xf32>
    %156 = arith.addf %154, %155 : vector<8x32xf32>
    %157 = arith.truncf %156 : vector<8x32xf32> to vector<8x32xbf16>
    %c1_64 = arith.constant 1 : index
    %c0_65 = arith.constant 0 : index
    %c0_66 = arith.constant 0 : index
    %158 = vector.load %arg5[%c1_64, %c0_65, %c0_66] : memref<4x32x96xbf16, #tpu.memory_space<vmem>>, vector<1x32x96xbf16>
    %159 = vector.shape_cast %158 : vector<1x32x96xbf16> to vector<32x96xbf16>
    %cst_67 = arith.constant dense<0.000000e+00> : vector<8x96xf32>
    %160 = tpu.matmul %157, %159, %cst_67 {dimension_numbers = #tpu.dot_dimension_numbers<[1], [0], [0], [1], [0, 0, 1, 1], [], []>} : vector<8x32xbf16>, vector<32x96xbf16>, vector<8x96xf32> -> vector<8x96xf32>
    %c1_68 = arith.constant 1 : index
    %c0_69 = arith.constant 0 : index
    %c0_70 = arith.constant 0 : index
    %161 = vector.load %arg6[%c1_68, %c0_69, %c0_70] : memref<4x1x96xf32, #tpu.memory_space<vmem>>, vector<1x1x96xf32>
    %162 = vector.shape_cast %161 : vector<1x1x96xf32> to vector<1x96xf32>
    %163 = vector.broadcast %162 : vector<1x96xf32> to vector<8x96xf32>
    %164 = arith.addf %160, %163 : vector<8x96xf32>
    %165 = arith.truncf %164 : vector<8x96xf32> to vector<8x96xbf16>
    %cst_71 = arith.constant 0.000000e+00 : f32
    %166 = vector.broadcast %cst_71 : f32 to vector<8x32xf32>
    %167 = vector.extract_strided_slice %165 {offsets = [0, 0], sizes = [8, 8], strides = [1, 1]} : vector<8x96xbf16> to vector<8x8xbf16>
    %168 = vector.extract_strided_slice %165 {offsets = [0, 32], sizes = [8, 8], strides = [1, 1]} : vector<8x96xbf16> to vector<8x8xbf16>
    %169 = vector.extract_strided_slice %165 {offsets = [0, 64], sizes = [8, 8], strides = [1, 1]} : vector<8x96xbf16> to vector<8x8xbf16>
    "tpu.trace_start"() <{level = 10 : i32, message = "qd,kd->qk"}> : () -> ()
    %cst_72 = arith.constant dense<0.000000e+00> : vector<8x8xf32>
    %170 = tpu.matmul %167, %168, %cst_72 {dimension_numbers = #tpu.dot_dimension_numbers<[1], [1], [0], [0], [0, 0, 1, 0], [], []>} : vector<8x8xbf16>, vector<8x8xbf16>, vector<8x8xf32> -> vector<8x8xf32>
    "tpu.trace_stop"() : () -> ()
    %171 = arith.addf %170, %1 : vector<8x8xf32>
    %cst_73 = arith.constant dense<0xFF800000> : vector<8xf32>
    %172 = vector.multi_reduction <maximumf>, %171, %cst_73 [1] : vector<8x8xf32> to vector<8xf32>
    %173 = vector.shape_cast %172 : vector<8xf32> to vector<8x1xf32>
    %174 = vector.broadcast %173 : vector<8x1xf32> to vector<8x8xf32>
    %175 = arith.subf %171, %174 : vector<8x8xf32>
    %176 = math.exp %175 : vector<8x8xf32>
    %cst_74 = arith.constant dense<0.000000e+00> : vector<8xf32>
    %177 = vector.multi_reduction <add>, %176, %cst_74 [1] : vector<8x8xf32> to vector<8xf32>
    %178 = vector.shape_cast %177 : vector<8xf32> to vector<8x1xf32>
    %179 = tpu.reciprocal %178 {approx = true} : vector<8x1xf32> -> vector<8x1xf32>
    %180 = vector.broadcast %179 : vector<8x1xf32> to vector<8x8xf32>
    %181 = arith.mulf %176, %180 : vector<8x8xf32>
    %182 = arith.truncf %181 : vector<8x8xf32> to vector<8x8xbf16>
    %cst_75 = arith.constant dense<0.000000e+00> : vector<8x8xf32>
    %183 = tpu.matmul %182, %169, %cst_75 {dimension_numbers = #tpu.dot_dimension_numbers<[1], [0], [0], [1], [0, 0, 1, 1], [], []>} : vector<8x8xbf16>, vector<8x8xbf16>, vector<8x8xf32> -> vector<8x8xf32>
    %184 = arith.truncf %183 : vector<8x8xf32> to vector<8x8xbf16>
    %c4 = arith.constant 4 : index
    %c0_76 = arith.constant 0 : index
    %c0_77 = arith.constant 0 : index
    %185 = vector.load %arg7[%c4, %c0_76, %c0_77] : memref<16x8x32xbf16, #tpu.memory_space<vmem>>, vector<1x8x32xbf16>
    %186 = vector.shape_cast %185 : vector<1x8x32xbf16> to vector<8x32xbf16>
    %cst_78 = arith.constant dense<0.000000e+00> : vector<8x32xf32>
    %187 = tpu.matmul %184, %186, %cst_78 {dimension_numbers = #tpu.dot_dimension_numbers<[1], [0], [0], [1], [0, 0, 1, 1], [], []>} : vector<8x8xbf16>, vector<8x32xbf16>, vector<8x32xf32> -> vector<8x32xf32>
    %188 = arith.addf %166, %187 : vector<8x32xf32>
    %189 = vector.extract_strided_slice %165 {offsets = [0, 8], sizes = [8, 8], strides = [1, 1]} : vector<8x96xbf16> to vector<8x8xbf16>
    %190 = vector.extract_strided_slice %165 {offsets = [0, 40], sizes = [8, 8], strides = [1, 1]} : vector<8x96xbf16> to vector<8x8xbf16>
    %191 = vector.extract_strided_slice %165 {offsets = [0, 72], sizes = [8, 8], strides = [1, 1]} : vector<8x96xbf16> to vector<8x8xbf16>
    "tpu.trace_start"() <{level = 10 : i32, message = "qd,kd->qk"}> : () -> ()
    %cst_79 = arith.constant dense<0.000000e+00> : vector<8x8xf32>
    %192 = tpu.matmul %189, %190, %cst_79 {dimension_numbers = #tpu.dot_dimension_numbers<[1], [1], [0], [0], [0, 0, 1, 0], [], []>} : vector<8x8xbf16>, vector<8x8xbf16>, vector<8x8xf32> -> vector<8x8xf32>
    "tpu.trace_stop"() : () -> ()
    %193 = arith.addf %192, %1 : vector<8x8xf32>
    %cst_80 = arith.constant dense<0xFF800000> : vector<8xf32>
    %194 = vector.multi_reduction <maximumf>, %193, %cst_80 [1] : vector<8x8xf32> to vector<8xf32>
    %195 = vector.shape_cast %194 : vector<8xf32> to vector<8x1xf32>
    %196 = vector.broadcast %195 : vector<8x1xf32> to vector<8x8xf32>
    %197 = arith.subf %193, %196 : vector<8x8xf32>
    %198 = math.exp %197 : vector<8x8xf32>
    %cst_81 = arith.constant dense<0.000000e+00> : vector<8xf32>
    %199 = vector.multi_reduction <add>, %198, %cst_81 [1] : vector<8x8xf32> to vector<8xf32>
    %200 = vector.shape_cast %199 : vector<8xf32> to vector<8x1xf32>
    %201 = tpu.reciprocal %200 {approx = true} : vector<8x1xf32> -> vector<8x1xf32>
    %202 = vector.broadcast %201 : vector<8x1xf32> to vector<8x8xf32>
    %203 = arith.mulf %198, %202 : vector<8x8xf32>
    %204 = arith.truncf %203 : vector<8x8xf32> to vector<8x8xbf16>
    %cst_82 = arith.constant dense<0.000000e+00> : vector<8x8xf32>
    %205 = tpu.matmul %204, %191, %cst_82 {dimension_numbers = #tpu.dot_dimension_numbers<[1], [0], [0], [1], [0, 0, 1, 1], [], []>} : vector<8x8xbf16>, vector<8x8xbf16>, vector<8x8xf32> -> vector<8x8xf32>
    %206 = arith.truncf %205 : vector<8x8xf32> to vector<8x8xbf16>
    %c5 = arith.constant 5 : index
    %c0_83 = arith.constant 0 : index
    %c0_84 = arith.constant 0 : index
    %207 = vector.load %arg7[%c5, %c0_83, %c0_84] : memref<16x8x32xbf16, #tpu.memory_space<vmem>>, vector<1x8x32xbf16>
    %208 = vector.shape_cast %207 : vector<1x8x32xbf16> to vector<8x32xbf16>
    %cst_85 = arith.constant dense<0.000000e+00> : vector<8x32xf32>
    %209 = tpu.matmul %206, %208, %cst_85 {dimension_numbers = #tpu.dot_dimension_numbers<[1], [0], [0], [1], [0, 0, 1, 1], [], []>} : vector<8x8xbf16>, vector<8x32xbf16>, vector<8x32xf32> -> vector<8x32xf32>
    %210 = arith.addf %188, %209 : vector<8x32xf32>
    %211 = vector.extract_strided_slice %165 {offsets = [0, 16], sizes = [8, 8], strides = [1, 1]} : vector<8x96xbf16> to vector<8x8xbf16>
    %212 = vector.extract_strided_slice %165 {offsets = [0, 48], sizes = [8, 8], strides = [1, 1]} : vector<8x96xbf16> to vector<8x8xbf16>
    %213 = vector.extract_strided_slice %165 {offsets = [0, 80], sizes = [8, 8], strides = [1, 1]} : vector<8x96xbf16> to vector<8x8xbf16>
    "tpu.trace_start"() <{level = 10 : i32, message = "qd,kd->qk"}> : () -> ()
    %cst_86 = arith.constant dense<0.000000e+00> : vector<8x8xf32>
    %214 = tpu.matmul %211, %212, %cst_86 {dimension_numbers = #tpu.dot_dimension_numbers<[1], [1], [0], [0], [0, 0, 1, 0], [], []>} : vector<8x8xbf16>, vector<8x8xbf16>, vector<8x8xf32> -> vector<8x8xf32>
    "tpu.trace_stop"() : () -> ()
    %215 = arith.addf %214, %1 : vector<8x8xf32>
    %cst_87 = arith.constant dense<0xFF800000> : vector<8xf32>
    %216 = vector.multi_reduction <maximumf>, %215, %cst_87 [1] : vector<8x8xf32> to vector<8xf32>
    %217 = vector.shape_cast %216 : vector<8xf32> to vector<8x1xf32>
    %218 = vector.broadcast %217 : vector<8x1xf32> to vector<8x8xf32>
    %219 = arith.subf %215, %218 : vector<8x8xf32>
    %220 = math.exp %219 : vector<8x8xf32>
    %cst_88 = arith.constant dense<0.000000e+00> : vector<8xf32>
    %221 = vector.multi_reduction <add>, %220, %cst_88 [1] : vector<8x8xf32> to vector<8xf32>
    %222 = vector.shape_cast %221 : vector<8xf32> to vector<8x1xf32>
    %223 = tpu.reciprocal %222 {approx = true} : vector<8x1xf32> -> vector<8x1xf32>
    %224 = vector.broadcast %223 : vector<8x1xf32> to vector<8x8xf32>
    %225 = arith.mulf %220, %224 : vector<8x8xf32>
    %226 = arith.truncf %225 : vector<8x8xf32> to vector<8x8xbf16>
    %cst_89 = arith.constant dense<0.000000e+00> : vector<8x8xf32>
    %227 = tpu.matmul %226, %213, %cst_89 {dimension_numbers = #tpu.dot_dimension_numbers<[1], [0], [0], [1], [0, 0, 1, 1], [], []>} : vector<8x8xbf16>, vector<8x8xbf16>, vector<8x8xf32> -> vector<8x8xf32>
    %228 = arith.truncf %227 : vector<8x8xf32> to vector<8x8xbf16>
    %c6 = arith.constant 6 : index
    %c0_90 = arith.constant 0 : index
    %c0_91 = arith.constant 0 : index
    %229 = vector.load %arg7[%c6, %c0_90, %c0_91] : memref<16x8x32xbf16, #tpu.memory_space<vmem>>, vector<1x8x32xbf16>
    %230 = vector.shape_cast %229 : vector<1x8x32xbf16> to vector<8x32xbf16>
    %cst_92 = arith.constant dense<0.000000e+00> : vector<8x32xf32>
    %231 = tpu.matmul %228, %230, %cst_92 {dimension_numbers = #tpu.dot_dimension_numbers<[1], [0], [0], [1], [0, 0, 1, 1], [], []>} : vector<8x8xbf16>, vector<8x32xbf16>, vector<8x32xf32> -> vector<8x32xf32>
    %232 = arith.addf %210, %231 : vector<8x32xf32>
    %233 = vector.extract_strided_slice %165 {offsets = [0, 24], sizes = [8, 8], strides = [1, 1]} : vector<8x96xbf16> to vector<8x8xbf16>
    %234 = vector.extract_strided_slice %165 {offsets = [0, 56], sizes = [8, 8], strides = [1, 1]} : vector<8x96xbf16> to vector<8x8xbf16>
    %235 = vector.extract_strided_slice %165 {offsets = [0, 88], sizes = [8, 8], strides = [1, 1]} : vector<8x96xbf16> to vector<8x8xbf16>
    "tpu.trace_start"() <{level = 10 : i32, message = "qd,kd->qk"}> : () -> ()
    %cst_93 = arith.constant dense<0.000000e+00> : vector<8x8xf32>
    %236 = tpu.matmul %233, %234, %cst_93 {dimension_numbers = #tpu.dot_dimension_numbers<[1], [1], [0], [0], [0, 0, 1, 0], [], []>} : vector<8x8xbf16>, vector<8x8xbf16>, vector<8x8xf32> -> vector<8x8xf32>
    "tpu.trace_stop"() : () -> ()
    %237 = arith.addf %236, %1 : vector<8x8xf32>
    %cst_94 = arith.constant dense<0xFF800000> : vector<8xf32>
    %238 = vector.multi_reduction <maximumf>, %237, %cst_94 [1] : vector<8x8xf32> to vector<8xf32>
    %239 = vector.shape_cast %238 : vector<8xf32> to vector<8x1xf32>
    %240 = vector.broadcast %239 : vector<8x1xf32> to vector<8x8xf32>
    %241 = arith.subf %237, %240 : vector<8x8xf32>
    %242 = math.exp %241 : vector<8x8xf32>
    %cst_95 = arith.constant dense<0.000000e+00> : vector<8xf32>
    %243 = vector.multi_reduction <add>, %242, %cst_95 [1] : vector<8x8xf32> to vector<8xf32>
    %244 = vector.shape_cast %243 : vector<8xf32> to vector<8x1xf32>
    %245 = tpu.reciprocal %244 {approx = true} : vector<8x1xf32> -> vector<8x1xf32>
    %246 = vector.broadcast %245 : vector<8x1xf32> to vector<8x8xf32>
    %247 = arith.mulf %242, %246 : vector<8x8xf32>
    %248 = arith.truncf %247 : vector<8x8xf32> to vector<8x8xbf16>
    %cst_96 = arith.constant dense<0.000000e+00> : vector<8x8xf32>
    %249 = tpu.matmul %248, %235, %cst_96 {dimension_numbers = #tpu.dot_dimension_numbers<[1], [0], [0], [1], [0, 0, 1, 1], [], []>} : vector<8x8xbf16>, vector<8x8xbf16>, vector<8x8xf32> -> vector<8x8xf32>
    %250 = arith.truncf %249 : vector<8x8xf32> to vector<8x8xbf16>
    %c7 = arith.constant 7 : index
    %c0_97 = arith.constant 0 : index
    %c0_98 = arith.constant 0 : index
    %251 = vector.load %arg7[%c7, %c0_97, %c0_98] : memref<16x8x32xbf16, #tpu.memory_space<vmem>>, vector<1x8x32xbf16>
    %252 = vector.shape_cast %251 : vector<1x8x32xbf16> to vector<8x32xbf16>
    %cst_99 = arith.constant dense<0.000000e+00> : vector<8x32xf32>
    %253 = tpu.matmul %250, %252, %cst_99 {dimension_numbers = #tpu.dot_dimension_numbers<[1], [0], [0], [1], [0, 0, 1, 1], [], []>} : vector<8x8xbf16>, vector<8x32xbf16>, vector<8x32xf32> -> vector<8x32xf32>
    %254 = arith.addf %232, %253 : vector<8x32xf32>
    %255 = arith.addf %130, %254 : vector<8x32xf32>
    %c1_100 = arith.constant 1 : index
    %c0_101 = arith.constant 0 : index
    %c0_102 = arith.constant 0 : index
    %256 = vector.load %arg8[%c1_100, %c0_101, %c0_102] : memref<4x1x32xf32, #tpu.memory_space<vmem>>, vector<1x1x32xf32>
    %257 = vector.shape_cast %256 : vector<1x1x32xf32> to vector<1x32xf32>
    %258 = vector.broadcast %257 : vector<1x32xf32> to vector<8x32xf32>
    %259 = arith.addf %255, %258 : vector<8x32xf32>
    %c0_103 = arith.constant 0 : index
    %c0_104 = arith.constant 0 : index
    %c0_105 = arith.constant 0 : index
    %260 = vector.load %arg9[%c0_103, %c0_104, %c0_105] : memref<2x1x32xf32, #tpu.memory_space<vmem>>, vector<1x1x32xf32>
    %261 = vector.shape_cast %260 : vector<1x1x32xf32> to vector<1x32xf32>
    %c0_106 = arith.constant 0 : index
    %c0_107 = arith.constant 0 : index
    %c0_108 = arith.constant 0 : index
    %262 = vector.load %arg10[%c0_106, %c0_107, %c0_108] : memref<2x1x32xf32, #tpu.memory_space<vmem>>, vector<1x1x32xf32>
    %263 = vector.shape_cast %262 : vector<1x1x32xf32> to vector<1x32xf32>
    %cst_109 = arith.constant dense<0.000000e+00> : vector<8xf32>
    %264 = vector.multi_reduction <add>, %259, %cst_109 [1] : vector<8x32xf32> to vector<8xf32>
    %265 = vector.shape_cast %264 : vector<8xf32> to vector<8x1xf32>
    %cst_110 = arith.constant 3.200000e+01 : f32
    %266 = vector.broadcast %cst_110 : f32 to vector<8x1xf32>
    %267 = arith.divf %265, %266 : vector<8x1xf32>
    %268 = vector.broadcast %267 : vector<8x1xf32> to vector<8x32xf32>
    %269 = arith.subf %259, %268 : vector<8x32xf32>
    %270 = arith.mulf %269, %269 : vector<8x32xf32>
    %cst_111 = arith.constant dense<0.000000e+00> : vector<8xf32>
    %271 = vector.multi_reduction <add>, %270, %cst_111 [1] : vector<8x32xf32> to vector<8xf32>
    %272 = vector.shape_cast %271 : vector<8xf32> to vector<8x1xf32>
    %cst_112 = arith.constant 3.200000e+01 : f32
    %273 = vector.broadcast %cst_112 : f32 to vector<8x1xf32>
    %274 = arith.divf %272, %273 : vector<8x1xf32>
    %275 = vector.broadcast %267 : vector<8x1xf32> to vector<8x32xf32>
    %276 = arith.subf %259, %275 : vector<8x32xf32>
    %cst_113 = arith.constant 9.99999974E-6 : f32
    %277 = vector.broadcast %cst_113 : f32 to vector<8x1xf32>
    %278 = arith.addf %274, %277 : vector<8x1xf32>
    %279 = math.rsqrt %278 : vector<8x1xf32>
    %280 = vector.broadcast %279 : vector<8x1xf32> to vector<8x32xf32>
    %281 = arith.mulf %276, %280 : vector<8x32xf32>
    %282 = vector.broadcast %261 : vector<1x32xf32> to vector<8x32xf32>
    %283 = arith.mulf %281, %282 : vector<8x32xf32>
    %284 = vector.broadcast %263 : vector<1x32xf32> to vector<8x32xf32>
    %285 = arith.addf %283, %284 : vector<8x32xf32>
    %286 = arith.truncf %285 : vector<8x32xf32> to vector<8x32xbf16>
    %c0_114 = arith.constant 0 : index
    %c0_115 = arith.constant 0 : index
    %c0_116 = arith.constant 0 : index
    %287 = vector.load %arg11[%c0_114, %c0_115, %c0_116] : memref<2x32x64xbf16, #tpu.memory_space<vmem>>, vector<1x32x64xbf16>
    %288 = vector.shape_cast %287 : vector<1x32x64xbf16> to vector<32x64xbf16>
    %cst_117 = arith.constant dense<0.000000e+00> : vector<8x64xf32>
    %289 = tpu.matmul %286, %288, %cst_117 {dimension_numbers = #tpu.dot_dimension_numbers<[1], [0], [0], [1], [0, 0, 1, 1], [], []>} : vector<8x32xbf16>, vector<32x64xbf16>, vector<8x64xf32> -> vector<8x64xf32>
    %c0_118 = arith.constant 0 : index
    %c0_119 = arith.constant 0 : index
    %c0_120 = arith.constant 0 : index
    %290 = vector.load %arg12[%c0_118, %c0_119, %c0_120] : memref<2x1x64xf32, #tpu.memory_space<vmem>>, vector<1x1x64xf32>
    %291 = vector.shape_cast %290 : vector<1x1x64xf32> to vector<1x64xf32>
    %292 = vector.broadcast %291 : vector<1x64xf32> to vector<8x64xf32>
    %293 = arith.addf %289, %292 : vector<8x64xf32>
    %cst_121 = arith.constant 0.000000e+00 : f32
    %294 = vector.broadcast %cst_121 : f32 to vector<8x64xf32>
    %295 = arith.maximumf %293, %294 : vector<8x64xf32>
    %296 = arith.truncf %295 : vector<8x64xf32> to vector<8x64xbf16>
    %c0_122 = arith.constant 0 : index
    %c0_123 = arith.constant 0 : index
    %c0_124 = arith.constant 0 : index
    %297 = vector.load %arg13[%c0_122, %c0_123, %c0_124] : memref<2x64x32xbf16, #tpu.memory_space<vmem>>, vector<1x64x32xbf16>
    %298 = vector.shape_cast %297 : vector<1x64x32xbf16> to vector<64x32xbf16>
    %cst_125 = arith.constant dense<0.000000e+00> : vector<8x32xf32>
    %299 = tpu.matmul %296, %298, %cst_125 {dimension_numbers = #tpu.dot_dimension_numbers<[1], [0], [0], [1], [0, 0, 1, 1], [], []>} : vector<8x64xbf16>, vector<64x32xbf16>, vector<8x32xf32> -> vector<8x32xf32>
    %c0_126 = arith.constant 0 : index
    %c0_127 = arith.constant 0 : index
    %c0_128 = arith.constant 0 : index
    %300 = vector.load %arg14[%c0_126, %c0_127, %c0_128] : memref<2x1x32xf32, #tpu.memory_space<vmem>>, vector<1x1x32xf32>
    %301 = vector.shape_cast %300 : vector<1x1x32xf32> to vector<1x32xf32>
    %302 = vector.broadcast %301 : vector<1x32xf32> to vector<8x32xf32>
    %303 = arith.addf %299, %302 : vector<8x32xf32>
    %304 = arith.addf %259, %303 : vector<8x32xf32>
    %c2_129 = arith.constant 2 : index
    %c0_130 = arith.constant 0 : index
    %c0_131 = arith.constant 0 : index
    %305 = vector.load %arg3[%c2_129, %c0_130, %c0_131] : memref<4x1x32xf32, #tpu.memory_space<vmem>>, vector<1x1x32xf32>
    %306 = vector.shape_cast %305 : vector<1x1x32xf32> to vector<1x32xf32>
    %c2_132 = arith.constant 2 : index
    %c0_133 = arith.constant 0 : index
    %c0_134 = arith.constant 0 : index
    %307 = vector.load %arg4[%c2_132, %c0_133, %c0_134] : memref<4x1x32xf32, #tpu.memory_space<vmem>>, vector<1x1x32xf32>
    %308 = vector.shape_cast %307 : vector<1x1x32xf32> to vector<1x32xf32>
    %cst_135 = arith.constant dense<0.000000e+00> : vector<8xf32>
    %309 = vector.multi_reduction <add>, %304, %cst_135 [1] : vector<8x32xf32> to vector<8xf32>
    %310 = vector.shape_cast %309 : vector<8xf32> to vector<8x1xf32>
    %cst_136 = arith.constant 3.200000e+01 : f32
    %311 = vector.broadcast %cst_136 : f32 to vector<8x1xf32>
    %312 = arith.divf %310, %311 : vector<8x1xf32>
    %313 = vector.broadcast %312 : vector<8x1xf32> to vector<8x32xf32>
    %314 = arith.subf %304, %313 : vector<8x32xf32>
    %315 = arith.mulf %314, %314 : vector<8x32xf32>
    %cst_137 = arith.constant dense<0.000000e+00> : vector<8xf32>
    %316 = vector.multi_reduction <add>, %315, %cst_137 [1] : vector<8x32xf32> to vector<8xf32>
    %317 = vector.shape_cast %316 : vector<8xf32> to vector<8x1xf32>
    %cst_138 = arith.constant 3.200000e+01 : f32
    %318 = vector.broadcast %cst_138 : f32 to vector<8x1xf32>
    %319 = arith.divf %317, %318 : vector<8x1xf32>
    %320 = vector.broadcast %312 : vector<8x1xf32> to vector<8x32xf32>
    %321 = arith.subf %304, %320 : vector<8x32xf32>
    %cst_139 = arith.constant 9.99999974E-6 : f32
    %322 = vector.broadcast %cst_139 : f32 to vector<8x1xf32>
    %323 = arith.addf %319, %322 : vector<8x1xf32>
    %324 = math.rsqrt %323 : vector<8x1xf32>
    %325 = vector.broadcast %324 : vector<8x1xf32> to vector<8x32xf32>
    %326 = arith.mulf %321, %325 : vector<8x32xf32>
    %327 = vector.broadcast %306 : vector<1x32xf32> to vector<8x32xf32>
    %328 = arith.mulf %326, %327 : vector<8x32xf32>
    %329 = vector.broadcast %308 : vector<1x32xf32> to vector<8x32xf32>
    %330 = arith.addf %328, %329 : vector<8x32xf32>
    %331 = arith.truncf %330 : vector<8x32xf32> to vector<8x32xbf16>
    %c2_140 = arith.constant 2 : index
    %c0_141 = arith.constant 0 : index
    %c0_142 = arith.constant 0 : index
    %332 = vector.load %arg5[%c2_140, %c0_141, %c0_142] : memref<4x32x96xbf16, #tpu.memory_space<vmem>>, vector<1x32x96xbf16>
    %333 = vector.shape_cast %332 : vector<1x32x96xbf16> to vector<32x96xbf16>
    %cst_143 = arith.constant dense<0.000000e+00> : vector<8x96xf32>
    %334 = tpu.matmul %331, %333, %cst_143 {dimension_numbers = #tpu.dot_dimension_numbers<[1], [0], [0], [1], [0, 0, 1, 1], [], []>} : vector<8x32xbf16>, vector<32x96xbf16>, vector<8x96xf32> -> vector<8x96xf32>
    %c2_144 = arith.constant 2 : index
    %c0_145 = arith.constant 0 : index
    %c0_146 = arith.constant 0 : index
    %335 = vector.load %arg6[%c2_144, %c0_145, %c0_146] : memref<4x1x96xf32, #tpu.memory_space<vmem>>, vector<1x1x96xf32>
    %336 = vector.shape_cast %335 : vector<1x1x96xf32> to vector<1x96xf32>
    %337 = vector.broadcast %336 : vector<1x96xf32> to vector<8x96xf32>
    %338 = arith.addf %334, %337 : vector<8x96xf32>
    %339 = arith.truncf %338 : vector<8x96xf32> to vector<8x96xbf16>
    %cst_147 = arith.constant 0.000000e+00 : f32
    %340 = vector.broadcast %cst_147 : f32 to vector<8x32xf32>
    %341 = vector.extract_strided_slice %339 {offsets = [0, 0], sizes = [8, 8], strides = [1, 1]} : vector<8x96xbf16> to vector<8x8xbf16>
    %342 = vector.extract_strided_slice %339 {offsets = [0, 32], sizes = [8, 8], strides = [1, 1]} : vector<8x96xbf16> to vector<8x8xbf16>
    %343 = vector.extract_strided_slice %339 {offsets = [0, 64], sizes = [8, 8], strides = [1, 1]} : vector<8x96xbf16> to vector<8x8xbf16>
    "tpu.trace_start"() <{level = 10 : i32, message = "qd,kd->qk"}> : () -> ()
    %cst_148 = arith.constant dense<0.000000e+00> : vector<8x8xf32>
    %344 = tpu.matmul %341, %342, %cst_148 {dimension_numbers = #tpu.dot_dimension_numbers<[1], [1], [0], [0], [0, 0, 1, 0], [], []>} : vector<8x8xbf16>, vector<8x8xbf16>, vector<8x8xf32> -> vector<8x8xf32>
    "tpu.trace_stop"() : () -> ()
    %345 = arith.addf %344, %1 : vector<8x8xf32>
    %cst_149 = arith.constant dense<0xFF800000> : vector<8xf32>
    %346 = vector.multi_reduction <maximumf>, %345, %cst_149 [1] : vector<8x8xf32> to vector<8xf32>
    %347 = vector.shape_cast %346 : vector<8xf32> to vector<8x1xf32>
    %348 = vector.broadcast %347 : vector<8x1xf32> to vector<8x8xf32>
    %349 = arith.subf %345, %348 : vector<8x8xf32>
    %350 = math.exp %349 : vector<8x8xf32>
    %cst_150 = arith.constant dense<0.000000e+00> : vector<8xf32>
    %351 = vector.multi_reduction <add>, %350, %cst_150 [1] : vector<8x8xf32> to vector<8xf32>
    %352 = vector.shape_cast %351 : vector<8xf32> to vector<8x1xf32>
    %353 = tpu.reciprocal %352 {approx = true} : vector<8x1xf32> -> vector<8x1xf32>
    %354 = vector.broadcast %353 : vector<8x1xf32> to vector<8x8xf32>
    %355 = arith.mulf %350, %354 : vector<8x8xf32>
    %356 = arith.truncf %355 : vector<8x8xf32> to vector<8x8xbf16>
    %cst_151 = arith.constant dense<0.000000e+00> : vector<8x8xf32>
    %357 = tpu.matmul %356, %343, %cst_151 {dimension_numbers = #tpu.dot_dimension_numbers<[1], [0], [0], [1], [0, 0, 1, 1], [], []>} : vector<8x8xbf16>, vector<8x8xbf16>, vector<8x8xf32> -> vector<8x8xf32>
    %358 = arith.truncf %357 : vector<8x8xf32> to vector<8x8xbf16>
    %c8 = arith.constant 8 : index
    %c0_152 = arith.constant 0 : index
    %c0_153 = arith.constant 0 : index
    %359 = vector.load %arg7[%c8, %c0_152, %c0_153] : memref<16x8x32xbf16, #tpu.memory_space<vmem>>, vector<1x8x32xbf16>
    %360 = vector.shape_cast %359 : vector<1x8x32xbf16> to vector<8x32xbf16>
    %cst_154 = arith.constant dense<0.000000e+00> : vector<8x32xf32>
    %361 = tpu.matmul %358, %360, %cst_154 {dimension_numbers = #tpu.dot_dimension_numbers<[1], [0], [0], [1], [0, 0, 1, 1], [], []>} : vector<8x8xbf16>, vector<8x32xbf16>, vector<8x32xf32> -> vector<8x32xf32>
    %362 = arith.addf %340, %361 : vector<8x32xf32>
    %363 = vector.extract_strided_slice %339 {offsets = [0, 8], sizes = [8, 8], strides = [1, 1]} : vector<8x96xbf16> to vector<8x8xbf16>
    %364 = vector.extract_strided_slice %339 {offsets = [0, 40], sizes = [8, 8], strides = [1, 1]} : vector<8x96xbf16> to vector<8x8xbf16>
    %365 = vector.extract_strided_slice %339 {offsets = [0, 72], sizes = [8, 8], strides = [1, 1]} : vector<8x96xbf16> to vector<8x8xbf16>
    "tpu.trace_start"() <{level = 10 : i32, message = "qd,kd->qk"}> : () -> ()
    %cst_155 = arith.constant dense<0.000000e+00> : vector<8x8xf32>
    %366 = tpu.matmul %363, %364, %cst_155 {dimension_numbers = #tpu.dot_dimension_numbers<[1], [1], [0], [0], [0, 0, 1, 0], [], []>} : vector<8x8xbf16>, vector<8x8xbf16>, vector<8x8xf32> -> vector<8x8xf32>
    "tpu.trace_stop"() : () -> ()
    %367 = arith.addf %366, %1 : vector<8x8xf32>
    %cst_156 = arith.constant dense<0xFF800000> : vector<8xf32>
    %368 = vector.multi_reduction <maximumf>, %367, %cst_156 [1] : vector<8x8xf32> to vector<8xf32>
    %369 = vector.shape_cast %368 : vector<8xf32> to vector<8x1xf32>
    %370 = vector.broadcast %369 : vector<8x1xf32> to vector<8x8xf32>
    %371 = arith.subf %367, %370 : vector<8x8xf32>
    %372 = math.exp %371 : vector<8x8xf32>
    %cst_157 = arith.constant dense<0.000000e+00> : vector<8xf32>
    %373 = vector.multi_reduction <add>, %372, %cst_157 [1] : vector<8x8xf32> to vector<8xf32>
    %374 = vector.shape_cast %373 : vector<8xf32> to vector<8x1xf32>
    %375 = tpu.reciprocal %374 {approx = true} : vector<8x1xf32> -> vector<8x1xf32>
    %376 = vector.broadcast %375 : vector<8x1xf32> to vector<8x8xf32>
    %377 = arith.mulf %372, %376 : vector<8x8xf32>
    %378 = arith.truncf %377 : vector<8x8xf32> to vector<8x8xbf16>
    %cst_158 = arith.constant dense<0.000000e+00> : vector<8x8xf32>
    %379 = tpu.matmul %378, %365, %cst_158 {dimension_numbers = #tpu.dot_dimension_numbers<[1], [0], [0], [1], [0, 0, 1, 1], [], []>} : vector<8x8xbf16>, vector<8x8xbf16>, vector<8x8xf32> -> vector<8x8xf32>
    %380 = arith.truncf %379 : vector<8x8xf32> to vector<8x8xbf16>
    %c9 = arith.constant 9 : index
    %c0_159 = arith.constant 0 : index
    %c0_160 = arith.constant 0 : index
    %381 = vector.load %arg7[%c9, %c0_159, %c0_160] : memref<16x8x32xbf16, #tpu.memory_space<vmem>>, vector<1x8x32xbf16>
    %382 = vector.shape_cast %381 : vector<1x8x32xbf16> to vector<8x32xbf16>
    %cst_161 = arith.constant dense<0.000000e+00> : vector<8x32xf32>
    %383 = tpu.matmul %380, %382, %cst_161 {dimension_numbers = #tpu.dot_dimension_numbers<[1], [0], [0], [1], [0, 0, 1, 1], [], []>} : vector<8x8xbf16>, vector<8x32xbf16>, vector<8x32xf32> -> vector<8x32xf32>
    %384 = arith.addf %362, %383 : vector<8x32xf32>
    %385 = vector.extract_strided_slice %339 {offsets = [0, 16], sizes = [8, 8], strides = [1, 1]} : vector<8x96xbf16> to vector<8x8xbf16>
    %386 = vector.extract_strided_slice %339 {offsets = [0, 48], sizes = [8, 8], strides = [1, 1]} : vector<8x96xbf16> to vector<8x8xbf16>
    %387 = vector.extract_strided_slice %339 {offsets = [0, 80], sizes = [8, 8], strides = [1, 1]} : vector<8x96xbf16> to vector<8x8xbf16>
    "tpu.trace_start"() <{level = 10 : i32, message = "qd,kd->qk"}> : () -> ()
    %cst_162 = arith.constant dense<0.000000e+00> : vector<8x8xf32>
    %388 = tpu.matmul %385, %386, %cst_162 {dimension_numbers = #tpu.dot_dimension_numbers<[1], [1], [0], [0], [0, 0, 1, 0], [], []>} : vector<8x8xbf16>, vector<8x8xbf16>, vector<8x8xf32> -> vector<8x8xf32>
    "tpu.trace_stop"() : () -> ()
    %389 = arith.addf %388, %1 : vector<8x8xf32>
    %cst_163 = arith.constant dense<0xFF800000> : vector<8xf32>
    %390 = vector.multi_reduction <maximumf>, %389, %cst_163 [1] : vector<8x8xf32> to vector<8xf32>
    %391 = vector.shape_cast %390 : vector<8xf32> to vector<8x1xf32>
    %392 = vector.broadcast %391 : vector<8x1xf32> to vector<8x8xf32>
    %393 = arith.subf %389, %392 : vector<8x8xf32>
    %394 = math.exp %393 : vector<8x8xf32>
    %cst_164 = arith.constant dense<0.000000e+00> : vector<8xf32>
    %395 = vector.multi_reduction <add>, %394, %cst_164 [1] : vector<8x8xf32> to vector<8xf32>
    %396 = vector.shape_cast %395 : vector<8xf32> to vector<8x1xf32>
    %397 = tpu.reciprocal %396 {approx = true} : vector<8x1xf32> -> vector<8x1xf32>
    %398 = vector.broadcast %397 : vector<8x1xf32> to vector<8x8xf32>
    %399 = arith.mulf %394, %398 : vector<8x8xf32>
    %400 = arith.truncf %399 : vector<8x8xf32> to vector<8x8xbf16>
    %cst_165 = arith.constant dense<0.000000e+00> : vector<8x8xf32>
    %401 = tpu.matmul %400, %387, %cst_165 {dimension_numbers = #tpu.dot_dimension_numbers<[1], [0], [0], [1], [0, 0, 1, 1], [], []>} : vector<8x8xbf16>, vector<8x8xbf16>, vector<8x8xf32> -> vector<8x8xf32>
    %402 = arith.truncf %401 : vector<8x8xf32> to vector<8x8xbf16>
    %c10 = arith.constant 10 : index
    %c0_166 = arith.constant 0 : index
    %c0_167 = arith.constant 0 : index
    %403 = vector.load %arg7[%c10, %c0_166, %c0_167] : memref<16x8x32xbf16, #tpu.memory_space<vmem>>, vector<1x8x32xbf16>
    %404 = vector.shape_cast %403 : vector<1x8x32xbf16> to vector<8x32xbf16>
    %cst_168 = arith.constant dense<0.000000e+00> : vector<8x32xf32>
    %405 = tpu.matmul %402, %404, %cst_168 {dimension_numbers = #tpu.dot_dimension_numbers<[1], [0], [0], [1], [0, 0, 1, 1], [], []>} : vector<8x8xbf16>, vector<8x32xbf16>, vector<8x32xf32> -> vector<8x32xf32>
    %406 = arith.addf %384, %405 : vector<8x32xf32>
    %407 = vector.extract_strided_slice %339 {offsets = [0, 24], sizes = [8, 8], strides = [1, 1]} : vector<8x96xbf16> to vector<8x8xbf16>
    %408 = vector.extract_strided_slice %339 {offsets = [0, 56], sizes = [8, 8], strides = [1, 1]} : vector<8x96xbf16> to vector<8x8xbf16>
    %409 = vector.extract_strided_slice %339 {offsets = [0, 88], sizes = [8, 8], strides = [1, 1]} : vector<8x96xbf16> to vector<8x8xbf16>
    "tpu.trace_start"() <{level = 10 : i32, message = "qd,kd->qk"}> : () -> ()
    %cst_169 = arith.constant dense<0.000000e+00> : vector<8x8xf32>
    %410 = tpu.matmul %407, %408, %cst_169 {dimension_numbers = #tpu.dot_dimension_numbers<[1], [1], [0], [0], [0, 0, 1, 0], [], []>} : vector<8x8xbf16>, vector<8x8xbf16>, vector<8x8xf32> -> vector<8x8xf32>
    "tpu.trace_stop"() : () -> ()
    %411 = arith.addf %410, %1 : vector<8x8xf32>
    %cst_170 = arith.constant dense<0xFF800000> : vector<8xf32>
    %412 = vector.multi_reduction <maximumf>, %411, %cst_170 [1] : vector<8x8xf32> to vector<8xf32>
    %413 = vector.shape_cast %412 : vector<8xf32> to vector<8x1xf32>
    %414 = vector.broadcast %413 : vector<8x1xf32> to vector<8x8xf32>
    %415 = arith.subf %411, %414 : vector<8x8xf32>
    %416 = math.exp %415 : vector<8x8xf32>
    %cst_171 = arith.constant dense<0.000000e+00> : vector<8xf32>
    %417 = vector.multi_reduction <add>, %416, %cst_171 [1] : vector<8x8xf32> to vector<8xf32>
    %418 = vector.shape_cast %417 : vector<8xf32> to vector<8x1xf32>
    %419 = tpu.reciprocal %418 {approx = true} : vector<8x1xf32> -> vector<8x1xf32>
    %420 = vector.broadcast %419 : vector<8x1xf32> to vector<8x8xf32>
    %421 = arith.mulf %416, %420 : vector<8x8xf32>
    %422 = arith.truncf %421 : vector<8x8xf32> to vector<8x8xbf16>
    %cst_172 = arith.constant dense<0.000000e+00> : vector<8x8xf32>
    %423 = tpu.matmul %422, %409, %cst_172 {dimension_numbers = #tpu.dot_dimension_numbers<[1], [0], [0], [1], [0, 0, 1, 1], [], []>} : vector<8x8xbf16>, vector<8x8xbf16>, vector<8x8xf32> -> vector<8x8xf32>
    %424 = arith.truncf %423 : vector<8x8xf32> to vector<8x8xbf16>
    %c11 = arith.constant 11 : index
    %c0_173 = arith.constant 0 : index
    %c0_174 = arith.constant 0 : index
    %425 = vector.load %arg7[%c11, %c0_173, %c0_174] : memref<16x8x32xbf16, #tpu.memory_space<vmem>>, vector<1x8x32xbf16>
    %426 = vector.shape_cast %425 : vector<1x8x32xbf16> to vector<8x32xbf16>
    %cst_175 = arith.constant dense<0.000000e+00> : vector<8x32xf32>
    %427 = tpu.matmul %424, %426, %cst_175 {dimension_numbers = #tpu.dot_dimension_numbers<[1], [0], [0], [1], [0, 0, 1, 1], [], []>} : vector<8x8xbf16>, vector<8x32xbf16>, vector<8x32xf32> -> vector<8x32xf32>
    %428 = arith.addf %406, %427 : vector<8x32xf32>
    %429 = arith.addf %304, %428 : vector<8x32xf32>
    %c2_176 = arith.constant 2 : index
    %c0_177 = arith.constant 0 : index
    %c0_178 = arith.constant 0 : index
    %430 = vector.load %arg8[%c2_176, %c0_177, %c0_178] : memref<4x1x32xf32, #tpu.memory_space<vmem>>, vector<1x1x32xf32>
    %431 = vector.shape_cast %430 : vector<1x1x32xf32> to vector<1x32xf32>
    %432 = vector.broadcast %431 : vector<1x32xf32> to vector<8x32xf32>
    %433 = arith.addf %429, %432 : vector<8x32xf32>
    %c3_179 = arith.constant 3 : index
    %c0_180 = arith.constant 0 : index
    %c0_181 = arith.constant 0 : index
    %434 = vector.load %arg3[%c3_179, %c0_180, %c0_181] : memref<4x1x32xf32, #tpu.memory_space<vmem>>, vector<1x1x32xf32>
    %435 = vector.shape_cast %434 : vector<1x1x32xf32> to vector<1x32xf32>
    %c3_182 = arith.constant 3 : index
    %c0_183 = arith.constant 0 : index
    %c0_184 = arith.constant 0 : index
    %436 = vector.load %arg4[%c3_182, %c0_183, %c0_184] : memref<4x1x32xf32, #tpu.memory_space<vmem>>, vector<1x1x32xf32>
    %437 = vector.shape_cast %436 : vector<1x1x32xf32> to vector<1x32xf32>
    %cst_185 = arith.constant dense<0.000000e+00> : vector<8xf32>
    %438 = vector.multi_reduction <add>, %433, %cst_185 [1] : vector<8x32xf32> to vector<8xf32>
    %439 = vector.shape_cast %438 : vector<8xf32> to vector<8x1xf32>
    %cst_186 = arith.constant 3.200000e+01 : f32
    %440 = vector.broadcast %cst_186 : f32 to vector<8x1xf32>
    %441 = arith.divf %439, %440 : vector<8x1xf32>
    %442 = vector.broadcast %441 : vector<8x1xf32> to vector<8x32xf32>
    %443 = arith.subf %433, %442 : vector<8x32xf32>
    %444 = arith.mulf %443, %443 : vector<8x32xf32>
    %cst_187 = arith.constant dense<0.000000e+00> : vector<8xf32>
    %445 = vector.multi_reduction <add>, %444, %cst_187 [1] : vector<8x32xf32> to vector<8xf32>
    %446 = vector.shape_cast %445 : vector<8xf32> to vector<8x1xf32>
    %cst_188 = arith.constant 3.200000e+01 : f32
    %447 = vector.broadcast %cst_188 : f32 to vector<8x1xf32>
    %448 = arith.divf %446, %447 : vector<8x1xf32>
    %449 = vector.broadcast %441 : vector<8x1xf32> to vector<8x32xf32>
    %450 = arith.subf %433, %449 : vector<8x32xf32>
    %cst_189 = arith.constant 9.99999974E-6 : f32
    %451 = vector.broadcast %cst_189 : f32 to vector<8x1xf32>
    %452 = arith.addf %448, %451 : vector<8x1xf32>
    %453 = math.rsqrt %452 : vector<8x1xf32>
    %454 = vector.broadcast %453 : vector<8x1xf32> to vector<8x32xf32>
    %455 = arith.mulf %450, %454 : vector<8x32xf32>
    %456 = vector.broadcast %435 : vector<1x32xf32> to vector<8x32xf32>
    %457 = arith.mulf %455, %456 : vector<8x32xf32>
    %458 = vector.broadcast %437 : vector<1x32xf32> to vector<8x32xf32>
    %459 = arith.addf %457, %458 : vector<8x32xf32>
    %460 = arith.truncf %459 : vector<8x32xf32> to vector<8x32xbf16>
    %c3_190 = arith.constant 3 : index
    %c0_191 = arith.constant 0 : index
    %c0_192 = arith.constant 0 : index
    %461 = vector.load %arg5[%c3_190, %c0_191, %c0_192] : memref<4x32x96xbf16, #tpu.memory_space<vmem>>, vector<1x32x96xbf16>
    %462 = vector.shape_cast %461 : vector<1x32x96xbf16> to vector<32x96xbf16>
    %cst_193 = arith.constant dense<0.000000e+00> : vector<8x96xf32>
    %463 = tpu.matmul %460, %462, %cst_193 {dimension_numbers = #tpu.dot_dimension_numbers<[1], [0], [0], [1], [0, 0, 1, 1], [], []>} : vector<8x32xbf16>, vector<32x96xbf16>, vector<8x96xf32> -> vector<8x96xf32>
    %c3_194 = arith.constant 3 : index
    %c0_195 = arith.constant 0 : index
    %c0_196 = arith.constant 0 : index
    %464 = vector.load %arg6[%c3_194, %c0_195, %c0_196] : memref<4x1x96xf32, #tpu.memory_space<vmem>>, vector<1x1x96xf32>
    %465 = vector.shape_cast %464 : vector<1x1x96xf32> to vector<1x96xf32>
    %466 = vector.broadcast %465 : vector<1x96xf32> to vector<8x96xf32>
    %467 = arith.addf %463, %466 : vector<8x96xf32>
    %468 = arith.truncf %467 : vector<8x96xf32> to vector<8x96xbf16>
    %cst_197 = arith.constant 0.000000e+00 : f32
    %469 = vector.broadcast %cst_197 : f32 to vector<8x32xf32>
    %470 = vector.extract_strided_slice %468 {offsets = [0, 0], sizes = [8, 8], strides = [1, 1]} : vector<8x96xbf16> to vector<8x8xbf16>
    %471 = vector.extract_strided_slice %468 {offsets = [0, 32], sizes = [8, 8], strides = [1, 1]} : vector<8x96xbf16> to vector<8x8xbf16>
    %472 = vector.extract_strided_slice %468 {offsets = [0, 64], sizes = [8, 8], strides = [1, 1]} : vector<8x96xbf16> to vector<8x8xbf16>
    "tpu.trace_start"() <{level = 10 : i32, message = "qd,kd->qk"}> : () -> ()
    %cst_198 = arith.constant dense<0.000000e+00> : vector<8x8xf32>
    %473 = tpu.matmul %470, %471, %cst_198 {dimension_numbers = #tpu.dot_dimension_numbers<[1], [1], [0], [0], [0, 0, 1, 0], [], []>} : vector<8x8xbf16>, vector<8x8xbf16>, vector<8x8xf32> -> vector<8x8xf32>
    "tpu.trace_stop"() : () -> ()
    %474 = arith.addf %473, %1 : vector<8x8xf32>
    %cst_199 = arith.constant dense<0xFF800000> : vector<8xf32>
    %475 = vector.multi_reduction <maximumf>, %474, %cst_199 [1] : vector<8x8xf32> to vector<8xf32>
    %476 = vector.shape_cast %475 : vector<8xf32> to vector<8x1xf32>
    %477 = vector.broadcast %476 : vector<8x1xf32> to vector<8x8xf32>
    %478 = arith.subf %474, %477 : vector<8x8xf32>
    %479 = math.exp %478 : vector<8x8xf32>
    %cst_200 = arith.constant dense<0.000000e+00> : vector<8xf32>
    %480 = vector.multi_reduction <add>, %479, %cst_200 [1] : vector<8x8xf32> to vector<8xf32>
    %481 = vector.shape_cast %480 : vector<8xf32> to vector<8x1xf32>
    %482 = tpu.reciprocal %481 {approx = true} : vector<8x1xf32> -> vector<8x1xf32>
    %483 = vector.broadcast %482 : vector<8x1xf32> to vector<8x8xf32>
    %484 = arith.mulf %479, %483 : vector<8x8xf32>
    %485 = arith.truncf %484 : vector<8x8xf32> to vector<8x8xbf16>
    %cst_201 = arith.constant dense<0.000000e+00> : vector<8x8xf32>
    %486 = tpu.matmul %485, %472, %cst_201 {dimension_numbers = #tpu.dot_dimension_numbers<[1], [0], [0], [1], [0, 0, 1, 1], [], []>} : vector<8x8xbf16>, vector<8x8xbf16>, vector<8x8xf32> -> vector<8x8xf32>
    %487 = arith.truncf %486 : vector<8x8xf32> to vector<8x8xbf16>
    %c12 = arith.constant 12 : index
    %c0_202 = arith.constant 0 : index
    %c0_203 = arith.constant 0 : index
    %488 = vector.load %arg7[%c12, %c0_202, %c0_203] : memref<16x8x32xbf16, #tpu.memory_space<vmem>>, vector<1x8x32xbf16>
    %489 = vector.shape_cast %488 : vector<1x8x32xbf16> to vector<8x32xbf16>
    %cst_204 = arith.constant dense<0.000000e+00> : vector<8x32xf32>
    %490 = tpu.matmul %487, %489, %cst_204 {dimension_numbers = #tpu.dot_dimension_numbers<[1], [0], [0], [1], [0, 0, 1, 1], [], []>} : vector<8x8xbf16>, vector<8x32xbf16>, vector<8x32xf32> -> vector<8x32xf32>
    %491 = arith.addf %469, %490 : vector<8x32xf32>
    %492 = vector.extract_strided_slice %468 {offsets = [0, 8], sizes = [8, 8], strides = [1, 1]} : vector<8x96xbf16> to vector<8x8xbf16>
    %493 = vector.extract_strided_slice %468 {offsets = [0, 40], sizes = [8, 8], strides = [1, 1]} : vector<8x96xbf16> to vector<8x8xbf16>
    %494 = vector.extract_strided_slice %468 {offsets = [0, 72], sizes = [8, 8], strides = [1, 1]} : vector<8x96xbf16> to vector<8x8xbf16>
    "tpu.trace_start"() <{level = 10 : i32, message = "qd,kd->qk"}> : () -> ()
    %cst_205 = arith.constant dense<0.000000e+00> : vector<8x8xf32>
    %495 = tpu.matmul %492, %493, %cst_205 {dimension_numbers = #tpu.dot_dimension_numbers<[1], [1], [0], [0], [0, 0, 1, 0], [], []>} : vector<8x8xbf16>, vector<8x8xbf16>, vector<8x8xf32> -> vector<8x8xf32>
    "tpu.trace_stop"() : () -> ()
    %496 = arith.addf %495, %1 : vector<8x8xf32>
    %cst_206 = arith.constant dense<0xFF800000> : vector<8xf32>
    %497 = vector.multi_reduction <maximumf>, %496, %cst_206 [1] : vector<8x8xf32> to vector<8xf32>
    %498 = vector.shape_cast %497 : vector<8xf32> to vector<8x1xf32>
    %499 = vector.broadcast %498 : vector<8x1xf32> to vector<8x8xf32>
    %500 = arith.subf %496, %499 : vector<8x8xf32>
    %501 = math.exp %500 : vector<8x8xf32>
    %cst_207 = arith.constant dense<0.000000e+00> : vector<8xf32>
    %502 = vector.multi_reduction <add>, %501, %cst_207 [1] : vector<8x8xf32> to vector<8xf32>
    %503 = vector.shape_cast %502 : vector<8xf32> to vector<8x1xf32>
    %504 = tpu.reciprocal %503 {approx = true} : vector<8x1xf32> -> vector<8x1xf32>
    %505 = vector.broadcast %504 : vector<8x1xf32> to vector<8x8xf32>
    %506 = arith.mulf %501, %505 : vector<8x8xf32>
    %507 = arith.truncf %506 : vector<8x8xf32> to vector<8x8xbf16>
    %cst_208 = arith.constant dense<0.000000e+00> : vector<8x8xf32>
    %508 = tpu.matmul %507, %494, %cst_208 {dimension_numbers = #tpu.dot_dimension_numbers<[1], [0], [0], [1], [0, 0, 1, 1], [], []>} : vector<8x8xbf16>, vector<8x8xbf16>, vector<8x8xf32> -> vector<8x8xf32>
    %509 = arith.truncf %508 : vector<8x8xf32> to vector<8x8xbf16>
    %c13 = arith.constant 13 : index
    %c0_209 = arith.constant 0 : index
    %c0_210 = arith.constant 0 : index
    %510 = vector.load %arg7[%c13, %c0_209, %c0_210] : memref<16x8x32xbf16, #tpu.memory_space<vmem>>, vector<1x8x32xbf16>
    %511 = vector.shape_cast %510 : vector<1x8x32xbf16> to vector<8x32xbf16>
    %cst_211 = arith.constant dense<0.000000e+00> : vector<8x32xf32>
    %512 = tpu.matmul %509, %511, %cst_211 {dimension_numbers = #tpu.dot_dimension_numbers<[1], [0], [0], [1], [0, 0, 1, 1], [], []>} : vector<8x8xbf16>, vector<8x32xbf16>, vector<8x32xf32> -> vector<8x32xf32>
    %513 = arith.addf %491, %512 : vector<8x32xf32>
    %514 = vector.extract_strided_slice %468 {offsets = [0, 16], sizes = [8, 8], strides = [1, 1]} : vector<8x96xbf16> to vector<8x8xbf16>
    %515 = vector.extract_strided_slice %468 {offsets = [0, 48], sizes = [8, 8], strides = [1, 1]} : vector<8x96xbf16> to vector<8x8xbf16>
    %516 = vector.extract_strided_slice %468 {offsets = [0, 80], sizes = [8, 8], strides = [1, 1]} : vector<8x96xbf16> to vector<8x8xbf16>
    "tpu.trace_start"() <{level = 10 : i32, message = "qd,kd->qk"}> : () -> ()
    %cst_212 = arith.constant dense<0.000000e+00> : vector<8x8xf32>
    %517 = tpu.matmul %514, %515, %cst_212 {dimension_numbers = #tpu.dot_dimension_numbers<[1], [1], [0], [0], [0, 0, 1, 0], [], []>} : vector<8x8xbf16>, vector<8x8xbf16>, vector<8x8xf32> -> vector<8x8xf32>
    "tpu.trace_stop"() : () -> ()
    %518 = arith.addf %517, %1 : vector<8x8xf32>
    %cst_213 = arith.constant dense<0xFF800000> : vector<8xf32>
    %519 = vector.multi_reduction <maximumf>, %518, %cst_213 [1] : vector<8x8xf32> to vector<8xf32>
    %520 = vector.shape_cast %519 : vector<8xf32> to vector<8x1xf32>
    %521 = vector.broadcast %520 : vector<8x1xf32> to vector<8x8xf32>
    %522 = arith.subf %518, %521 : vector<8x8xf32>
    %523 = math.exp %522 : vector<8x8xf32>
    %cst_214 = arith.constant dense<0.000000e+00> : vector<8xf32>
    %524 = vector.multi_reduction <add>, %523, %cst_214 [1] : vector<8x8xf32> to vector<8xf32>
    %525 = vector.shape_cast %524 : vector<8xf32> to vector<8x1xf32>
    %526 = tpu.reciprocal %525 {approx = true} : vector<8x1xf32> -> vector<8x1xf32>
    %527 = vector.broadcast %526 : vector<8x1xf32> to vector<8x8xf32>
    %528 = arith.mulf %523, %527 : vector<8x8xf32>
    %529 = arith.truncf %528 : vector<8x8xf32> to vector<8x8xbf16>
    %cst_215 = arith.constant dense<0.000000e+00> : vector<8x8xf32>
    %530 = tpu.matmul %529, %516, %cst_215 {dimension_numbers = #tpu.dot_dimension_numbers<[1], [0], [0], [1], [0, 0, 1, 1], [], []>} : vector<8x8xbf16>, vector<8x8xbf16>, vector<8x8xf32> -> vector<8x8xf32>
    %531 = arith.truncf %530 : vector<8x8xf32> to vector<8x8xbf16>
    %c14 = arith.constant 14 : index
    %c0_216 = arith.constant 0 : index
    %c0_217 = arith.constant 0 : index
    %532 = vector.load %arg7[%c14, %c0_216, %c0_217] : memref<16x8x32xbf16, #tpu.memory_space<vmem>>, vector<1x8x32xbf16>
    %533 = vector.shape_cast %532 : vector<1x8x32xbf16> to vector<8x32xbf16>
    %cst_218 = arith.constant dense<0.000000e+00> : vector<8x32xf32>
    %534 = tpu.matmul %531, %533, %cst_218 {dimension_numbers = #tpu.dot_dimension_numbers<[1], [0], [0], [1], [0, 0, 1, 1], [], []>} : vector<8x8xbf16>, vector<8x32xbf16>, vector<8x32xf32> -> vector<8x32xf32>
    %535 = arith.addf %513, %534 : vector<8x32xf32>
    %536 = vector.extract_strided_slice %468 {offsets = [0, 24], sizes = [8, 8], strides = [1, 1]} : vector<8x96xbf16> to vector<8x8xbf16>
    %537 = vector.extract_strided_slice %468 {offsets = [0, 56], sizes = [8, 8], strides = [1, 1]} : vector<8x96xbf16> to vector<8x8xbf16>
    %538 = vector.extract_strided_slice %468 {offsets = [0, 88], sizes = [8, 8], strides = [1, 1]} : vector<8x96xbf16> to vector<8x8xbf16>
    "tpu.trace_start"() <{level = 10 : i32, message = "qd,kd->qk"}> : () -> ()
    %cst_219 = arith.constant dense<0.000000e+00> : vector<8x8xf32>
    %539 = tpu.matmul %536, %537, %cst_219 {dimension_numbers = #tpu.dot_dimension_numbers<[1], [1], [0], [0], [0, 0, 1, 0], [], []>} : vector<8x8xbf16>, vector<8x8xbf16>, vector<8x8xf32> -> vector<8x8xf32>
    "tpu.trace_stop"() : () -> ()
    %540 = arith.addf %539, %1 : vector<8x8xf32>
    %cst_220 = arith.constant dense<0xFF800000> : vector<8xf32>
    %541 = vector.multi_reduction <maximumf>, %540, %cst_220 [1] : vector<8x8xf32> to vector<8xf32>
    %542 = vector.shape_cast %541 : vector<8xf32> to vector<8x1xf32>
    %543 = vector.broadcast %542 : vector<8x1xf32> to vector<8x8xf32>
    %544 = arith.subf %540, %543 : vector<8x8xf32>
    %545 = math.exp %544 : vector<8x8xf32>
    %cst_221 = arith.constant dense<0.000000e+00> : vector<8xf32>
    %546 = vector.multi_reduction <add>, %545, %cst_221 [1] : vector<8x8xf32> to vector<8xf32>
    %547 = vector.shape_cast %546 : vector<8xf32> to vector<8x1xf32>
    %548 = tpu.reciprocal %547 {approx = true} : vector<8x1xf32> -> vector<8x1xf32>
    %549 = vector.broadcast %548 : vector<8x1xf32> to vector<8x8xf32>
    %550 = arith.mulf %545, %549 : vector<8x8xf32>
    %551 = arith.truncf %550 : vector<8x8xf32> to vector<8x8xbf16>
    %cst_222 = arith.constant dense<0.000000e+00> : vector<8x8xf32>
    %552 = tpu.matmul %551, %538, %cst_222 {dimension_numbers = #tpu.dot_dimension_numbers<[1], [0], [0], [1], [0, 0, 1, 1], [], []>} : vector<8x8xbf16>, vector<8x8xbf16>, vector<8x8xf32> -> vector<8x8xf32>
    %553 = arith.truncf %552 : vector<8x8xf32> to vector<8x8xbf16>
    %c15 = arith.constant 15 : index
    %c0_223 = arith.constant 0 : index
    %c0_224 = arith.constant 0 : index
    %554 = vector.load %arg7[%c15, %c0_223, %c0_224] : memref<16x8x32xbf16, #tpu.memory_space<vmem>>, vector<1x8x32xbf16>
    %555 = vector.shape_cast %554 : vector<1x8x32xbf16> to vector<8x32xbf16>
    %cst_225 = arith.constant dense<0.000000e+00> : vector<8x32xf32>
    %556 = tpu.matmul %553, %555, %cst_225 {dimension_numbers = #tpu.dot_dimension_numbers<[1], [0], [0], [1], [0, 0, 1, 1], [], []>} : vector<8x8xbf16>, vector<8x32xbf16>, vector<8x32xf32> -> vector<8x32xf32>
    %557 = arith.addf %535, %556 : vector<8x32xf32>
    %558 = arith.addf %433, %557 : vector<8x32xf32>
    %c3_226 = arith.constant 3 : index
    %c0_227 = arith.constant 0 : index
    %c0_228 = arith.constant 0 : index
    %559 = vector.load %arg8[%c3_226, %c0_227, %c0_228] : memref<4x1x32xf32, #tpu.memory_space<vmem>>, vector<1x1x32xf32>
    %560 = vector.shape_cast %559 : vector<1x1x32xf32> to vector<1x32xf32>
    %561 = vector.broadcast %560 : vector<1x32xf32> to vector<8x32xf32>
    %562 = arith.addf %558, %561 : vector<8x32xf32>
    %c1_229 = arith.constant 1 : index
    %c0_230 = arith.constant 0 : index
    %c0_231 = arith.constant 0 : index
    %563 = vector.load %arg9[%c1_229, %c0_230, %c0_231] : memref<2x1x32xf32, #tpu.memory_space<vmem>>, vector<1x1x32xf32>
    %564 = vector.shape_cast %563 : vector<1x1x32xf32> to vector<1x32xf32>
    %c1_232 = arith.constant 1 : index
    %c0_233 = arith.constant 0 : index
    %c0_234 = arith.constant 0 : index
    %565 = vector.load %arg10[%c1_232, %c0_233, %c0_234] : memref<2x1x32xf32, #tpu.memory_space<vmem>>, vector<1x1x32xf32>
    %566 = vector.shape_cast %565 : vector<1x1x32xf32> to vector<1x32xf32>
    %cst_235 = arith.constant dense<0.000000e+00> : vector<8xf32>
    %567 = vector.multi_reduction <add>, %562, %cst_235 [1] : vector<8x32xf32> to vector<8xf32>
    %568 = vector.shape_cast %567 : vector<8xf32> to vector<8x1xf32>
    %cst_236 = arith.constant 3.200000e+01 : f32
    %569 = vector.broadcast %cst_236 : f32 to vector<8x1xf32>
    %570 = arith.divf %568, %569 : vector<8x1xf32>
    %571 = vector.broadcast %570 : vector<8x1xf32> to vector<8x32xf32>
    %572 = arith.subf %562, %571 : vector<8x32xf32>
    %573 = arith.mulf %572, %572 : vector<8x32xf32>
    %cst_237 = arith.constant dense<0.000000e+00> : vector<8xf32>
    %574 = vector.multi_reduction <add>, %573, %cst_237 [1] : vector<8x32xf32> to vector<8xf32>
    %575 = vector.shape_cast %574 : vector<8xf32> to vector<8x1xf32>
    %cst_238 = arith.constant 3.200000e+01 : f32
    %576 = vector.broadcast %cst_238 : f32 to vector<8x1xf32>
    %577 = arith.divf %575, %576 : vector<8x1xf32>
    %578 = vector.broadcast %570 : vector<8x1xf32> to vector<8x32xf32>
    %579 = arith.subf %562, %578 : vector<8x32xf32>
    %cst_239 = arith.constant 9.99999974E-6 : f32
    %580 = vector.broadcast %cst_239 : f32 to vector<8x1xf32>
    %581 = arith.addf %577, %580 : vector<8x1xf32>
    %582 = math.rsqrt %581 : vector<8x1xf32>
    %583 = vector.broadcast %582 : vector<8x1xf32> to vector<8x32xf32>
    %584 = arith.mulf %579, %583 : vector<8x32xf32>
    %585 = vector.broadcast %564 : vector<1x32xf32> to vector<8x32xf32>
    %586 = arith.mulf %584, %585 : vector<8x32xf32>
    %587 = vector.broadcast %566 : vector<1x32xf32> to vector<8x32xf32>
    %588 = arith.addf %586, %587 : vector<8x32xf32>
    %589 = arith.truncf %588 : vector<8x32xf32> to vector<8x32xbf16>
    %c1_240 = arith.constant 1 : index
    %c0_241 = arith.constant 0 : index
    %c0_242 = arith.constant 0 : index
    %590 = vector.load %arg11[%c1_240, %c0_241, %c0_242] : memref<2x32x64xbf16, #tpu.memory_space<vmem>>, vector<1x32x64xbf16>
    %591 = vector.shape_cast %590 : vector<1x32x64xbf16> to vector<32x64xbf16>
    %cst_243 = arith.constant dense<0.000000e+00> : vector<8x64xf32>
    %592 = tpu.matmul %589, %591, %cst_243 {dimension_numbers = #tpu.dot_dimension_numbers<[1], [0], [0], [1], [0, 0, 1, 1], [], []>} : vector<8x32xbf16>, vector<32x64xbf16>, vector<8x64xf32> -> vector<8x64xf32>
    %c1_244 = arith.constant 1 : index
    %c0_245 = arith.constant 0 : index
    %c0_246 = arith.constant 0 : index
    %593 = vector.load %arg12[%c1_244, %c0_245, %c0_246] : memref<2x1x64xf32, #tpu.memory_space<vmem>>, vector<1x1x64xf32>
    %594 = vector.shape_cast %593 : vector<1x1x64xf32> to vector<1x64xf32>
    %595 = vector.broadcast %594 : vector<1x64xf32> to vector<8x64xf32>
    %596 = arith.addf %592, %595 : vector<8x64xf32>
    %cst_247 = arith.constant 0.000000e+00 : f32
    %597 = vector.broadcast %cst_247 : f32 to vector<8x64xf32>
    %598 = arith.maximumf %596, %597 : vector<8x64xf32>
    %599 = arith.truncf %598 : vector<8x64xf32> to vector<8x64xbf16>
    %c1_248 = arith.constant 1 : index
    %c0_249 = arith.constant 0 : index
    %c0_250 = arith.constant 0 : index
    %600 = vector.load %arg13[%c1_248, %c0_249, %c0_250] : memref<2x64x32xbf16, #tpu.memory_space<vmem>>, vector<1x64x32xbf16>
    %601 = vector.shape_cast %600 : vector<1x64x32xbf16> to vector<64x32xbf16>
    %cst_251 = arith.constant dense<0.000000e+00> : vector<8x32xf32>
    %602 = tpu.matmul %599, %601, %cst_251 {dimension_numbers = #tpu.dot_dimension_numbers<[1], [0], [0], [1], [0, 0, 1, 1], [], []>} : vector<8x64xbf16>, vector<64x32xbf16>, vector<8x32xf32> -> vector<8x32xf32>
    %c1_252 = arith.constant 1 : index
    %c0_253 = arith.constant 0 : index
    %c0_254 = arith.constant 0 : index
    %603 = vector.load %arg14[%c1_252, %c0_253, %c0_254] : memref<2x1x32xf32, #tpu.memory_space<vmem>>, vector<1x1x32xf32>
    %604 = vector.shape_cast %603 : vector<1x1x32xf32> to vector<1x32xf32>
    %605 = vector.broadcast %604 : vector<1x32xf32> to vector<8x32xf32>
    %606 = arith.addf %602, %605 : vector<8x32xf32>
    %607 = arith.addf %562, %606 : vector<8x32xf32>
    %c0_255 = arith.constant 0 : index
    %c0_256 = arith.constant 0 : index
    %608 = vector.load %arg15[%c0_255, %c0_256] : memref<1x32xf32, #tpu.memory_space<vmem>>, vector<1x32xf32>
    %c0_257 = arith.constant 0 : index
    %c0_258 = arith.constant 0 : index
    %609 = vector.load %arg16[%c0_257, %c0_258] : memref<1x32xf32, #tpu.memory_space<vmem>>, vector<1x32xf32>
    %cst_259 = arith.constant dense<0.000000e+00> : vector<8xf32>
    %610 = vector.multi_reduction <add>, %607, %cst_259 [1] : vector<8x32xf32> to vector<8xf32>
    %611 = vector.shape_cast %610 : vector<8xf32> to vector<8x1xf32>
    %cst_260 = arith.constant 3.200000e+01 : f32
    %612 = vector.broadcast %cst_260 : f32 to vector<8x1xf32>
    %613 = arith.divf %611, %612 : vector<8x1xf32>
    %614 = vector.broadcast %613 : vector<8x1xf32> to vector<8x32xf32>
    %615 = arith.subf %607, %614 : vector<8x32xf32>
    %616 = arith.mulf %615, %615 : vector<8x32xf32>
    %cst_261 = arith.constant dense<0.000000e+00> : vector<8xf32>
    %617 = vector.multi_reduction <add>, %616, %cst_261 [1] : vector<8x32xf32> to vector<8xf32>
    %618 = vector.shape_cast %617 : vector<8xf32> to vector<8x1xf32>
    %cst_262 = arith.constant 3.200000e+01 : f32
    %619 = vector.broadcast %cst_262 : f32 to vector<8x1xf32>
    %620 = arith.divf %618, %619 : vector<8x1xf32>
    %621 = vector.broadcast %613 : vector<8x1xf32> to vector<8x32xf32>
    %622 = arith.subf %607, %621 : vector<8x32xf32>
    %cst_263 = arith.constant 9.99999974E-6 : f32
    %623 = vector.broadcast %cst_263 : f32 to vector<8x1xf32>
    %624 = arith.addf %620, %623 : vector<8x1xf32>
    %625 = math.rsqrt %624 : vector<8x1xf32>
    %626 = vector.broadcast %625 : vector<8x1xf32> to vector<8x32xf32>
    %627 = arith.mulf %622, %626 : vector<8x32xf32>
    %628 = vector.broadcast %608 : vector<1x32xf32> to vector<8x32xf32>
    %629 = arith.mulf %627, %628 : vector<8x32xf32>
    %630 = vector.broadcast %609 : vector<1x32xf32> to vector<8x32xf32>
    %631 = arith.addf %629, %630 : vector<8x32xf32>
    %c0_264 = arith.constant 0 : index
    %c0_265 = arith.constant 0 : index
    %632 = vector.load %arg17[%c0_264, %c0_265] : memref<8x32xf32, #tpu.memory_space<vmem>>, vector<8x32xf32>
    tpu.vector_store %arg17[%c0_264, %c0_265], %631 {strides = array<i32>} : memref<8x32xf32, #tpu.memory_space<vmem>>, vector<8x32xf32>,
    return
  }
  func.func @transform_0(%arg0: i32) -> (i32, i32) {
    %c0_i32 = arith.constant 0 : i32
    %c0_i32_0 = arith.constant 0 : i32
    return %arg0, %c0_i32 : i32, i32
  }
  func.func @transform_1(%arg0: i32) -> (i32, i32) {
    %c0_i32 = arith.constant 0 : i32
    %c0_i32_0 = arith.constant 0 : i32
    %c0_i32_1 = arith.constant 0 : i32
    return %c0_i32, %c0_i32_0 : i32, i32
  }
  func.func @transform_2(%arg0: i32) -> (i32, i32, i32) {
    %c0_i32 = arith.constant 0 : i32
    %c0_i32_0 = arith.constant 0 : i32
    %c0_i32_1 = arith.constant 0 : i32
    %c0_i32_2 = arith.constant 0 : i32
    return %c0_i32, %c0_i32_0, %c0_i32_1 : i32, i32, i32
  }
  func.func @transform_3(%arg0: i32) -> (i32, i32, i32) {
    %c0_i32 = arith.constant 0 : i32
    %c0_i32_0 = arith.constant 0 : i32
    %c0_i32_1 = arith.constant 0 : i32
    %c0_i32_2 = arith.constant 0 : i32
    return %c0_i32, %c0_i32_0, %c0_i32_1 : i32, i32, i32
  }
  func.func @transform_4(%arg0: i32) -> (i32, i32, i32) {
    %c0_i32 = arith.constant 0 : i32
    %c0_i32_0 = arith.constant 0 : i32
    %c0_i32_1 = arith.constant 0 : i32
    %c0_i32_2 = arith.constant 0 : i32
    return %c0_i32, %c0_i32_0, %c0_i32_1 : i32, i32, i32
  }
  func.func @transform_5(%arg0: i32) -> (i32, i32, i32) {
    %c0_i32 = arith.constant 0 : i32
    %c0_i32_0 = arith.constant 0 : i32
    %c0_i32_1 = arith.constant 0 : i32
    %c0_i32_2 = arith.constant 0 : i32
    return %c0_i32, %c0_i32_0, %c0_i32_1 : i32, i32, i32
  }
  func.func @transform_6(%arg0: i32) -> (i32, i32, i32) {
    %c0_i32 = arith.constant 0 : i32
    %c0_i32_0 = arith.constant 0 : i32
    %c0_i32_1 = arith.constant 0 : i32
    %c0_i32_2 = arith.constant 0 : i32
    return %c0_i32, %c0_i32_0, %c0_i32_1 : i32, i32, i32
  }
  func.func @transform_7(%arg0: i32) -> (i32, i32, i32) {
    %c0_i32 = arith.constant 0 : i32
    %c0_i32_0 = arith.constant 0 : i32
    %c0_i32_1 = arith.constant 0 : i32
    %c0_i32_2 = arith.constant 0 : i32
    return %c0_i32, %c0_i32_0, %c0_i32_1 : i32, i32, i32
  }
  func.func @transform_8(%arg0: i32) -> (i32, i32, i32) {
    %c0_i32 = arith.constant 0 : i32
    %c0_i32_0 = arith.constant 0 : i32
    %c0_i32_1 = arith.constant 0 : i32
    %c0_i32_2 = arith.constant 0 : i32
    return %c0_i32, %c0_i32_0, %c0_i32_1 : i32, i32, i32
  }
  func.func @transform_9(%arg0: i32) -> (i32, i32, i32) {
    %c0_i32 = arith.constant 0 : i32
    %c0_i32_0 = arith.constant 0 : i32
    %c0_i32_1 = arith.constant 0 : i32
    %c0_i32_2 = arith.constant 0 : i32
    return %c0_i32, %c0_i32_0, %c0_i32_1 : i32, i32, i32
  }
  func.func @transform_10(%arg0: i32) -> (i32, i32, i32) {
    %c0_i32 = arith.constant 0 : i32
    %c0_i32_0 = arith.constant 0 : i32
    %c0_i32_1 = arith.constant 0 : i32
    %c0_i32_2 = arith.constant 0 : i32
    return %c0_i32, %c0_i32_0, %c0_i32_1 : i32, i32, i32
  }
  func.func @transform_11(%arg0: i32) -> (i32, i32, i32) {
    %c0_i32 = arith.constant 0 : i32
    %c0_i32_0 = arith.constant 0 : i32
    %c0_i32_1 = arith.constant 0 : i32
    %c0_i32_2 = arith.constant 0 : i32
    return %c0_i32, %c0_i32_0, %c0_i32_1 : i32, i32, i32
  }
  func.func @transform_12(%arg0: i32) -> (i32, i32, i32) {
    %c0_i32 = arith.constant 0 : i32
    %c0_i32_0 = arith.constant 0 : i32
    %c0_i32_1 = arith.constant 0 : i32
    %c0_i32_2 = arith.constant 0 : i32
    return %c0_i32, %c0_i32_0, %c0_i32_1 : i32, i32, i32
  }
  func.func @transform_13(%arg0: i32) -> (i32, i32, i32) {
    %c0_i32 = arith.constant 0 : i32
    %c0_i32_0 = arith.constant 0 : i32
    %c0_i32_1 = arith.constant 0 : i32
    %c0_i32_2 = arith.constant 0 : i32
    return %c0_i32, %c0_i32_0, %c0_i32_1 : i32, i32, i32
  }
  func.func @transform_14(%arg0: i32) -> (i32, i32) {
    %c0_i32 = arith.constant 0 : i32
    %c0_i32_0 = arith.constant 0 : i32
    %c0_i32_1 = arith.constant 0 : i32
    return %c0_i32, %c0_i32_0 : i32, i32
  }
  func.func @transform_15(%arg0: i32) -> (i32, i32) {
    %c0_i32 = arith.constant 0 : i32
    %c0_i32_0 = arith.constant 0 : i32
    %c0_i32_1 = arith.constant 0 : i32
    return %c0_i32, %c0_i32_0 : i32, i32
  }
  func.func @transform_16(%arg0: i32) -> (i32, i32) {
    %c0_i32 = arith.constant 0 : i32
    %c0_i32_0 = arith.constant 0 : i32
    return %arg0, %c0_i32 : i32, i32
  }
}

</mosaic_0001>

<bundles_post_ra>
// kernel: transformer_forward.1
= control target key start
LH: loop header
LB: loop body
LE: loop exit
PB: predicated region body
PF: predicated region fallthrough
CT: control target
= control target key end

     0   :  { %s5707_s0 = inlined_call_operand.vmem [shape: f32[16,32], index: 0, kind: input, shape index: {}]   ;;  %s5708_s1 = inlined_call_operand.vmem [shape: f32[8,8], index: 1, kind: input, shape index: {}]   ;;  %s5709_s2 = inlined_call_operand.vmem [shape: f32[4,1,32], index: 2, kind: input, shape index: {}]   ;;  %s5710_s3 = inlined_call_operand.vmem [shape: f32[4,1,32], index: 3, kind: input, shape index: {}]   ;;  %s5711_s4 = inlined_call_operand.vmem [shape: bf16[4,32,96], index: 4, kind: input, shape index: {}]   ;;  %s5712_s5 = inlined_call_operand.vmem [shape: f32[4,1,96], index: 5, kind: input, shape index: {}]   ;;  %s5713_s6 = inlined_call_operand.vmem [shape: bf16[16,8,32], index: 6, kind: input, shape index: {}]   ;;  %s5714_s7 = inlined_call_operand.vmem [shape: f32[4,1,32], index: 7, kind: input, shape index: {}]   ;;  %s5715_s8 = inlined_call_operand.vmem [shape: f32[2,1,32], index: 8, kind: input, shape index: {}]   ;;  %s5716_s9 = inlined_call_operand.vmem [shape: f32[2,1,32], index: 9, kind: input, shape index: {}]   ;;  %s5717_s10 = inlined_call_operand.vmem [shape: bf16[2,32,64], index: 10, kind: input, shape index: {}]   ;;  %s5718_s11 = inlined_call_operand.vmem [shape: f32[2,1,64], index: 11, kind: input, shape index: {}]   ;;  %s5719_s12 = inlined_call_operand.vmem [shape: bf16[2,64,32], index: 12, kind: input, shape index: {}]   ;;  %s5720_s13 = inlined_call_operand.vmem [shape: f32[2,1,32], index: 13, kind: input, shape index: {}]   ;;  %s5721_s14 = inlined_call_operand.vmem [shape: f32[1,32], index: 14, kind: input, shape index: {}]   ;;  %s5722_s15 = inlined_call_operand.vmem [shape: f32[1,32], index: 15, kind: input, shape index: {}]   ;;  %s5723_s16 = inlined_call_operand.hbm [shape: f32[16,32], index: 16, kind: output, shape index: {}]  }
   0x1   :  { %5757 = sst [smem:[#allocation14_spill]] %s5707_s0 }
   0x2   :  { %5758 = sst [smem:[#allocation15_spill]] %s5708_s1 }
   0x3   :  { %5759 = sst [smem:[#allocation16_spill]] %s5721_s14 }
   0x4   :  { %5760 = sst [smem:[#allocation17_spill]] %s5722_s15 }
   0x5   :  { %5761 = sst [smem:[#allocation18_spill]] %s5723_s16 }
   0x6   :  { %21 = vsyncpa [#allocation3], 0 }
   0x7   :  { %23 = vsyncpa [#allocation3 + $0x1], 0  ;;  %s4945_s21 = smov 0   ;;  %s4947_s22 = smov 0  }
   0x8   :  { %s4949_s23 = smov 0   ;;  %s4951_s24 = smov 0  }
   0x9 LB: > { %5762 = sst [smem:[#allocation5_spill]] %s4832_s21  ;;  %s4966_s25 = sadd.s32 4294967295, %s4844_s24   ;;  %s4844_s24 = sphi %s4951_s24, %s5796_s24   ;;  %s4840_s23 = sphi %s4949_s23, %s5799_s23   ;;  %s4836_s22 = sphi %s4947_s22, %s5798_s22   ;;  %s4832_s21 = sphi %s4945_s21, %s5797_s21  }
   0xa   : > { %5763 = sst [smem:[#allocation6_spill]] %s4836_s22  ;;  %s3982_s26 = sadd.s32 4294967294, %s4844_s24  }
   0xb   : > { %5764 = sst [smem:[#allocation7_spill]] %s4840_s23  ;;  %s4970_s27 = sadd.s32 1, %s4844_s24  }
   0xc   : > { %5765 = sst [smem:[#allocation8_spill]] %s4844_s24  ;;  %s377_s28 = sadd.s32 1, %s4840_s23 }
   0xd   : > { %5766 = sst [smem:[#allocation9_spill]] %s4966_s25  ;;  %s374_s29 = ssub.s32 %s4844_s24, %s4970_s27 }
   0xe   : > { %5767 = sst [smem:[#allocation10_spill]] %s4970_s27  ;;  %p387_p0 = scmp.ne.s32.totalorder %s4840_s23, %s4836_s22 }
   0xf   : > { %p375_p1 = scmp.eq.s32.totalorder %s374_s29, 0  ;;  %p388_p2 = scmp.eq.s32.totalorder %s4966_s25, 1 }
  0x10   : > { %p393_p3 = scmp.ne.s32.totalorder %s4836_s22, %s4832_s21  ;;  %p394_p4 = scmp.eq.s32.totalorder %s3982_s26, 1 }
  0x11   : > { %s4981_s30 = scalar_select %p375_p1, %s4840_s23, %s377_s28  }
  0x12   : > { %p4983_p5 = por %p388_p2, %p387_p0  ;;  %p4987_p6 = por %p394_p4, %p393_p3 }
  0x13   : > { %5768 = sst [smem:[#allocation11_spill]] %s4981_s30  ;;  %p3985_p7 = scmp.ge.s32.totalorder %s4844_s24, 1 }
  0x14   : > { %s5769_s0 = scalar_select %p4983_p5, 1, 0 }
  0x15   : > { %s5771_s17 = scalar_select %p4987_p6, 1, 0 }
  0x16   : > { %5770 = sst [smem:[#allocation12_spill]] %s5769_s0  ;;  %p464_p8 = scmp.lt.s32.totalorder %s4844_s24, 3 }
  0x17   : > { %5772 = sst [smem:[#allocation13_spill]] %s5771_s17 }
  0x18   : > { %p465_p9 = pnand %p3985_p7, %p464_p8 }
  0x19   : > { %p513_p10 = scmp.lt.s32.totalorder (!%p465_p9), %s4966_s25, 1  ;;  %s5773_s28 = sld [smem:[#allocation14_spill]] (!%p465_p9) }
  0x1a   : > { %468 = sbr.rel (%p465_p9) target bundleno = 12849 (0x3231), region = 84  ;;  %s5740_s20 = smov (!%p465_p9), 120  }
  0x1b   : > { %s5742_s30 = smov (!%p465_p9), 96   ;;  %s5744_s26 = smov (!%p465_p9), 88  }
  0x1c   : > { %s5774_s1 = sld [smem:[#allocation15_spill]] (!%p465_p9)  ;;  %s5781_s23 = smov (!%p465_p9), 72  }
  0x1d   : > { %s5782_s27 = smov (!%p465_p9), 104   ;;  %s5783_s17 = smov (!%p465_p9), 48  }
  0x1e   : > { %s5784_s21 = smov (!%p465_p9), 40   ;;  %s5785_s24 = smov (!%p465_p9), 88  }
  0x1f   : > { %s514_s18 = scalar_select %p513_p10, %s4966_s25, 1  ;;  %vm522_vm0 = vcmask 261120   ;;  %v4685_v7 = vld [vmem:[%s5711_s4 + $0x8] sm:$0xff]   ;;  %v4846_v8 = vmov 0.0   ;;  %vm4847_vm1 = vmmov 0   ;;  %v4686_v9 = vld [vmem:[%s5711_s4] sm:$0xff]  }
  0x20   : > { %4273 = vmatprep.subr.bf16.mxu1 %v4846_v8  ;;  %4277 = vmatprep.mubr.msk.bf16.mxu1 %vm4847_vm1, %v4846_v8  ;;  %v3988_v14 = vld [vmem:[%s5709_s2] ss:$0 sm:$0xff]  ;;  %vm622_vm2 = vcmask 64512   ;;  %vm686_vm3 = vcmask 1043456   ;;  %vm2151_vm4 = vcmask 523264   ;;  %s5786_s16 = sld [smem:[#allocation6_spill]] }
  0x21   : > { %s3987_s19 = sshll.u32 %s514_s18, 3  ;;  %4274 = vmatpush3.bf16.msra.mxu1 %v4685_v7  ;;  %4287 = vmatprep.subr.bf16.mxu0 %v4846_v8  ;;  %v3989_v16 = vld [vmem:[%s5710_s3] ss:$0 sm:$0xff]  ;;  %s5728_s18 = smov 56  }
  0x22   : > { %s516_s29 = scalar_lea.vmem %s5773_s28, %s3987_s19  ;;  %4275 = vmatprep.subr.bf16.mxu1 %v4846_v8  ;;  %4289 = vmatprep.mubr.msk.bf16.mxu0 %vm4847_vm1, %v4846_v8  ;;  %v3990_v20 = vld [vmem:[%s5712_s5] ss:$0 sm:$0xff]  ;;  %s5730_s19 = smov 64  }
  0x23   : > { %v4998_v0 = vld [vmem:[%s516_s29] sm:$0xff]  ;;  %s5724_s28 = smov 80   ;;  %s5726_s29 = smov 112  }
  0x24   : > { %v523_v1 = vsel %vm522_vm0, %v4998_v0, 0.0  ;;  %v5052_v32 = vld [vmem:[%s5774_s1] sm:$0xff]  ;;  %s5787_s14 = sld [smem:[#allocation9_spill]] }
  0x25   : > { %524 = vadd.xlane.f32.xlu0 %v523_v1  ;;  %4276 = vmatpush3.bf16.msra.mxu1 %v4686_v9 }
  0x26   : > { %4281 = vmatprep.subr.bf16.mxu1 %v4846_v8  ;;  %s510_s0 = sand.u32 1, %s5786_s16  }
  0x27   : > { %s3986_s22 = sshll.u32 %s510_s0, 3 }
  0xae   : > { %v525_v2 = vpop.xlane.xlu0 %524 }
  0xaf   : > { %v527_v3 = vmul.f32 0.03125, %v525_v2 }
  0xb1   : > { %v528_v4 = vsub.f32 %v4998_v0, %v527_v3 }
  0xb3   : > { %v529_v5 = vmul.f32 %v528_v4, %v528_v4 }
  0xb5   : > { %v530_v6 = vsel %vm522_vm0, %v529_v5, 0.0 }
  0xb6   : > { %531 = vadd.xlane.f32.xlu0 %v530_v6  ;;  %v3998_v6 = vld [vmem:[%s5713_s6 + $0x4] sm:$0xf] }
  0xb7   : > { %v849_v7 = vsel %vm686_vm3, %v3998_v6, 0 }
 0x13f   : > { %v532_v10 = vpop.xlane.xlu0 %531 }
 0x140   : > { %v533_v11 = vmul.f32 0.03125, %v532_v10 }
 0x142   : > { %v534_v12 = vadd.f32 1e-05, %v533_v11 }
 0x144   : > { %4705 = vrsqrt.f32 %v534_v12 }
 0x151   : > { %v4706_v13 = vpop.eup %4705 }
 0x152   : > { %v536_v15 = vmul.f32 %v4706_v13, %v528_v4  ;;  %v731_v4 = vld [vmem:[%s5713_s6] sm:$0xf] }
 0x153   : > { %v895_v5 = vsel %vm686_vm3, %v731_v4, 0 }
 0x154   : > { %v543_v17 = vmul.f32 %v3988_v14, %v536_v15 }
 0x156   : > { %v550_v18 = vadd.f32 %v3989_v16, %v543_v17 }
 0x158   : > { %v551_v19 = vpack.c.bf16 %v550_v18, %v550_v18 }
 0x15a   : > { %4278 = vmatmul.mubr.msk.bf16.vlgmr.msra.gmra.mxu1 %vm522_vm0, %v551_v19 }
 0x15b   : > { %4283 = vmatprep.mubr.msk.bf16.mxu1 %vm4847_vm1, %v4846_v8 }
 0x21a   : > { %v612_v21 = vpop.f32.mrf.mxu1 }
 0x21b   : > { %v613_v22 = vadd.f32 %v3990_v20, %v612_v21 }
 0x21c   : > { %v4279_v23 = vpop.f32.mrf.mxu1 }
 0x21d   : > { %v5030_v24 = vpack.c.bf16 %v613_v22, %v613_v22 }
 0x21e   : > { %v615_v25 = vpop.f32.mrf.mxu1 }
 0x21f   : > { %732 = vrot.lane.b32.xlu0 %v5030_v24, %s5740_s20  ;;  %620 = vrot.lane.b32.xlu1 %v5030_v24, %s5742_s30  ;;  %s5775_s20 = smov 96   ;;  %s5776_s30 = smov 120  }
 0x220   : > { %v4280_v26 = vpop.f32.mrf.mxu1 }
 0x223   : > { %734 = vrot.lane.b32.xlu1 %v5030_v24, %s5744_s26 }
 0x291   : > { %v621_v27 = vpop.permute.xlu1 %620  ;;  %v733_v31 = vpop.permute.xlu0 %732 }
 0x292   : > { %v627_v28 = vsel %vm622_vm2, %v621_v27, 0 }
 0x293   : > { %4282 = vmatpush3.bf16.xpose.msra.mxu1 %v627_v28 }
 0x294   : > { %4293 = vmatprep.subr.bf16.mxu1 %v4846_v8 }
 0x295   : > { %v735_v29 = vpop.permute.xlu1 %734 }
 0x296   : > { %v740_v30 = vsel %vm622_vm2, %v735_v29, 0 }
 0x29a   : > { %4284 = vmatmul.mubr.msk.bf16.vlgmr.msra.gmra.mxu1 %vm622_vm2, %v5030_v24 }
 0x29b   : > { %4294 = vmatpush3.bf16.xpose.msra.mxu1 %v740_v30  ;;  %4295 = vmatprep.mubr.msk.bf16.mxu1 %vm4847_vm1, %v4846_v8 }
 0x29c   : > { %4305 = vmatprep.subr.bf16.mxu1 %v4846_v8 }
 0x2a2   : > { %4296 = vmatmul.mubr.msk.bf16.vlgmr.msra.gmra.mxu1 %vm622_vm2, %v733_v31 }
 0x2a3   : > { %4307 = vmatprep.mubr.msk.bf16.mxu1 %vm4847_vm1, %v4846_v8  ;;  %4306 = vmatpush3.bf16.msra.mxu1 %v849_v7 }
 0x2a4   : > { %4317 = vmatprep.subr.bf16.mxu1 %v4846_v8 }
 0x35a   : > { %v663_v33 = vpop.f32.mrf.mxu1 }
 0x35b   : > { %v664_v34 = vadd.f32 %v663_v33, %v5052_v32 }
 0x35c   : > { %v4285_v35 = vpop.f32.mrf.mxu1 }
 0x35d   : > { %v669_v36 = vsel %vm622_vm2, %v664_v34, -inf }
 0x35e   : > { %670 = vmax.xlane.f32.xlu1 %v669_v36  ;;  %v666_v37 = vpop.f32.mrf.mxu1 }
 0x360   : > { %v4286_v38 = vpop.f32.mrf.mxu1 }
 0x362   : > { %v776_v39 = vpop.f32.mrf.mxu1 }
 0x363   : > { %v777_v40 = vadd.f32 %v776_v39, %v5052_v32 }
 0x364   : > { %v4297_v41 = vpop.f32.mrf.mxu1 }
 0x365   : > { %v782_v42 = vsel %vm622_vm2, %v777_v40, -inf }
 0x366   : > { %783 = vmax.xlane.f32.xlu0 %v782_v42  ;;  %v779_v43 = vpop.f32.mrf.mxu1 }
 0x368   : > { %v4298_v44 = vpop.f32.mrf.mxu1 }
 0x37c   : > { %794 = vrot.lane.b32.xlu0 %v5030_v24, %s5728_s18  ;;  %s5732_s18 = smov 48  }
 0x3e7   : > { %v671_v45 = vpop.xlane.xlu1 %670 }
 0x3e8   : > { %v672_v46 = vsub.f32 %v664_v34, %v671_v45 }
 0x3ea   : > { %v673_v47 = vmul.f32 1.442695, %v672_v46 }
 0x3ec   : > { %4707 = vpow2.f32 %v673_v47 }
 0x3ef   : > { %v784_v48 = vpop.xlane.xlu0 %783 }
 0x3f0   : > { %v785_v49 = vsub.f32 %v777_v40, %v784_v48 }
 0x3f2   : > { %v786_v50 = vmul.f32 1.442695, %v785_v49 }
 0x3f3   : > { %v795_v61 = vpop.permute.xlu0 %794 }
 0x3f4   : > { %4709 = vpow2.f32 %v786_v50  ;;  %v800_v63 = vsel %vm686_vm3, %v795_v61, 0 }
 0x3f9   : > { %v4708_v51 = vpop.eup %4707 }
 0x3fa   : > { %v675_v52 = vsel %vm622_vm2, %v4708_v51, 0.0 }
 0x3fb   : > { %676 = vadd.xlane.f32.xlu1 %v675_v52 }
 0x401   : > { %v4710_v53 = vpop.eup %4709 }
 0x402   : > { %v788_v54 = vsel %vm622_vm2, %v4710_v53, 0.0 }
 0x403   : > { %789 = vadd.xlane.f32.xlu1 %v788_v54 }
 0x414   : > { %681 = vrot.lane.b32.xlu1 %v5030_v24, %s5730_s19  ;;  %s5734_s19 = smov 104  }
 0x418   : > { %939 = vrot.lane.b32.xlu1 %v5030_v24, %s5724_s28  ;;  %s5738_s28 = smov 72  }
 0x41c   : > { %937 = vrot.lane.b32.xlu1 %v5030_v24, %s5726_s29  ;;  %s5778_s29 = smov 56  }
 0x484   : > { %v677_v55 = vpop.xlane.xlu1 %676 }
 0x485   : > { %4711 = vrcp.f32 %v677_v55 }
 0x48c   : > { %v790_v56 = vpop.xlane.xlu1 %789 }
 0x48d   : > { %4713 = vrcp.f32 %v790_v56 }
 0x490   : > { %v682_v57 = vpop.permute.xlu1 %681 }
 0x491   : > { %v688_v58 = vsel %vm686_vm3, %v682_v57, 0 }
 0x492   : > { %v4712_v59 = vpop.eup %4711  ;;  %4288 = vmatpush3.bf16.msra.mxu0 %v688_v58 }
 0x493   : > { %4299 = vmatprep.subr.bf16.mxu0 %v4846_v8  ;;  %v679_v60 = vmul.f32 %v4712_v59, %v4708_v51 }
 0x494   : > { %v940_v14 = vpop.permute.xlu1 %939 }
 0x495   : > { %v680_v62 = vpack.c.bf16 %v679_v60, %v679_v60  ;;  %v945_v18 = vsel %vm622_vm2, %v940_v14, 0 }
 0x497   : > { %4290 = vmatmul.mubr.msk.bf16.vlgmr.msra.gmra.mxu0 %vm622_vm2, %v680_v62 }
 0x498   : > { %4300 = vmatpush3.bf16.msra.mxu0 %v800_v63  ;;  %4301 = vmatprep.mubr.msk.bf16.mxu0 %vm4847_vm1, %v4846_v8  ;;  %v938_v21 = vpop.permute.xlu1 %937 }
 0x499   : > { %4311 = vmatprep.subr.bf16.mxu0 %v4846_v8 }
 0x49a   : > { %v4714_v1 = vpop.eup %4713 }
 0x49b   : > { %v792_v2 = vmul.f32 %v4714_v1, %v4710_v53  ;;  %v4003_v53 = vld [vmem:[%s5713_s6 + $0x8] sm:$0xf] }
 0x49c   : > { %v1054_v54 = vsel %vm686_vm3, %v4003_v53, 0  ;;  %v4019_v53 = vld [vmem:[%s5712_s5 + $0x1] ss:$0 sm:$0xff] }
 0x49d   : > { %v793_v3 = vpack.c.bf16 %v792_v2, %v792_v2 }
 0x49f   : > { %4302 = vmatmul.mubr.msk.bf16.vlgmr.msra.gmra.mxu0 %vm622_vm2, %v793_v3 }
 0x4a0   : > { %4313 = vmatprep.mubr.msk.bf16.mxu0 %vm4847_vm1, %v4846_v8  ;;  %4312 = vmatpush3.bf16.msra.mxu0 %v895_v5 }
 0x4a1   : > { %4323 = vmatprep.subr.bf16.mxu0 %v4846_v8 }
 0x557   : > { %v724_v9 = vpop.f32.mrf.mxu0 }
 0x558   : > { %v730_v10 = vpack.c.bf16 %v724_v9, %v724_v9 }
 0x559   : > { %v4291_v11 = vpop.f32.mrf.mxu0 }
 0x55a   : > { %4314 = vmatmul.mubr.msk.bf16.vlgmr.msra.gmra.mxu0 %vm622_vm2, %v730_v10 }
 0x55b   : > { %v727_v12 = vpop.f32.mrf.mxu0  ;;  %4325 = vmatprep.mubr.msk.bf16.mxu0 %vm4847_vm1, %v4846_v8 }
 0x55c   : > { %v4007_v12 = vld [vmem:[%s5713_s6 + $0xc] sm:$0xf] }
 0x55d   : > { %v4292_v13 = vpop.f32.mrf.mxu0 }
 0x55e   : > { %v1214_v13 = vsel %vm686_vm3, %v4007_v12, 0 }
 0x55f   : > { %v836_v15 = vpop.f32.mrf.mxu0 }
 0x560   : > { %v842_v16 = vpack.c.bf16 %v836_v15, %v836_v15 }
 0x561   : > { %v4303_v17 = vpop.f32.mrf.mxu0 }
 0x562   : > { %4308 = vmatmul.mubr.msk.bf16.vlgmr.msra.gmra.mxu1 %vm622_vm2, %v842_v16 }
 0x563   : > { %4318 = vmatpush3.bf16.xpose.msra.mxu1 %v945_v18  ;;  %v839_v19 = vpop.f32.mrf.mxu0  ;;  %4319 = vmatprep.mubr.msk.bf16.mxu1 %vm4847_vm1, %v4846_v8 }
 0x564   : > { %4329 = vmatprep.subr.bf16.mxu1 %v4846_v8 }
 0x565   : > { %v4304_v20 = vpop.f32.mrf.mxu0 }
 0x56a   : > { %4320 = vmatmul.mubr.msk.bf16.vlgmr.msra.gmra.mxu1 %vm622_vm2, %v938_v21 }
 0x56b   : > { %4331 = vmatprep.mubr.msk.bf16.mxu1 %vm4847_vm1, %v4846_v8  ;;  %4330 = vmatpush3.bf16.msra.mxu1 %v1054_v54 }
 0x56c   : > { %4341 = vmatprep.subr.bf16.mxu1 %v4846_v8 }
 0x61a   : > { %v931_v22 = vpop.f32.mrf.mxu0 }
 0x61c   : > { %v4315_v23 = vpop.f32.mrf.mxu0 }
 0x61e   : > { %v934_v25 = vpop.f32.mrf.mxu0 }
 0x620   : > { %v4316_v26 = vpop.f32.mrf.mxu0 }
 0x622   : > { %v885_v27 = vpop.f32.mrf.mxu1 }
 0x623   : > { %v5099_v28 = vadd.f32 %v931_v22, %v885_v27 }
 0x624   : > { %v4309_v29 = vpop.f32.mrf.mxu1 }
 0x625   : > { %v4009_v29 = vld [vmem:[%s5714_s7] ss:$0 sm:$0xff] }
 0x626   : > { %v888_v30 = vpop.f32.mrf.mxu1 }
 0x628   : > { %v4310_v31 = vpop.f32.mrf.mxu1 }
 0x62a   : > { %v981_v33 = vpop.f32.mrf.mxu1 }
 0x62b   : > { %v982_v34 = vadd.f32 %v981_v33, %v5052_v32 }
 0x62c   : > { %v4321_v35 = vpop.f32.mrf.mxu1 }
 0x62d   : > { %v987_v36 = vsel %vm622_vm2, %v982_v34, -inf }
 0x62e   : > { %988 = vmax.xlane.f32.xlu1 %v987_v36  ;;  %v984_v37 = vpop.f32.mrf.mxu1 }
 0x630   : > { %v4322_v38 = vpop.f32.mrf.mxu1 }
 0x63f   : > { %999 = vrot.lane.b32.xlu1 %v5030_v24, %s5732_s18  ;;  %s5736_s18 = smov 40  }
 0x643   : > { %1097 = vrot.lane.b32.xlu1 %v5030_v24, %s5734_s19  ;;  %s5777_s19 = smov 64  }
 0x6b7   : > { %v989_v39 = vpop.xlane.xlu1 %988 }
 0x6b8   : > { %v990_v40 = vsub.f32 %v982_v34, %v989_v39 }
 0x6ba   : > { %v991_v41 = vmul.f32 1.442695, %v990_v40 }
 0x6bb   : > { %v1000_v42 = vpop.permute.xlu1 %999 }
 0x6bc   : > { %4715 = vpow2.f32 %v991_v41  ;;  %v1005_v43 = vsel %vm686_vm3, %v1000_v42, 0  ;;  %v4688_v42 = vld [vmem:[%s5711_s4 + $0x10] sm:$0xff]  }
 0x6bd   : > { %4324 = vmatpush3.bf16.msra.mxu0 %v1005_v43 }
 0x6be   : > { %4335 = vmatprep.subr.bf16.mxu0 %v4846_v8 }
 0x6bf   : > { %v1098_v52 = vpop.permute.xlu1 %1097 }
 0x6c9   : > { %v4716_v44 = vpop.eup %4715 }
 0x6ca   : > { %v993_v45 = vsel %vm622_vm2, %v4716_v44, 0.0 }
 0x6cb   : > { %994 = vadd.xlane.f32.xlu0 %v993_v45 }
 0x6e1   : > { %1099 = vrot.lane.b32.xlu0 %v5030_v24, %s5738_s28  ;;  %s5779_s28 = smov 112  }
 0x754   : > { %v995_v46 = vpop.xlane.xlu0 %994 }
 0x755   : > { %4717 = vrcp.f32 %v995_v46 }
 0x758   : > { %v1100_v49 = vpop.permute.xlu0 %1099 }
 0x759   : > { %v1105_v51 = vsel %vm622_vm2, %v1100_v49, 0  ;;  %v4013_v49 = vld [vmem:[%s5710_s3 + $0x1] ss:$0 sm:$0xff] }
 0x762   : > { %v4718_v47 = vpop.eup %4717 }
 0x763   : > { %v997_v48 = vmul.f32 %v4718_v47, %v4716_v44  ;;  %v4012_v47 = vld [vmem:[%s5709_s2 + $0x1] ss:$0 sm:$0xff] }
 0x765   : > { %v998_v50 = vpack.c.bf16 %v997_v48, %v997_v48 }
 0x767   : > { %4326 = vmatmul.mubr.msk.bf16.vlgmr.msra.gmra.mxu0 %vm622_vm2, %v998_v50 }
 0x768   : > { %4336 = vmatpush3.bf16.xpose.msra.mxu0 %v1105_v51  ;;  %4337 = vmatprep.mubr.msk.bf16.mxu0 %vm4847_vm1, %v4846_v8 }
 0x769   : > { %4347 = vmatprep.subr.bf16.mxu0 %v4846_v8 }
 0x76f   : > { %4338 = vmatmul.mubr.msk.bf16.vlgmr.msra.gmra.mxu0 %vm622_vm2, %v1098_v52 }
 0x770   : > { %4349 = vmatprep.mubr.msk.bf16.mxu0 %vm4847_vm1, %v4846_v8  ;;  %4348 = vmatpush3.bf16.msra.mxu0 %v1214_v13 }
 0x771   : > { %4361 = vmatprep.subr.bf16.mxu0 %v4846_v8 }
 0x827   : > { %v1041_v55 = vpop.f32.mrf.mxu0 }
 0x828   : > { %v1047_v56 = vpack.c.bf16 %v1041_v55, %v1041_v55 }
 0x829   : > { %v4327_v57 = vpop.f32.mrf.mxu0 }
 0x82a   : > { %4332 = vmatmul.mubr.msk.bf16.vlgmr.msra.gmra.mxu1 %vm622_vm2, %v1047_v56 }
 0x82b   : > { %v1044_v58 = vpop.f32.mrf.mxu0  ;;  %4343 = vmatprep.mubr.msk.bf16.mxu1 %vm4847_vm1, %v4846_v8 }
 0x82d   : > { %v4328_v59 = vpop.f32.mrf.mxu0 }
 0x82f   : > { %v1141_v60 = vpop.f32.mrf.mxu0 }
 0x830   : > { %v1142_v61 = vadd.f32 %v1141_v60, %v5052_v32 }
 0x831   : > { %v4339_v62 = vpop.f32.mrf.mxu0 }
 0x832   : > { %v1147_v63 = vsel %vm622_vm2, %v1142_v61, -inf }
 0x833   : > { %1148 = vmax.xlane.f32.xlu1 %v1147_v63  ;;  %v1144_v1 = vpop.f32.mrf.mxu0 }
 0x835   : > { %v4340_v2 = vpop.f32.mrf.mxu0 }
 0x8bc   : > { %v1149_v3 = vpop.xlane.xlu1 %1148 }
 0x8bd   : > { %v1150_v4 = vsub.f32 %v1142_v61, %v1149_v3 }
 0x8bf   : > { %v1151_v5 = vmul.f32 1.442695, %v1150_v4 }
 0x8c1   : > { %4719 = vpow2.f32 %v1151_v5 }
 0x8ce   : > { %v4720_v6 = vpop.eup %4719 }
 0x8cf   : > { %v1153_v7 = vsel %vm622_vm2, %v4720_v6, 0.0 }
 0x8d0   : > { %1154 = vadd.xlane.f32.xlu0 %v1153_v7 }
 0x8e6   : > { %1159 = vrot.lane.b32.xlu0 %v5030_v24, %s5736_s18  ;;  %s5780_s18 = smov 80  }
 0x8ea   : > { %v1090_v9 = vpop.f32.mrf.mxu1 }
 0x8eb   : > { %v1096_v10 = vadd.f32 %v1090_v9, %v5099_v28 }
 0x8ec   : > { %v4333_v11 = vpop.f32.mrf.mxu1 }
 0x8ee   : > { %v1093_v14 = vpop.f32.mrf.mxu1 }
 0x8f0   : > { %v4334_v15 = vpop.f32.mrf.mxu1 }
 0x959   : > { %v1155_v16 = vpop.xlane.xlu0 %1154 }
 0x95a   : > { %4721 = vrcp.f32 %v1155_v16 }
 0x95d   : > { %v1160_v17 = vpop.permute.xlu0 %1159 }
 0x95e   : > { %v1165_v24 = vsel %vm686_vm3, %v1160_v17, 0 }
 0x95f   : > { %4342 = vmatpush3.bf16.msra.mxu1 %v1165_v24 }
 0x960   : > { %4353 = vmatprep.subr.bf16.mxu1 %v4846_v8 }
 0x967   : > { %v4722_v18 = vpop.eup %4721 }
 0x968   : > { %v1157_v19 = vmul.f32 %v4722_v18, %v4720_v6 }
 0x96a   : > { %v1158_v20 = vpack.c.bf16 %v1157_v19, %v1157_v19 }
 0x96c   : > { %4344 = vmatmul.mubr.msk.bf16.vlgmr.msra.gmra.mxu1 %vm622_vm2, %v1158_v20 }
 0x96d   : > { %4357 = vmatprep.mubr.msk.bf16.mxu1 %vm4847_vm1, %v4846_v8 }
 0xa2c   : > { %v1201_v21 = vpop.f32.mrf.mxu1 }
 0xa2d   : > { %v1207_v22 = vpack.c.bf16 %v1201_v21, %v1201_v21 }
 0xa2e   : > { %v4345_v23 = vpop.f32.mrf.mxu1 }
 0xa2f   : > { %4350 = vmatmul.mubr.msk.bf16.vlgmr.msra.gmra.mxu0 %vm622_vm2, %v1207_v22 }
 0xa30   : > { %v1204_v25 = vpop.f32.mrf.mxu1  ;;  %4363 = vmatprep.mubr.msk.bf16.mxu0 %vm4847_vm1, %v4846_v8 }
 0xa32   : > { %v4346_v26 = vpop.f32.mrf.mxu1 }
 0xaef   : > { %v1250_v27 = vpop.f32.mrf.mxu0 }
 0xaf0   : > { %v1256_v28 = vadd.f32 %v1250_v27, %v1096_v10 }
 0xaf1   : > { %v4351_v30 = vpop.f32.mrf.mxu0 }
 0xaf2   : > { %v1257_v31 = vadd.f32 %v1256_v28, %v4998_v0  ;;  %v4687_v0 = vld [vmem:[%s5711_s4 + $0x18] sm:$0xff]  }
 0xaf3   : > { %v1253_v33 = vpop.f32.mrf.mxu0  ;;  %4354 = vmatpush3.bf16.msra.mxu1 %v4687_v0 }
 0xaf4   : > { %v5151_v34 = vadd.f32 %v4009_v29, %v1257_v31  ;;  %4355 = vmatprep.subr.bf16.mxu1 %v4846_v8 }
 0xaf5   : > { %v4352_v35 = vpop.f32.mrf.mxu0 }
 0xaf6   : > { %v1270_v36 = vsel %vm522_vm0, %v5151_v34, 0.0 }
 0xaf7   : > { %1271 = vadd.xlane.f32.xlu1 %v1270_v36  ;;  %4356 = vmatpush3.bf16.msra.mxu1 %v4688_v42 }
 0xaf8   : > { %4367 = vmatprep.subr.bf16.mxu1 %v4846_v8 }
 0xb80   : > { %v1272_v37 = vpop.xlane.xlu1 %1271 }
 0xb81   : > { %v1273_v38 = vmul.f32 0.03125, %v1272_v37 }
 0xb83   : > { %v1274_v39 = vsub.f32 %v5151_v34, %v1273_v38 }
 0xb85   : > { %v1275_v40 = vmul.f32 %v1274_v39, %v1274_v39 }
 0xb87   : > { %v1276_v41 = vsel %vm522_vm0, %v1275_v40, 0.0 }
 0xb88   : > { %1277 = vadd.xlane.f32.xlu1 %v1276_v41  ;;  %v4028_v41 = vld [vmem:[%s5713_s6 + $0x14] sm:$0xf] }
 0xb89   : > { %v1596_v0 = vsel %vm686_vm3, %v4028_v41, 0 }
 0xc11   : > { %v1278_v43 = vpop.xlane.xlu1 %1277 }
 0xc12   : > { %v1279_v44 = vmul.f32 0.03125, %v1278_v43 }
 0xc14   : > { %v1280_v45 = vadd.f32 1e-05, %v1279_v44 }
 0xc16   : > { %4723 = vrsqrt.f32 %v1280_v45 }
 0xc23   : > { %v4724_v46 = vpop.eup %4723 }
 0xc24   : > { %v1282_v48 = vmul.f32 %v4724_v46, %v1274_v39  ;;  %v4025_v39 = vld [vmem:[%s5713_s6 + $0x10] sm:$0xf] }
 0xc25   : > { %v1642_v40 = vsel %vm686_vm3, %v4025_v39, 0 }
 0xc26   : > { %v1289_v50 = vmul.f32 %v4012_v47, %v1282_v48 }
 0xc28   : > { %v1296_v51 = vadd.f32 %v4013_v49, %v1289_v50 }
 0xc2a   : > { %v1297_v52 = vpack.c.bf16 %v1296_v51, %v1296_v51 }
 0xc2c   : > { %4358 = vmatmul.mubr.msk.bf16.vlgmr.msra.gmra.mxu1 %vm522_vm0, %v1297_v52 }
 0xc2d   : > { %4369 = vmatprep.mubr.msk.bf16.mxu1 %vm4847_vm1, %v4846_v8 }
 0xcec   : > { %v1360_v54 = vpop.f32.mrf.mxu1 }
 0xced   : > { %v1361_v55 = vadd.f32 %v4019_v53, %v1360_v54 }
 0xcee   : > { %v4359_v56 = vpop.f32.mrf.mxu1 }
 0xcef   : > { %v5177_v57 = vpack.c.bf16 %v1361_v55, %v1361_v55 }
 0xcf0   : > { %v1363_v58 = vpop.f32.mrf.mxu1 }
 0xcf1   : > { %1481 = vrot.lane.b32.xlu0 %v5177_v57, %s5744_s26  ;;  %1368 = vrot.lane.b32.xlu1 %v5177_v57, %s5775_s20 }
 0xcf2   : > { %v4360_v59 = vpop.f32.mrf.mxu1 }
 0xcf5   : > { %1479 = vrot.lane.b32.xlu0 %v5177_v57, %s5776_s30 }
 0xd63   : > { %v1369_v60 = vpop.permute.xlu1 %1368  ;;  %v1482_v62 = vpop.permute.xlu0 %1481 }
 0xd64   : > { %v1374_v61 = vsel %vm622_vm2, %v1369_v60, 0  ;;  %v1487_v63 = vsel %vm622_vm2, %v1482_v62, 0 }
 0xd65   : > { %4362 = vmatpush3.bf16.xpose.msra.mxu0 %v1374_v61 }
 0xd66   : > { %4373 = vmatprep.subr.bf16.mxu0 %v4846_v8 }
 0xd67   : > { %v1480_v1 = vpop.permute.xlu0 %1479 }
 0xd6c   : > { %4364 = vmatmul.mubr.msk.bf16.vlgmr.msra.gmra.mxu0 %vm622_vm2, %v5177_v57 }
 0xd6d   : > { %4374 = vmatpush3.bf16.xpose.msra.mxu0 %v1487_v63  ;;  %4375 = vmatprep.mubr.msk.bf16.mxu0 %vm4847_vm1, %v4846_v8 }
 0xd6e   : > { %4385 = vmatprep.subr.bf16.mxu0 %v4846_v8 }
 0xd74   : > { %4376 = vmatmul.mubr.msk.bf16.vlgmr.msra.gmra.mxu0 %vm622_vm2, %v1480_v1 }
 0xd75   : > { %4387 = vmatprep.mubr.msk.bf16.mxu0 %vm4847_vm1, %v4846_v8  ;;  %4386 = vmatpush3.bf16.msra.mxu0 %v1596_v0 }
 0xd76   : > { %4397 = vmatprep.subr.bf16.mxu0 %v4846_v8 }
 0xe2c   : > { %v1410_v2 = vpop.f32.mrf.mxu0 }
 0xe2d   : > { %v1411_v3 = vadd.f32 %v1410_v2, %v5052_v32 }
 0xe2e   : > { %v4365_v4 = vpop.f32.mrf.mxu0 }
 0xe2f   : > { %v1416_v5 = vsel %vm622_vm2, %v1411_v3, -inf }
 0xe30   : > { %1417 = vmax.xlane.f32.xlu1 %v1416_v5  ;;  %v1413_v6 = vpop.f32.mrf.mxu0 }
 0xe32   : > { %v4366_v7 = vpop.f32.mrf.mxu0 }
 0xe34   : > { %v1523_v9 = vpop.f32.mrf.mxu0 }
 0xe35   : > { %v1524_v10 = vadd.f32 %v1523_v9, %v5052_v32 }
 0xe36   : > { %v4377_v11 = vpop.f32.mrf.mxu0 }
 0xe37   : > { %v1529_v12 = vsel %vm622_vm2, %v1524_v10, -inf }
 0xe38   : > { %1530 = vmax.xlane.f32.xlu0 %v1529_v12  ;;  %v1526_v13 = vpop.f32.mrf.mxu0 }
 0xe3a   : > { %v4378_v14 = vpop.f32.mrf.mxu0 }
 0xeb9   : > { %v1418_v15 = vpop.xlane.xlu1 %1417 }
 0xeba   : > { %v1419_v16 = vsub.f32 %v1411_v3, %v1418_v15 }
 0xebc   : > { %v1420_v17 = vmul.f32 1.442695, %v1419_v16 }
 0xebe   : > { %4725 = vpow2.f32 %v1420_v17 }
 0xec1   : > { %v1531_v24 = vpop.xlane.xlu0 %1530 }
 0xec2   : > { %v1532_v18 = vsub.f32 %v1524_v10, %v1531_v24 }
 0xec4   : > { %v1533_v19 = vmul.f32 1.442695, %v1532_v18 }
 0xec6   : > { %4727 = vpow2.f32 %v1533_v19 }
 0xecb   : > { %v4726_v20 = vpop.eup %4725 }
 0xecc   : > { %v1422_v21 = vsel %vm622_vm2, %v4726_v20, 0.0 }
 0xecd   : > { %1423 = vadd.xlane.f32.xlu0 %v1422_v21 }
 0xed3   : > { %v4728_v22 = vpop.eup %4727 }
 0xed4   : > { %v1535_v23 = vsel %vm622_vm2, %v4728_v22, 0.0 }
 0xed5   : > { %1536 = vadd.xlane.f32.xlu1 %v1535_v23 }
 0xee3   : > { %1428 = vrot.lane.b32.xlu0 %v5177_v57, %s5777_s19 }
 0xee6   : > { %1541 = vrot.lane.b32.xlu1 %v5177_v57, %s5778_s29 }
 0xee7   : > { %1684 = vrot.lane.b32.xlu0 %v5177_v57, %s5779_s28 }
 0xeea   : > { %1686 = vrot.lane.b32.xlu1 %v5177_v57, %s5780_s18 }
 0xf56   : > { %v1424_v25 = vpop.xlane.xlu0 %1423 }
 0xf57   : > { %4729 = vrcp.f32 %v1424_v25 }
 0xf5a   : > { %v1429_v26 = vpop.permute.xlu0 %1428 }
 0xf5b   : > { %v1434_v27 = vsel %vm686_vm3, %v1429_v26, 0 }
 0xf5c   : > { %4368 = vmatpush3.bf16.msra.mxu1 %v1434_v27 }
 0xf5d   : > { %4379 = vmatprep.subr.bf16.mxu1 %v4846_v8 }
 0xf5e   : > { %v1537_v28 = vpop.xlane.xlu1 %1536  ;;  %v1685_v54 = vpop.permute.xlu0 %1684 }
 0xf5f   : > { %4731 = vrcp.f32 %v1537_v28 }
 0xf62   : > { %v1542_v31 = vpop.permute.xlu1 %1541 }
 0xf63   : > { %v1547_v35 = vsel %vm686_vm3, %v1542_v31, 0 }
 0xf64   : > { %v4730_v29 = vpop.eup %4729 }
 0xf65   : > { %v1426_v30 = vmul.f32 %v4730_v29, %v4726_v20 }
 0xf66   : > { %v1687_v47 = vpop.permute.xlu1 %1686 }
 0xf67   : > { %v1427_v33 = vpack.c.bf16 %v1426_v30, %v1426_v30  ;;  %v1692_v51 = vsel %vm622_vm2, %v1687_v47, 0 }
 0xf69   : > { %4370 = vmatmul.mubr.msk.bf16.vlgmr.msra.gmra.mxu1 %vm622_vm2, %v1427_v33 }
 0xf6a   : > { %4380 = vmatpush3.bf16.msra.mxu1 %v1547_v35  ;;  %4381 = vmatprep.mubr.msk.bf16.mxu1 %vm4847_vm1, %v4846_v8 }
 0xf6b   : > { %4391 = vmatprep.subr.bf16.mxu1 %v4846_v8 }
 0xf6c   : > { %v4732_v36 = vpop.eup %4731 }
 0xf6d   : > { %v1539_v37 = vmul.f32 %v4732_v36, %v4728_v22  ;;  %v4033_v22 = vld [vmem:[%s5713_s6 + $0x18] sm:$0xf] }
 0xf6e   : > { %v1801_v23 = vsel %vm686_vm3, %v4033_v22, 0 }
 0xf6f   : > { %v1540_v38 = vpack.c.bf16 %v1539_v37, %v1539_v37 }
 0xf71   : > { %4382 = vmatmul.mubr.msk.bf16.vlgmr.msra.gmra.mxu1 %vm622_vm2, %v1540_v38 }
 0xf72   : > { %4393 = vmatprep.mubr.msk.bf16.mxu1 %vm4847_vm1, %v4846_v8  ;;  %4392 = vmatpush3.bf16.msra.mxu1 %v1642_v40 }
 0xf73   : > { %4403 = vmatprep.subr.bf16.mxu1 %v4846_v8 }
0x1029   : > { %v1470_v42 = vpop.f32.mrf.mxu1 }
0x102a   : > { %v1476_v43 = vpack.c.bf16 %v1470_v42, %v1470_v42 }
0x102b   : > { %v4371_v44 = vpop.f32.mrf.mxu1 }
0x102c   : > { %4394 = vmatmul.mubr.msk.bf16.vlgmr.msra.gmra.mxu1 %vm622_vm2, %v1476_v43 }
0x102d   : > { %v1473_v45 = vpop.f32.mrf.mxu1  ;;  %4405 = vmatprep.mubr.msk.bf16.mxu1 %vm4847_vm1, %v4846_v8 }
0x102f   : > { %v4372_v46 = vpop.f32.mrf.mxu1 }
0x1031   : > { %v1583_v48 = vpop.f32.mrf.mxu1 }
0x1032   : > { %v1589_v49 = vpack.c.bf16 %v1583_v48, %v1583_v48 }
0x1033   : > { %v4383_v50 = vpop.f32.mrf.mxu1 }
0x1034   : > { %4388 = vmatmul.mubr.msk.bf16.vlgmr.msra.gmra.mxu0 %vm622_vm2, %v1589_v49 }
0x1035   : > { %4398 = vmatpush3.bf16.xpose.msra.mxu0 %v1692_v51  ;;  %v1586_v52 = vpop.f32.mrf.mxu1  ;;  %4399 = vmatprep.mubr.msk.bf16.mxu0 %vm4847_vm1, %v4846_v8 }
0x1036   : > { %4409 = vmatprep.subr.bf16.mxu0 %v4846_v8 }
0x1037   : > { %v4384_v53 = vpop.f32.mrf.mxu1 }
0x103c   : > { %4400 = vmatmul.mubr.msk.bf16.vlgmr.msra.gmra.mxu0 %vm622_vm2, %v1685_v54 }
0x103d   : > { %4411 = vmatprep.mubr.msk.bf16.mxu0 %vm4847_vm1, %v4846_v8  ;;  %4410 = vmatpush3.bf16.msra.mxu0 %v1801_v23  ;;  %v4693_v23 = vld [vmem:[%s5719_s12 + $0x8] sm:$0xff]  }
0x103e   : > { %4421 = vmatprep.subr.bf16.mxu0 %v4846_v8 }
0x10ec   : > { %v1678_v55 = vpop.f32.mrf.mxu1 }
0x10ee   : > { %v4395_v56 = vpop.f32.mrf.mxu1 }
0x10f0   : > { %v1681_v58 = vpop.f32.mrf.mxu1 }
0x10f2   : > { %v4396_v59 = vpop.f32.mrf.mxu1 }
0x10f4   : > { %v1632_v60 = vpop.f32.mrf.mxu0 }
0x10f5   : > { %v5241_v61 = vadd.f32 %v1678_v55, %v1632_v60 }
0x10f6   : > { %v4389_v62 = vpop.f32.mrf.mxu0 }
0x10f8   : > { %v1635_v63 = vpop.f32.mrf.mxu0 }
0x10fa   : > { %v4390_v1 = vpop.f32.mrf.mxu0 }
0x10fc   : > { %v1728_v2 = vpop.f32.mrf.mxu0 }
0x10fd   : > { %v1729_v3 = vadd.f32 %v1728_v2, %v5052_v32 }
0x10fe   : > { %v4401_v4 = vpop.f32.mrf.mxu0 }
0x10ff   : > { %v1734_v5 = vsel %vm622_vm2, %v1729_v3, -inf }
0x1100   : > { %1735 = vmax.xlane.f32.xlu1 %v1734_v5  ;;  %v1731_v6 = vpop.f32.mrf.mxu0 }
0x1102   : > { %v4402_v7 = vpop.f32.mrf.mxu0 }
0x1111   : > { %1846 = vrot.lane.b32.xlu1 %v5177_v57, %s5781_s23 }
0x1115   : > { %1844 = vrot.lane.b32.xlu1 %v5177_v57, %s5782_s27 }
0x1189   : > { %v1736_v9 = vpop.xlane.xlu1 %1735 }
0x118a   : > { %v1737_v10 = vsub.f32 %v1729_v3, %v1736_v9 }
0x118c   : > { %v1738_v11 = vmul.f32 1.442695, %v1737_v10 }
0x118d   : > { %v1847_v18 = vpop.permute.xlu1 %1846 }
0x118e   : > { %4733 = vpow2.f32 %v1738_v11  ;;  %v1852_v20 = vsel %vm622_vm2, %v1847_v18, 0  ;;  %v4689_v11 = vld [vmem:[%s5717_s10 + $0x8] sm:$0xff]  }
0x1191   : > { %v1845_v21 = vpop.permute.xlu1 %1844 }
0x119b   : > { %v4734_v12 = vpop.eup %4733 }
0x119c   : > { %v1740_v13 = vsel %vm622_vm2, %v4734_v12, 0.0 }
0x119d   : > { %1741 = vadd.xlane.f32.xlu0 %v1740_v13  ;;  %v4692_v13 = vld [vmem:[%s5719_s12 + $0x10] sm:$0xff]  }
0x11b3   : > { %1746 = vrot.lane.b32.xlu0 %v5177_v57, %s5783_s17 }
0x1226   : > { %v1742_v14 = vpop.xlane.xlu0 %1741 }
0x1227   : > { %4735 = vrcp.f32 %v1742_v14 }
0x122a   : > { %v1747_v15 = vpop.permute.xlu0 %1746 }
0x122b   : > { %v1752_v16 = vsel %vm686_vm3, %v1747_v15, 0 }
0x122c   : > { %4404 = vmatpush3.bf16.msra.mxu1 %v1752_v16 }
0x122d   : > { %4415 = vmatprep.subr.bf16.mxu1 %v4846_v8 }
0x1234   : > { %v4736_v17 = vpop.eup %4735 }
0x1235   : > { %v1744_v24 = vmul.f32 %v4736_v17, %v4734_v12  ;;  %v4691_v12 = vld [vmem:[%s5719_s12 + $0x18] sm:$0xff]  }
0x1237   : > { %v1745_v19 = vpack.c.bf16 %v1744_v24, %v1744_v24  ;;  %v4041_v24 = vld [vmem:[%s5715_s8] ss:$0 sm:$0xff] }
0x1239   : > { %4406 = vmatmul.mubr.msk.bf16.vlgmr.msra.gmra.mxu1 %vm622_vm2, %v1745_v19  ;;  %v4042_v19 = vld [vmem:[%s5716_s9] ss:$0 sm:$0xff] }
0x123a   : > { %4416 = vmatpush3.bf16.xpose.msra.mxu1 %v1852_v20  ;;  %4417 = vmatprep.mubr.msk.bf16.mxu1 %vm4847_vm1, %v4846_v8 }
0x123b   : > { %4427 = vmatprep.subr.bf16.mxu1 %v4846_v8 }
0x1241   : > { %4418 = vmatmul.mubr.msk.bf16.vlgmr.msra.gmra.mxu1 %vm622_vm2, %v1845_v21 }
0x1242   : > { %4429 = vmatprep.mubr.msk.bf16.mxu1 %vm4847_vm1, %v4846_v8 }
0x12f9   : > { %v1788_v25 = vpop.f32.mrf.mxu1 }
0x12fa   : > { %v1794_v26 = vpack.c.bf16 %v1788_v25, %v1788_v25  ;;  %v4694_v25 = vld [vmem:[%s5719_s12] sm:$0xff]  }
0x12fb   : > { %v4407_v27 = vpop.f32.mrf.mxu1 }
0x12fc   : > { %4412 = vmatmul.mubr.msk.bf16.vlgmr.msra.gmra.mxu0 %vm622_vm2, %v1794_v26  ;;  %v4043_v26 = vld [vmem:[%s5718_s11] ss:$0 sm:$0xff] }
0x12fd   : > { %v1791_v28 = vpop.f32.mrf.mxu1  ;;  %4423 = vmatprep.mubr.msk.bf16.mxu0 %vm4847_vm1, %v4846_v8 }
0x12ff   : > { %v4408_v29 = vpop.f32.mrf.mxu1 }
0x1301   : > { %v1888_v30 = vpop.f32.mrf.mxu1 }
0x1302   : > { %v1889_v31 = vadd.f32 %v1888_v30, %v5052_v32 }
0x1303   : > { %v4419_v33 = vpop.f32.mrf.mxu1 }
0x1304   : > { %v1894_v35 = vsel %vm622_vm2, %v1889_v31, -inf }
0x1305   : > { %1895 = vmax.xlane.f32.xlu0 %v1894_v35  ;;  %v1891_v36 = vpop.f32.mrf.mxu1 }
0x1306   : > { %v4047_v36 = vld [vmem:[%s5720_s13] ss:$0 sm:$0xff] }
0x1307   : > { %v4420_v37 = vpop.f32.mrf.mxu1 }
0x131b   : > { %1906 = vrot.lane.b32.xlu0 %v5177_v57, %s5784_s21  ;;  %v4037_v57 = vld [vmem:[%s5713_s6 + $0x1c] sm:$0xf] }
0x131c   : > { %v1961_v46 = vsel %vm686_vm3, %v4037_v57, 0 }
0x131d   : > { %4428 = vmatpush3.bf16.msra.mxu1 %v1961_v46  ;;  %v4695_v46 = vld [vmem:[%s5711_s4 + $0x28] sm:$0xff]  }
0x131e   : > { %4441 = vmatprep.subr.bf16.mxu1 %v4846_v8 }
0x138e   : > { %v1896_v38 = vpop.xlane.xlu0 %1895 }
0x138f   : > { %v1897_v39 = vsub.f32 %v1889_v31, %v1896_v38 }
0x1391   : > { %v1898_v40 = vmul.f32 1.442695, %v1897_v39 }
0x1392   : > { %v1907_v41 = vpop.permute.xlu0 %1906 }
0x1393   : > { %4737 = vpow2.f32 %v1898_v40  ;;  %v1912_v0 = vsel %vm686_vm3, %v1907_v41, 0 }
0x1394   : > { %4422 = vmatpush3.bf16.msra.mxu0 %v1912_v0 }
0x1395   : > { %4433 = vmatprep.subr.bf16.mxu0 %v4846_v8 }
0x13a0   : > { %v4738_v32 = vpop.eup %4737 }
0x13a1   : > { %v1900_v42 = vsel %vm622_vm2, %v4738_v32, 0.0 }
0x13a2   : > { %1901 = vadd.xlane.f32.xlu1 %v1900_v42 }
0x13bc   : > { %v1837_v43 = vpop.f32.mrf.mxu0 }
0x13bd   : > { %v1843_v44 = vadd.f32 %v1837_v43, %v5241_v61  ;;  %v4040_v61 = vld [vmem:[%s5714_s7 + $0x1] ss:$0 sm:$0xff] }
0x13be   : > { %v4413_v45 = vpop.f32.mrf.mxu0 }
0x13c0   : > { %v1840_v47 = vpop.f32.mrf.mxu0 }
0x13c1   : > { %v4696_v47 = vld [vmem:[%s5711_s4 + $0x20] sm:$0xff]  }
0x13c2   : > { %v4414_v48 = vpop.f32.mrf.mxu0 }
0x142b   : > { %v1902_v49 = vpop.xlane.xlu1 %1901 }
0x142c   : > { %4739 = vrcp.f32 %v1902_v49 }
0x1439   : > { %v4740_v50 = vpop.eup %4739 }
0x143a   : > { %v1904_v51 = vmul.f32 %v4740_v50, %v4738_v32 }
0x143c   : > { %v1905_v52 = vpack.c.bf16 %v1904_v51, %v1904_v51 }
0x143e   : > { %4424 = vmatmul.mubr.msk.bf16.vlgmr.msra.gmra.mxu0 %vm622_vm2, %v1905_v52  ;;  %v4055_v52 = vld [vmem:[%s5709_s2 + $0x2] ss:$0 sm:$0xff] }
0x143f   : > { %4437 = vmatprep.mubr.msk.bf16.mxu0 %vm4847_vm1, %v4846_v8  ;;  %4434 = vmatpush3.bf16.msra.mxu0 %v4689_v11 }
0x1440   : > { %4435 = vmatprep.subr.bf16.mxu0 %v4846_v8 }
0x14fe   : > { %v1948_v53 = vpop.f32.mrf.mxu0 }
0x14ff   : > { %v1954_v54 = vpack.c.bf16 %v1948_v53, %v1948_v53 }
0x1500   : > { %v4425_v55 = vpop.f32.mrf.mxu0 }
0x1501   : > { %4430 = vmatmul.mubr.msk.bf16.vlgmr.msra.gmra.mxu1 %vm622_vm2, %v1954_v54  ;;  %v4056_v54 = vld [vmem:[%s5710_s3 + $0x2] ss:$0 sm:$0xff] }
0x1502   : > { %v1951_v56 = vpop.f32.mrf.mxu0  ;;  %4449 = vmatprep.mubr.msk.bf16.mxu1 %vm4847_vm1, %v4846_v8  ;;  %4442 = vmatpush3.bf16.msra.mxu1 %v4691_v12 }
0x1503   : > { %4443 = vmatprep.subr.bf16.mxu1 %v4846_v8 }
0x1504   : > { %v4426_v58 = vpop.f32.mrf.mxu0 }
0x1506   : > { %4444 = vmatpush3.bf16.msra.mxu1 %v4692_v13 }
0x1507   : > { %4445 = vmatprep.subr.bf16.mxu1 %v4846_v8 }
0x150a   : > { %4446 = vmatpush3.bf16.msra.mxu1 %v4693_v23 }
0x150b   : > { %4447 = vmatprep.subr.bf16.mxu1 %v4846_v8 }
0x150e   : > { %4448 = vmatpush3.bf16.msra.mxu1 %v4694_v25 }
0x150f   : > { %4467 = vmatprep.subr.bf16.mxu1 %v4846_v8 }
0x15c1   : > { %v1997_v59 = vpop.f32.mrf.mxu1 }
0x15c2   : > { %v2003_v60 = vadd.f32 %v1997_v59, %v1843_v44  ;;  %v4062_v59 = vld [vmem:[%s5712_s5 + $0x2] ss:$0 sm:$0xff] }
0x15c3   : > { %v4431_v62 = vpop.f32.mrf.mxu1 }
0x15c4   : > { %v2004_v63 = vadd.f32 %v2003_v60, %v5151_v34  ;;  %v4690_v34 = vld [vmem:[%s5717_s10] sm:$0xff]  }
0x15c5   : > { %v2000_v1 = vpop.f32.mrf.mxu1  ;;  %4436 = vmatpush3.bf16.msra.mxu0 %v4690_v34 }
0x15c6   : > { %v2013_v2 = vadd.f32 %v4040_v61, %v2004_v63  ;;  %4453 = vmatprep.subr.bf16.mxu0 %v4846_v8 }
0x15c7   : > { %v4432_v3 = vpop.f32.mrf.mxu1 }
0x15c8   : > { %v2016_v4 = vsel %vm522_vm0, %v2013_v2, 0.0 }
0x15c9   : > { %2017 = vadd.xlane.f32.xlu1 %v2016_v4 }
0x1652   : > { %v2018_v5 = vpop.xlane.xlu1 %2017 }
0x1653   : > { %v2019_v6 = vmul.f32 0.03125, %v2018_v5 }
0x1655   : > { %v2020_v7 = vsub.f32 %v2013_v2, %v2019_v6 }
0x1657   : > { %v2021_v9 = vmul.f32 %v2020_v7, %v2020_v7 }
0x1659   : > { %v2022_v10 = vsel %vm522_vm0, %v2021_v9, 0.0 }
0x165a   : > { %2023 = vadd.xlane.f32.xlu1 %v2022_v10  ;;  %v5385_v10 = vld [vmem:[%s5774_s1] sm:$0xff]  ;;  %s3910_s1 = scalar_lea.sflag [#allocation3], %s510_s0 }
0x16e3   : > { %v2024_v14 = vpop.xlane.xlu1 %2023 }
0x16e4   : > { %v2025_v15 = vmul.f32 0.03125, %v2024_v14 }
0x16e6   : > { %v2026_v16 = vadd.f32 1e-05, %v2025_v15 }
0x16e8   : > { %4741 = vrsqrt.f32 %v2026_v16 }
0x16f5   : > { %v4742_v17 = vpop.eup %4741 }
0x16f6   : > { %v2028_v18 = vmul.f32 %v4742_v17, %v2020_v7 }
0x16f8   : > { %v2035_v20 = vmul.f32 %v4041_v24, %v2028_v18 }
0x16fa   : > { %v2042_v21 = vadd.f32 %v4042_v19, %v2035_v20 }
0x16fc   : > { %v2043_v22 = vpack.c.bf16 %v2042_v21, %v2042_v21 }
0x16fe   : > { %4438 = vmatmul.mubr.msk.bf16.vlgmr.msra.gmra.mxu0 %vm522_vm0, %v2043_v22 }
0x16ff   : > { %4457 = vmatprep.mubr.msk.bf16.mxu0 %vm4847_vm1, %v4846_v8  ;;  %4454 = vmatpush3.bf16.msra.mxu0 %v4695_v46 }
0x1700   : > { %4455 = vmatprep.subr.bf16.mxu0 %v4846_v8 }
0x1703   : > { %4456 = vmatpush3.bf16.msra.mxu0 %v4696_v47 }
0x1704   : > { %4461 = vmatprep.subr.bf16.mxu0 %v4846_v8 }
0x17be   : > { %v2104_v27 = vpop.f32.mrf.mxu0 }
0x17bf   : > { %v2105_v28 = vadd.f32 %v4043_v26, %v2104_v27 }
0x17c0   : > { %v4439_v29 = vpop.f32.mrf.mxu0 }
0x17c1   : > { %v2110_v30 = vmax.f32 %v2105_v28, 0.0 }
0x17c2   : > { %v2107_v31 = vpop.f32.mrf.mxu0 }
0x17c3   : > { %v2111_v33 = vpack.c.bf16 %v2110_v30, %v2110_v30 }
0x17c4   : > { %v4440_v35 = vpop.f32.mrf.mxu0 }
0x17c5   : > { %4450 = vmatmul.mubr.msk.bf16.vlgmr.msra.gmra.mxu1 %vm2151_vm4, %v2111_v33 }
0x17c6   : > { %4469 = vmatprep.mubr.msk.bf16.mxu1 %vm4847_vm1, %v4846_v8 }
0x1885   : > { %v2189_v37 = vpop.f32.mrf.mxu1 }
0x1886   : > { %v2190_v38 = vadd.f32 %v4047_v36, %v2189_v37 }
0x1887   : > { %v4451_v39 = vpop.f32.mrf.mxu1 }
0x1888   : > { %v5337_v40 = vadd.f32 %v2190_v38, %v2013_v2 }
0x1889   : > { %v2192_v41 = vpop.f32.mrf.mxu1 }
0x188a   : > { %v2200_v0 = vsel %vm522_vm0, %v5337_v40, 0.0 }
0x188b   : > { %2201 = vadd.xlane.f32.xlu1 %v2200_v0  ;;  %v4452_v32 = vpop.f32.mrf.mxu1 }
0x1914   : > { %v2202_v42 = vpop.xlane.xlu1 %2201 }
0x1915   : > { %v2203_v43 = vmul.f32 0.03125, %v2202_v42 }
0x1917   : > { %v2204_v44 = vsub.f32 %v5337_v40, %v2203_v43 }
0x1919   : > { %v2205_v45 = vmul.f32 %v2204_v44, %v2204_v44 }
0x191b   : > { %v2206_v57 = vsel %vm522_vm0, %v2205_v45, 0.0 }
0x191c   : > { %2207 = vadd.xlane.f32.xlu1 %v2206_v57  ;;  %v4071_v57 = vld [vmem:[%s5713_s6 + $0x24] sm:$0xf] }
0x191d   : > { %v2526_v46 = vsel %vm686_vm3, %v4071_v57, 0 }
0x19a5   : > { %v2208_v48 = vpop.xlane.xlu1 %2207 }
0x19a6   : > { %v2209_v49 = vmul.f32 0.03125, %v2208_v48 }
0x19a8   : > { %v2210_v50 = vadd.f32 1e-05, %v2209_v49 }
0x19aa   : > { %4743 = vrsqrt.f32 %v2210_v50 }
0x19b7   : > { %v4744_v51 = vpop.eup %4743 }
0x19b8   : > { %v2212_v53 = vmul.f32 %v4744_v51, %v2204_v44  ;;  %v4068_v44 = vld [vmem:[%s5713_s6 + $0x20] sm:$0xf] }
0x19b9   : > { %v2572_v45 = vsel %vm686_vm3, %v4068_v44, 0 }
0x19ba   : > { %v2219_v55 = vmul.f32 %v4055_v52, %v2212_v53 }
0x19bc   : > { %v2226_v56 = vadd.f32 %v4056_v54, %v2219_v55 }
0x19be   : > { %v2227_v58 = vpack.c.bf16 %v2226_v56, %v2226_v56 }
0x19c0   : > { %4458 = vmatmul.mubr.msk.bf16.vlgmr.msra.gmra.mxu0 %vm522_vm0, %v2227_v58 }
0x19c1   : > { %4463 = vmatprep.mubr.msk.bf16.mxu0 %vm4847_vm1, %v4846_v8 }
0x1a80   : > { %v2290_v60 = vpop.f32.mrf.mxu0 }
0x1a81   : > { %v2291_v61 = vadd.f32 %v4062_v59, %v2290_v60 }
0x1a82   : > { %v4459_v62 = vpop.f32.mrf.mxu0 }
0x1a83   : > { %v5363_v63 = vpack.c.bf16 %v2291_v61, %v2291_v61 }
0x1a84   : > { %v2293_v1 = vpop.f32.mrf.mxu0 }
0x1a85   : > { %2411 = vrot.lane.b32.xlu1 %v5363_v63, %s5785_s24  ;;  %2298 = vrot.lane.b32.xlu0 %v5363_v63, %s5775_s20 }
0x1a86   : > { %v4460_v2 = vpop.f32.mrf.mxu0 }
0x1a89   : > { %2409 = vrot.lane.b32.xlu0 %v5363_v63, %s5776_s30 }
0x1af7   : > { %v2299_v3 = vpop.permute.xlu0 %2298  ;;  %v2412_v5 = vpop.permute.xlu1 %2411 }
0x1af8   : > { %v2304_v4 = vsel %vm622_vm2, %v2299_v3, 0  ;;  %v2417_v6 = vsel %vm622_vm2, %v2412_v5, 0 }
0x1af9   : > { %4462 = vmatpush3.bf16.xpose.msra.mxu0 %v2304_v4 }
0x1afa   : > { %4473 = vmatprep.subr.bf16.mxu0 %v4846_v8 }
0x1afb   : > { %v2410_v7 = vpop.permute.xlu0 %2409 }
0x1b00   : > { %4464 = vmatmul.mubr.msk.bf16.vlgmr.msra.gmra.mxu0 %vm622_vm2, %v5363_v63 }
0x1b01   : > { %4474 = vmatpush3.bf16.xpose.msra.mxu0 %v2417_v6  ;;  %4475 = vmatprep.mubr.msk.bf16.mxu0 %vm4847_vm1, %v4846_v8 }
0x1b02   : > { %4485 = vmatprep.subr.bf16.mxu0 %v4846_v8 }
0x1b08   : > { %4476 = vmatmul.mubr.msk.bf16.vlgmr.msra.gmra.mxu0 %vm622_vm2, %v2410_v7 }
0x1b09   : > { %4487 = vmatprep.mubr.msk.bf16.mxu0 %vm4847_vm1, %v4846_v8  ;;  %4486 = vmatpush3.bf16.msra.mxu0 %v2526_v46 }
0x1b0a   : > { %4497 = vmatprep.subr.bf16.mxu0 %v4846_v8 }
0x1bc0   : > { %v2340_v9 = vpop.f32.mrf.mxu0 }
0x1bc1   : > { %v2341_v11 = vadd.f32 %v5385_v10, %v2340_v9 }
0x1bc2   : > { %v4465_v34 = vpop.f32.mrf.mxu0 }
0x1bc3   : > { %v2346_v12 = vsel %vm622_vm2, %v2341_v11, -inf }
0x1bc4   : > { %2347 = vmax.xlane.f32.xlu0 %v2346_v12  ;;  %v2343_v13 = vpop.f32.mrf.mxu0 }
0x1bc6   : > { %v4466_v14 = vpop.f32.mrf.mxu0 }
0x1bc8   : > { %v2453_v15 = vpop.f32.mrf.mxu0 }
0x1bc9   : > { %v2454_v16 = vadd.f32 %v5385_v10, %v2453_v15 }
0x1bca   : > { %v4477_v17 = vpop.f32.mrf.mxu0 }
0x1bcb   : > { %v2459_v24 = vsel %vm622_vm2, %v2454_v16, -inf }
0x1bcc   : > { %2460 = vmax.xlane.f32.xlu1 %v2459_v24  ;;  %v2456_v18 = vpop.f32.mrf.mxu0 }
0x1bce   : > { %v4478_v19 = vpop.f32.mrf.mxu0 }
0x1bdd   : > { %2471 = vrot.lane.b32.xlu1 %v5363_v63, %s5778_s29 }
0x1be1   : > { %2614 = vrot.lane.b32.xlu1 %v5363_v63, %s5779_s28 }
0x1c4d   : > { %v2348_v20 = vpop.xlane.xlu0 %2347 }
0x1c4e   : > { %v2349_v21 = vsub.f32 %v2341_v11, %v2348_v20 }
0x1c50   : > { %v2350_v22 = vmul.f32 1.442695, %v2349_v21 }
0x1c52   : > { %4745 = vpow2.f32 %v2350_v22 }
0x1c55   : > { %v2461_v23 = vpop.xlane.xlu1 %2460 }
0x1c56   : > { %v2462_v25 = vsub.f32 %v2454_v16, %v2461_v23 }
0x1c58   : > { %v2463_v26 = vmul.f32 1.442695, %v2462_v25 }
0x1c59   : > { %v2472_v39 = vpop.permute.xlu1 %2471 }
0x1c5a   : > { %4747 = vpow2.f32 %v2463_v26  ;;  %v2477_v0 = vsel %vm686_vm3, %v2472_v39, 0 }
0x1c5d   : > { %v2615_v60 = vpop.permute.xlu1 %2614 }
0x1c5f   : > { %v4746_v27 = vpop.eup %4745 }
0x1c60   : > { %v2352_v28 = vsel %vm622_vm2, %v4746_v27, 0.0 }
0x1c61   : > { %2353 = vadd.xlane.f32.xlu0 %v2352_v28 }
0x1c67   : > { %v4748_v29 = vpop.eup %4747 }
0x1c68   : > { %v2465_v30 = vsel %vm622_vm2, %v4748_v29, 0.0 }
0x1c69   : > { %2466 = vadd.xlane.f32.xlu0 %v2465_v30 }
0x1c7f   : > { %2358 = vrot.lane.b32.xlu0 %v5363_v63, %s5777_s19 }
0x1c83   : > { %2616 = vrot.lane.b32.xlu0 %v5363_v63, %s5780_s18 }
0x1cea   : > { %v2354_v31 = vpop.xlane.xlu0 %2353 }
0x1ceb   : > { %4749 = vrcp.f32 %v2354_v31 }
0x1cf2   : > { %v2467_v33 = vpop.xlane.xlu0 %2466 }
0x1cf3   : > { %4751 = vrcp.f32 %v2467_v33 }
0x1cf6   : > { %v2359_v35 = vpop.permute.xlu0 %2358 }
0x1cf7   : > { %v2364_v36 = vsel %vm686_vm3, %v2359_v35, 0 }
0x1cf8   : > { %v4750_v37 = vpop.eup %4749  ;;  %4468 = vmatpush3.bf16.msra.mxu1 %v2364_v36 }
0x1cf9   : > { %4479 = vmatprep.subr.bf16.mxu1 %v4846_v8  ;;  %v2356_v38 = vmul.f32 %v4750_v37, %v4746_v27 }
0x1cfa   : > { %v2617_v52 = vpop.permute.xlu0 %2616 }
0x1cfb   : > { %v2357_v41 = vpack.c.bf16 %v2356_v38, %v2356_v38  ;;  %v2622_v56 = vsel %vm622_vm2, %v2617_v52, 0 }
0x1cfd   : > { %4470 = vmatmul.mubr.msk.bf16.vlgmr.msra.gmra.mxu1 %vm622_vm2, %v2357_v41 }
0x1cfe   : > { %4480 = vmatpush3.bf16.msra.mxu1 %v2477_v0  ;;  %4481 = vmatprep.mubr.msk.bf16.mxu1 %vm4847_vm1, %v4846_v8 }
0x1cff   : > { %4491 = vmatprep.subr.bf16.mxu1 %v4846_v8 }
0x1d00   : > { %v4752_v32 = vpop.eup %4751 }
0x1d01   : > { %v2469_v42 = vmul.f32 %v4752_v32, %v4748_v29  ;;  %v4076_v29 = vld [vmem:[%s5713_s6 + $0x28] sm:$0xf] }
0x1d02   : > { %v2731_v30 = vsel %vm686_vm3, %v4076_v29, 0  ;;  %v4093_v29 = vld [vmem:[%s5712_s5 + $0x3] ss:$0 sm:$0xff] }
0x1d03   : > { %v2470_v43 = vpack.c.bf16 %v2469_v42, %v2469_v42 }
0x1d05   : > { %4482 = vmatmul.mubr.msk.bf16.vlgmr.msra.gmra.mxu1 %vm622_vm2, %v2470_v43 }
0x1d06   : > { %4493 = vmatprep.mubr.msk.bf16.mxu1 %vm4847_vm1, %v4846_v8  ;;  %4492 = vmatpush3.bf16.msra.mxu1 %v2572_v45 }
0x1d07   : > { %4503 = vmatprep.subr.bf16.mxu1 %v4846_v8 }
0x1dbd   : > { %v2400_v47 = vpop.f32.mrf.mxu1 }
0x1dbe   : > { %v2406_v48 = vpack.c.bf16 %v2400_v47, %v2400_v47 }
0x1dbf   : > { %v4471_v49 = vpop.f32.mrf.mxu1 }
0x1dc0   : > { %4494 = vmatmul.mubr.msk.bf16.vlgmr.msra.gmra.mxu1 %vm622_vm2, %v2406_v48 }
0x1dc1   : > { %v2403_v50 = vpop.f32.mrf.mxu1  ;;  %4505 = vmatprep.mubr.msk.bf16.mxu1 %vm4847_vm1, %v4846_v8 }
0x1dc2   : > { %v4080_v50 = vld [vmem:[%s5713_s6 + $0x2c] sm:$0xf] }
0x1dc3   : > { %v4472_v51 = vpop.f32.mrf.mxu1 }
0x1dc4   : > { %v2891_v51 = vsel %vm686_vm3, %v4080_v50, 0 }
0x1dc5   : > { %v2513_v53 = vpop.f32.mrf.mxu1 }
0x1dc6   : > { %v2519_v54 = vpack.c.bf16 %v2513_v53, %v2513_v53 }
0x1dc7   : > { %v4483_v55 = vpop.f32.mrf.mxu1 }
0x1dc8   : > { %4488 = vmatmul.mubr.msk.bf16.vlgmr.msra.gmra.mxu0 %vm622_vm2, %v2519_v54 }
0x1dc9   : > { %4498 = vmatpush3.bf16.xpose.msra.mxu0 %v2622_v56  ;;  %v2516_v58 = vpop.f32.mrf.mxu1  ;;  %4499 = vmatprep.mubr.msk.bf16.mxu0 %vm4847_vm1, %v4846_v8 }
0x1dca   : > { %4509 = vmatprep.subr.bf16.mxu0 %v4846_v8 }
0x1dcb   : > { %v4484_v59 = vpop.f32.mrf.mxu1 }
0x1dd0   : > { %4500 = vmatmul.mubr.msk.bf16.vlgmr.msra.gmra.mxu0 %vm622_vm2, %v2615_v60 }
0x1dd1   : > { %4511 = vmatprep.mubr.msk.bf16.mxu0 %vm4847_vm1, %v4846_v8  ;;  %4510 = vmatpush3.bf16.msra.mxu0 %v2731_v30 }
0x1dd2   : > { %4521 = vmatprep.subr.bf16.mxu0 %v4846_v8 }
0x1e80   : > { %v2608_v61 = vpop.f32.mrf.mxu1 }
0x1e82   : > { %v4495_v62 = vpop.f32.mrf.mxu1 }
0x1e84   : > { %v2611_v1 = vpop.f32.mrf.mxu1 }
0x1e86   : > { %v4496_v2 = vpop.f32.mrf.mxu1 }
0x1e88   : > { %v2562_v3 = vpop.f32.mrf.mxu0 }
0x1e89   : > { %v5432_v4 = vadd.f32 %v2608_v61, %v2562_v3 }
0x1e8a   : > { %v4489_v5 = vpop.f32.mrf.mxu0 }
0x1e8b   : > { %v4083_v5 = vld [vmem:[%s5714_s7 + $0x2] ss:$0 sm:$0xff] }
0x1e8c   : > { %v2565_v6 = vpop.f32.mrf.mxu0 }
0x1e8e   : > { %v4490_v7 = vpop.f32.mrf.mxu0 }
0x1e90   : > { %v2658_v9 = vpop.f32.mrf.mxu0 }
0x1e91   : > { %v2659_v11 = vadd.f32 %v5385_v10, %v2658_v9 }
0x1e92   : > { %v4501_v34 = vpop.f32.mrf.mxu0 }
0x1e93   : > { %v2664_v12 = vsel %vm622_vm2, %v2659_v11, -inf }
0x1e94   : > { %2665 = vmax.xlane.f32.xlu0 %v2664_v12  ;;  %v2661_v13 = vpop.f32.mrf.mxu0 }
0x1e96   : > { %v4502_v14 = vpop.f32.mrf.mxu0 }
0x1eaa   : > { %2676 = vrot.lane.b32.xlu0 %v5363_v63, %s5783_s17 }
0x1eae   : > { %2774 = vrot.lane.b32.xlu0 %v5363_v63, %s5782_s27 }
0x1f1d   : > { %v2666_v15 = vpop.xlane.xlu0 %2665 }
0x1f1e   : > { %v2667_v16 = vsub.f32 %v2659_v11, %v2666_v15 }
0x1f20   : > { %v2668_v17 = vmul.f32 1.442695, %v2667_v16 }
0x1f21   : > { %v2677_v24 = vpop.permute.xlu0 %2676 }
0x1f22   : > { %4753 = vpow2.f32 %v2668_v17  ;;  %v2682_v18 = vsel %vm686_vm3, %v2677_v24, 0  ;;  %v4698_v24 = vld [vmem:[%s5711_s4 + $0x30] sm:$0xff]  }
0x1f23   : > { %4504 = vmatpush3.bf16.msra.mxu1 %v2682_v18 }
0x1f24   : > { %4515 = vmatprep.subr.bf16.mxu1 %v4846_v8 }
0x1f25   : > { %v2775_v28 = vpop.permute.xlu0 %2774 }
0x1f2f   : > { %v4754_v19 = vpop.eup %4753 }
0x1f30   : > { %v2670_v20 = vsel %vm622_vm2, %v4754_v19, 0.0 }
0x1f31   : > { %2671 = vadd.xlane.f32.xlu1 %v2670_v20 }
0x1f42   : > { %2776 = vrot.lane.b32.xlu1 %v5363_v63, %s5781_s23 }
0x1fba   : > { %v2672_v21 = vpop.xlane.xlu1 %2671 }
0x1fbb   : > { %4755 = vrcp.f32 %v2672_v21 }
0x1fbe   : > { %v2777_v25 = vpop.permute.xlu1 %2776 }
0x1fbf   : > { %v2782_v27 = vsel %vm622_vm2, %v2777_v25, 0  ;;  %v4087_v25 = vld [vmem:[%s5710_s3 + $0x3] ss:$0 sm:$0xff] }
0x1fc8   : > { %v4756_v22 = vpop.eup %4755 }
0x1fc9   : > { %v2674_v23 = vmul.f32 %v4756_v22, %v4754_v19  ;;  %v4086_v22 = vld [vmem:[%s5709_s2 + $0x3] ss:$0 sm:$0xff] }
0x1fcb   : > { %v2675_v26 = vpack.c.bf16 %v2674_v23, %v2674_v23 }
0x1fcd   : > { %4506 = vmatmul.mubr.msk.bf16.vlgmr.msra.gmra.mxu1 %vm622_vm2, %v2675_v26 }
0x1fce   : > { %4516 = vmatpush3.bf16.xpose.msra.mxu1 %v2782_v27  ;;  %4517 = vmatprep.mubr.msk.bf16.mxu1 %vm4847_vm1, %v4846_v8 }
0x1fcf   : > { %4527 = vmatprep.subr.bf16.mxu1 %v4846_v8 }
0x1fd5   : > { %4518 = vmatmul.mubr.msk.bf16.vlgmr.msra.gmra.mxu1 %vm622_vm2, %v2775_v28 }
0x1fd6   : > { %4529 = vmatprep.mubr.msk.bf16.mxu1 %vm4847_vm1, %v4846_v8  ;;  %4528 = vmatpush3.bf16.msra.mxu1 %v2891_v51 }
0x1fd7   : > { %4541 = vmatprep.subr.bf16.mxu1 %v4846_v8 }
0x208d   : > { %v2718_v31 = vpop.f32.mrf.mxu1 }
0x208e   : > { %v2724_v33 = vpack.c.bf16 %v2718_v31, %v2718_v31 }
0x208f   : > { %v4507_v35 = vpop.f32.mrf.mxu1 }
0x2090   : > { %4512 = vmatmul.mubr.msk.bf16.vlgmr.msra.gmra.mxu0 %vm622_vm2, %v2724_v33 }
0x2091   : > { %v2721_v36 = vpop.f32.mrf.mxu1  ;;  %4523 = vmatprep.mubr.msk.bf16.mxu0 %vm4847_vm1, %v4846_v8 }
0x2093   : > { %v4508_v37 = vpop.f32.mrf.mxu1 }
0x2095   : > { %v2818_v38 = vpop.f32.mrf.mxu1 }
0x2096   : > { %v2819_v39 = vadd.f32 %v5385_v10, %v2818_v38 }
0x2097   : > { %v4519_v41 = vpop.f32.mrf.mxu1 }
0x2098   : > { %v2824_v0 = vsel %vm622_vm2, %v2819_v39, -inf }
0x2099   : > { %2825 = vmax.xlane.f32.xlu1 %v2824_v0  ;;  %v2821_v32 = vpop.f32.mrf.mxu1 }
0x209b   : > { %v4520_v42 = vpop.f32.mrf.mxu1 }
0x2122   : > { %v2826_v43 = vpop.xlane.xlu1 %2825 }
0x2123   : > { %v2827_v44 = vsub.f32 %v2819_v39, %v2826_v43 }
0x2125   : > { %v2828_v45 = vmul.f32 1.442695, %v2827_v44 }
0x2127   : > { %4757 = vpow2.f32 %v2828_v45 }
0x2134   : > { %v4758_v57 = vpop.eup %4757 }
0x2135   : > { %v2830_v46 = vsel %vm622_vm2, %v4758_v57, 0.0 }
0x2136   : > { %2831 = vadd.xlane.f32.xlu0 %v2830_v46 }
0x214c   : > { %2836 = vrot.lane.b32.xlu0 %v5363_v63, %s5784_s21 }
0x2150   : > { %v2767_v47 = vpop.f32.mrf.mxu0 }
0x2151   : > { %v2773_v48 = vadd.f32 %v2767_v47, %v5432_v4 }
0x2152   : > { %v4513_v49 = vpop.f32.mrf.mxu0 }
0x2154   : > { %v2770_v52 = vpop.f32.mrf.mxu0 }
0x2156   : > { %v4514_v53 = vpop.f32.mrf.mxu0 }
0x21bf   : > { %v2832_v54 = vpop.xlane.xlu0 %2831 }
0x21c0   : > { %4759 = vrcp.f32 %v2832_v54 }
0x21c3   : > { %v2837_v55 = vpop.permute.xlu0 %2836 }
0x21c4   : > { %v2842_v63 = vsel %vm686_vm3, %v2837_v55, 0 }
0x21c5   : > { %4522 = vmatpush3.bf16.msra.mxu0 %v2842_v63 }
0x21c6   : > { %4533 = vmatprep.subr.bf16.mxu0 %v4846_v8 }
0x21cd   : > { %v4760_v56 = vpop.eup %4759 }
0x21ce   : > { %v2834_v58 = vmul.f32 %v4760_v56, %v4758_v57 }
0x21d0   : > { %v2835_v59 = vpack.c.bf16 %v2834_v58, %v2834_v58 }
0x21d2   : > { %4524 = vmatmul.mubr.msk.bf16.vlgmr.msra.gmra.mxu0 %vm622_vm2, %v2835_v59 }
0x21d3   : > { %4537 = vmatprep.mubr.msk.bf16.mxu0 %vm4847_vm1, %v4846_v8 }
0x2292   : > { %v2878_v60 = vpop.f32.mrf.mxu0 }
0x2293   : > { %v2884_v61 = vpack.c.bf16 %v2878_v60, %v2878_v60 }
0x2294   : > { %v4525_v62 = vpop.f32.mrf.mxu0 }
0x2295   : > { %4530 = vmatmul.mubr.msk.bf16.vlgmr.msra.gmra.mxu1 %vm622_vm2, %v2884_v61 }
0x2296   : > { %v2881_v1 = vpop.f32.mrf.mxu0  ;;  %4543 = vmatprep.mubr.msk.bf16.mxu1 %vm4847_vm1, %v4846_v8 }
0x2298   : > { %v4526_v2 = vpop.f32.mrf.mxu0 }
0x2355   : > { %v2927_v3 = vpop.f32.mrf.mxu1 }
0x2356   : > { %v2933_v4 = vadd.f32 %v2927_v3, %v2773_v48 }
0x2357   : > { %v4531_v6 = vpop.f32.mrf.mxu1 }
0x2358   : > { %v2934_v7 = vadd.f32 %v2933_v4, %v5337_v40  ;;  %v4697_v40 = vld [vmem:[%s5711_s4 + $0x38] sm:$0xff]  }
0x2359   : > { %v2930_v9 = vpop.f32.mrf.mxu1  ;;  %4534 = vmatpush3.bf16.msra.mxu0 %v4697_v40 }
0x235a   : > { %v5484_v11 = vadd.f32 %v4083_v5, %v2934_v7  ;;  %4535 = vmatprep.subr.bf16.mxu0 %v4846_v8 }
0x235b   : > { %v4532_v34 = vpop.f32.mrf.mxu1 }
0x235c   : > { %v2948_v12 = vsel %vm522_vm0, %v5484_v11, 0.0 }
0x235d   : > { %2949 = vadd.xlane.f32.xlu1 %v2948_v12  ;;  %4536 = vmatpush3.bf16.msra.mxu0 %v4698_v24 }
0x235e   : > { %4547 = vmatprep.subr.bf16.mxu0 %v4846_v8 }
0x23e6   : > { %v2950_v13 = vpop.xlane.xlu1 %2949 }
0x23e7   : > { %v2951_v14 = vmul.f32 0.03125, %v2950_v13 }
0x23e9   : > { %v2952_v15 = vsub.f32 %v5484_v11, %v2951_v14 }
0x23eb   : > { %v2953_v16 = vmul.f32 %v2952_v15, %v2952_v15 }
0x23ed   : > { %v2954_v17 = vsel %vm522_vm0, %v2953_v16, 0.0 }
0x23ee   : > { %2955 = vadd.xlane.f32.xlu1 %v2954_v17  ;;  %v4102_v17 = vld [vmem:[%s5713_s6 + $0x34] sm:$0xf] }
0x23ef   : > { %v3274_v40 = vsel %vm686_vm3, %v4102_v17, 0 }
0x2477   : > { %v2956_v18 = vpop.xlane.xlu1 %2955 }
0x2478   : > { %v2957_v19 = vmul.f32 0.03125, %v2956_v18 }
0x247a   : > { %v2958_v20 = vadd.f32 1e-05, %v2957_v19 }
0x247c   : > { %4761 = vrsqrt.f32 %v2958_v20 }
0x2489   : > { %v4762_v21 = vpop.eup %4761 }
0x248a   : > { %v2960_v23 = vmul.f32 %v4762_v21, %v2952_v15  ;;  %v4099_v15 = vld [vmem:[%s5713_s6 + $0x30] sm:$0xf] }
0x248b   : > { %v3320_v16 = vsel %vm686_vm3, %v4099_v15, 0 }
0x248c   : > { %v2967_v26 = vmul.f32 %v4086_v22, %v2960_v23 }
0x248e   : > { %v2974_v27 = vadd.f32 %v4087_v25, %v2967_v26 }
0x2490   : > { %v2975_v28 = vpack.c.bf16 %v2974_v27, %v2974_v27 }
0x2492   : > { %4538 = vmatmul.mubr.msk.bf16.vlgmr.msra.gmra.mxu0 %vm522_vm0, %v2975_v28 }
0x2493   : > { %4549 = vmatprep.mubr.msk.bf16.mxu0 %vm4847_vm1, %v4846_v8 }
0x2552   : > { %v3038_v30 = vpop.f32.mrf.mxu0 }
0x2553   : > { %v3039_v31 = vadd.f32 %v4093_v29, %v3038_v30 }
0x2554   : > { %v4539_v33 = vpop.f32.mrf.mxu0 }
0x2555   : > { %v5510_v35 = vpack.c.bf16 %v3039_v31, %v3039_v31 }
0x2556   : > { %v3041_v36 = vpop.f32.mrf.mxu0 }
0x2557   : > { %3159 = vrot.lane.b32.xlu0 %v5510_v35, %s5785_s24  ;;  %3046 = vrot.lane.b32.xlu1 %v5510_v35, %s5775_s20  ;;  %s5791_s24 = sld [smem:[#allocation18_spill]]  ;;  %s4859_s20 = smov [#allocation2]  }
0x2558   : > { %v4540_v37 = vpop.f32.mrf.mxu0 }
0x255b   : > { %3157 = vrot.lane.b32.xlu0 %v5510_v35, %s5776_s30  ;;  %s5789_s30 = sld [smem:[#allocation16_spill]] }
0x255d   : > { %s5792_s15 = smov %s5791_s24 }
0x25c9   : > { %v3047_v38 = vpop.permute.xlu1 %3046  ;;  %v3160_v41 = vpop.permute.xlu0 %3159 }
0x25ca   : > { %v3052_v39 = vsel %vm622_vm2, %v3047_v38, 0  ;;  %v3165_v0 = vsel %vm622_vm2, %v3160_v41, 0 }
0x25cb   : > { %4542 = vmatpush3.bf16.xpose.msra.mxu1 %v3052_v39 }
0x25cc   : > { %4553 = vmatprep.subr.bf16.mxu1 %v4846_v8 }
0x25cd   : > { %v3158_v32 = vpop.permute.xlu0 %3157 }
0x25d2   : > { %4544 = vmatmul.mubr.msk.bf16.vlgmr.msra.gmra.mxu1 %vm622_vm2, %v5510_v35 }
0x25d3   : > { %4554 = vmatpush3.bf16.xpose.msra.mxu1 %v3165_v0  ;;  %4555 = vmatprep.mubr.msk.bf16.mxu1 %vm4847_vm1, %v4846_v8 }
0x25d4   : > { %4565 = vmatprep.subr.bf16.mxu1 %v4846_v8 }
0x25da   : > { %4556 = vmatmul.mubr.msk.bf16.vlgmr.msra.gmra.mxu1 %vm622_vm2, %v3158_v32 }
0x25db   : > { %4567 = vmatprep.mubr.msk.bf16.mxu1 %vm4847_vm1, %v4846_v8  ;;  %4566 = vmatpush3.bf16.msra.mxu1 %v3274_v40 }
0x25dc   : > { %4577 = vmatprep.subr.bf16.mxu1 %v4846_v8 }
0x2692   : > { %v3088_v42 = vpop.f32.mrf.mxu1 }
0x2693   : > { %v3089_v43 = vadd.f32 %v5385_v10, %v3088_v42 }
0x2694   : > { %v4545_v44 = vpop.f32.mrf.mxu1 }
0x2695   : > { %v3094_v45 = vsel %vm622_vm2, %v3089_v43, -inf }
0x2696   : > { %3095 = vmax.xlane.f32.xlu1 %v3094_v45  ;;  %v3091_v57 = vpop.f32.mrf.mxu1 }
0x2698   : > { %v4546_v46 = vpop.f32.mrf.mxu1 }
0x269a   : > { %v3201_v47 = vpop.f32.mrf.mxu1 }
0x269b   : > { %v3202_v48 = vadd.f32 %v5385_v10, %v3201_v47 }
0x269c   : > { %v4557_v49 = vpop.f32.mrf.mxu1 }
0x269d   : > { %v3207_v50 = vsel %vm622_vm2, %v3202_v48, -inf }
0x269e   : > { %3208 = vmax.xlane.f32.xlu0 %v3207_v50  ;;  %v3204_v51 = vpop.f32.mrf.mxu1 }
0x26a0   : > { %v4558_v52 = vpop.f32.mrf.mxu1 }
0x271f   : > { %v3096_v53 = vpop.xlane.xlu1 %3095 }
0x2720   : > { %v3097_v54 = vsub.f32 %v3089_v43, %v3096_v53 }
0x2722   : > { %v3098_v55 = vmul.f32 1.442695, %v3097_v54 }
0x2724   : > { %4763 = vpow2.f32 %v3098_v55 }
0x2727   : > { %v3209_v63 = vpop.xlane.xlu0 %3208 }
0x2728   : > { %v3210_v56 = vsub.f32 %v3202_v48, %v3209_v63 }
0x272a   : > { %v3211_v58 = vmul.f32 1.442695, %v3210_v56 }
0x272c   : > { %4765 = vpow2.f32 %v3211_v58 }
0x2731   : > { %v4764_v59 = vpop.eup %4763 }
0x2732   : > { %v3100_v60 = vsel %vm622_vm2, %v4764_v59, 0.0 }
0x2733   : > { %3101 = vadd.xlane.f32.xlu0 %v3100_v60 }
0x2739   : > { %v4766_v61 = vpop.eup %4765 }
0x273a   : > { %v3213_v62 = vsel %vm622_vm2, %v4766_v61, 0.0 }
0x273b   : > { %3214 = vadd.xlane.f32.xlu1 %v3213_v62 }
0x2749   : > { %3106 = vrot.lane.b32.xlu0 %v5510_v35, %s5777_s19 }
0x274c   : > { %3219 = vrot.lane.b32.xlu1 %v5510_v35, %s5778_s29 }
0x274d   : > { %3362 = vrot.lane.b32.xlu0 %v5510_v35, %s5779_s28  ;;  %s5790_s28 = sld [smem:[#allocation17_spill]] }
0x2750   : > { %3364 = vrot.lane.b32.xlu1 %v5510_v35, %s5780_s18  ;;  %s4146_s18 = sshll.u32 %s5787_s14, 7 }
0x2751   : > { %s3921_s16 = scalar_lea.hbm %s5791_s24, %s4146_s18 }
0x27bc   : > { %v3102_v1 = vpop.xlane.xlu0 %3101 }
0x27bd   : > { %4767 = vrcp.f32 %v3102_v1 }
0x27c0   : > { %v3107_v2 = vpop.permute.xlu0 %3106 }
0x27c1   : > { %v3112_v3 = vsel %vm686_vm3, %v3107_v2, 0 }
0x27c2   : > { %4548 = vmatpush3.bf16.msra.mxu0 %v3112_v3 }
0x27c3   : > { %4559 = vmatprep.subr.bf16.mxu0 %v4846_v8 }
0x27c4   : > { %v3215_v4 = vpop.xlane.xlu1 %3214  ;;  %v3363_v30 = vpop.permute.xlu0 %3362 }
0x27c5   : > { %4769 = vrcp.f32 %v3215_v4 }
0x27c8   : > { %v3220_v7 = vpop.permute.xlu1 %3219 }
0x27c9   : > { %v3225_v34 = vsel %vm686_vm3, %v3220_v7, 0 }
0x27ca   : > { %v4768_v5 = vpop.eup %4767 }
0x27cb   : > { %v3104_v6 = vmul.f32 %v4768_v5, %v4764_v59 }
0x27cc   : > { %v3365_v22 = vpop.permute.xlu1 %3364 }
0x27cd   : > { %v3105_v9 = vpack.c.bf16 %v3104_v6, %v3104_v6  ;;  %v3370_v27 = vsel %vm622_vm2, %v3365_v22, 0 }
0x27cf   : > { %4550 = vmatmul.mubr.msk.bf16.vlgmr.msra.gmra.mxu0 %vm622_vm2, %v3105_v9 }
0x27d0   : > { %4560 = vmatpush3.bf16.msra.mxu0 %v3225_v34  ;;  %4561 = vmatprep.mubr.msk.bf16.mxu0 %vm4847_vm1, %v4846_v8 }
0x27d1   : > { %4571 = vmatprep.subr.bf16.mxu0 %v4846_v8 }
0x27d2   : > { %v4770_v12 = vpop.eup %4769 }
0x27d3   : > { %v3217_v13 = vmul.f32 %v4770_v12, %v4766_v61  ;;  %v4107_v61 = vld [vmem:[%s5713_s6 + $0x38] sm:$0xf] }
0x27d4   : > { %v3479_v62 = vsel %vm686_vm3, %v4107_v61, 0 }
0x27d5   : > { %v3218_v14 = vpack.c.bf16 %v3217_v13, %v3217_v13 }
0x27d7   : > { %4562 = vmatmul.mubr.msk.bf16.vlgmr.msra.gmra.mxu0 %vm622_vm2, %v3218_v14 }
0x27d8   : > { %4573 = vmatprep.mubr.msk.bf16.mxu0 %vm4847_vm1, %v4846_v8  ;;  %4572 = vmatpush3.bf16.msra.mxu0 %v3320_v16 }
0x27d9   : > { %4583 = vmatprep.subr.bf16.mxu0 %v4846_v8 }
0x288f   : > { %v3148_v24 = vpop.f32.mrf.mxu0 }
0x2890   : > { %v3154_v18 = vpack.c.bf16 %v3148_v24, %v3148_v24 }
0x2891   : > { %v4551_v19 = vpop.f32.mrf.mxu0 }
0x2892   : > { %4574 = vmatmul.mubr.msk.bf16.vlgmr.msra.gmra.mxu0 %vm622_vm2, %v3154_v18 }
0x2893   : > { %v3151_v20 = vpop.f32.mrf.mxu0  ;;  %4585 = vmatprep.mubr.msk.bf16.mxu0 %vm4847_vm1, %v4846_v8 }
0x2895   : > { %v4552_v21 = vpop.f32.mrf.mxu0 }
0x2897   : > { %v3261_v23 = vpop.f32.mrf.mxu0 }
0x2898   : > { %v3267_v25 = vpack.c.bf16 %v3261_v23, %v3261_v23 }
0x2899   : > { %v4563_v26 = vpop.f32.mrf.mxu0 }
0x289a   : > { %4568 = vmatmul.mubr.msk.bf16.vlgmr.msra.gmra.mxu1 %vm622_vm2, %v3267_v25 }
0x289b   : > { %4578 = vmatpush3.bf16.xpose.msra.mxu1 %v3370_v27  ;;  %v3264_v28 = vpop.f32.mrf.mxu0  ;;  %4579 = vmatprep.mubr.msk.bf16.mxu1 %vm4847_vm1, %v4846_v8 }
0x289c   : > { %4589 = vmatprep.subr.bf16.mxu1 %v4846_v8 }
0x289d   : > { %v4564_v29 = vpop.f32.mrf.mxu0 }
0x28a2   : > { %4580 = vmatmul.mubr.msk.bf16.vlgmr.msra.gmra.mxu1 %vm622_vm2, %v3363_v30 }
0x28a3   : > { %4591 = vmatprep.mubr.msk.bf16.mxu1 %vm4847_vm1, %v4846_v8  ;;  %4590 = vmatpush3.bf16.msra.mxu1 %v3479_v62  ;;  %v4703_v62 = vld [vmem:[%s5719_s12 + $0x28] sm:$0xff]  }
0x28a4   : > { %4601 = vmatprep.subr.bf16.mxu1 %v4846_v8 }
0x2952   : > { %v3356_v31 = vpop.f32.mrf.mxu0 }
0x2954   : > { %v4575_v33 = vpop.f32.mrf.mxu0 }
0x2956   : > { %v3359_v36 = vpop.f32.mrf.mxu0 }
0x2958   : > { %v4576_v37 = vpop.f32.mrf.mxu0 }
0x295a   : > { %v3310_v38 = vpop.f32.mrf.mxu1 }
0x295b   : > { %v5574_v39 = vadd.f32 %v3356_v31, %v3310_v38 }
0x295c   : > { %v4569_v41 = vpop.f32.mrf.mxu1 }
0x295e   : > { %v3313_v0 = vpop.f32.mrf.mxu1 }
0x2960   : > { %v4570_v32 = vpop.f32.mrf.mxu1 }
0x2962   : > { %v3406_v42 = vpop.f32.mrf.mxu1 }
0x2963   : > { %v3407_v43 = vadd.f32 %v5385_v10, %v3406_v42 }
0x2964   : > { %v4581_v44 = vpop.f32.mrf.mxu1 }
0x2965   : > { %v3412_v45 = vsel %vm622_vm2, %v3407_v43, -inf }
0x2966   : > { %3413 = vmax.xlane.f32.xlu1 %v3412_v45  ;;  %v3409_v57 = vpop.f32.mrf.mxu1 }
0x2968   : > { %v4582_v46 = vpop.f32.mrf.mxu1 }
0x2977   : > { %3524 = vrot.lane.b32.xlu1 %v5510_v35, %s5781_s23  ;;  %s512_s23 = scalar_lea.vmem [#allocation2], %s3986_s22 }
0x297b   : > { %3522 = vrot.lane.b32.xlu1 %v5510_v35, %s5782_s27  ;;  %s3923_s27 = sshll.u32 %s512_s23, 4  ;;  %s3924_s27 = int_to_ptr.vmem [resolvable:$true] %s3923_s27 }
0x297c   : > { %s4784_s26 = scalar_lea.vmem %s3924_s27, 128 }
0x297d   : > { %p4785_p11 = scmp.ne.s32.totalorder %s3924_s27, %s4784_s26 }
0x297f   : > { %p4786_p12 = pnand %p4785_p11, %p4983_p5 }
0x2981   : > { %p4787_p13 = pneg %p4786_p12 }
0x29ef   : > { %v3414_v47 = vpop.xlane.xlu1 %3413 }
0x29f0   : > { %v3415_v48 = vsub.f32 %v3407_v43, %v3414_v47 }
0x29f2   : > { %v3416_v49 = vmul.f32 1.442695, %v3415_v48 }
0x29f3   : > { %v3525_v56 = vpop.permute.xlu1 %3524 }
0x29f4   : > { %4771 = vpow2.f32 %v3416_v49  ;;  %v3530_v59 = vsel %vm622_vm2, %v3525_v56, 0  ;;  %v4699_v49 = vld [vmem:[%s5717_s10 + $0x18] sm:$0xff]  }
0x29f7   : > { %v3523_v60 = vpop.permute.xlu1 %3522 }
0x2a01   : > { %v4772_v50 = vpop.eup %4771 }
0x2a02   : > { %v3418_v51 = vsel %vm622_vm2, %v4772_v50, 0.0 }
0x2a03   : > { %3419 = vadd.xlane.f32.xlu0 %v3418_v51  ;;  %v4702_v51 = vld [vmem:[%s5719_s12 + $0x30] sm:$0xff]  }
0x2a19   : > { %3424 = vrot.lane.b32.xlu0 %v5510_v35, %s5783_s17 }
0x2a8c   : > { %v3420_v52 = vpop.xlane.xlu0 %3419 }
0x2a8d   : > { %4773 = vrcp.f32 %v3420_v52 }
0x2a90   : > { %v3425_v53 = vpop.permute.xlu0 %3424 }
0x2a91   : > { %v3430_v54 = vsel %vm686_vm3, %v3425_v53, 0 }
0x2a92   : > { %4584 = vmatpush3.bf16.msra.mxu0 %v3430_v54 }
0x2a93   : > { %4595 = vmatprep.subr.bf16.mxu0 %v4846_v8 }
0x2a9a   : > { %v4774_v55 = vpop.eup %4773 }
0x2a9b   : > { %v3422_v63 = vmul.f32 %v4774_v55, %v4772_v50  ;;  %v4701_v50 = vld [vmem:[%s5719_s12 + $0x38] sm:$0xff]  }
0x2a9d   : > { %v3423_v58 = vpack.c.bf16 %v3422_v63, %v3422_v63  ;;  %v4117_v63 = vld [vmem:[%s5715_s8 + $0x1] ss:$0 sm:$0xff] }
0x2a9f   : > { %4586 = vmatmul.mubr.msk.bf16.vlgmr.msra.gmra.mxu0 %vm622_vm2, %v3423_v58  ;;  %v4118_v58 = vld [vmem:[%s5716_s9 + $0x1] ss:$0 sm:$0xff] }
0x2aa0   : > { %4596 = vmatpush3.bf16.xpose.msra.mxu0 %v3530_v59  ;;  %4597 = vmatprep.mubr.msk.bf16.mxu0 %vm4847_vm1, %v4846_v8 }
0x2aa1   : > { %4607 = vmatprep.subr.bf16.mxu0 %v4846_v8 }
0x2aa7   : > { %4598 = vmatmul.mubr.msk.bf16.vlgmr.msra.gmra.mxu0 %vm622_vm2, %v3523_v60 }
0x2aa8   : > { %4609 = vmatprep.mubr.msk.bf16.mxu0 %vm4847_vm1, %v4846_v8 }
0x2b5f   : > { %v3466_v1 = vpop.f32.mrf.mxu0 }
0x2b60   : > { %v3472_v2 = vpack.c.bf16 %v3466_v1, %v3466_v1  ;;  %v4704_v1 = vld [vmem:[%s5719_s12 + $0x20] sm:$0xff]  }
0x2b61   : > { %v4587_v3 = vpop.f32.mrf.mxu0 }
0x2b62   : > { %4592 = vmatmul.mubr.msk.bf16.vlgmr.msra.gmra.mxu1 %vm622_vm2, %v3472_v2  ;;  %v4124_v2 = vld [vmem:[%s5718_s11 + $0x1] ss:$0 sm:$0xff] }
0x2b63   : > { %v3469_v4 = vpop.f32.mrf.mxu0  ;;  %4603 = vmatprep.mubr.msk.bf16.mxu1 %vm4847_vm1, %v4846_v8 }
0x2b65   : > { %v4588_v5 = vpop.f32.mrf.mxu0 }
0x2b67   : > { %v3566_v6 = vpop.f32.mrf.mxu0 }
0x2b68   : > { %v3567_v7 = vadd.f32 %v5385_v10, %v3566_v6 }
0x2b69   : > { %v4599_v9 = vpop.f32.mrf.mxu0 }
0x2b6a   : > { %v3572_v34 = vsel %vm622_vm2, %v3567_v7, -inf }
0x2b6b   : > { %3573 = vmax.xlane.f32.xlu0 %v3572_v34  ;;  %v3569_v12 = vpop.f32.mrf.mxu0 }
0x2b6d   : > { %v4600_v13 = vpop.f32.mrf.mxu0 }
0x2b81   : > { %3584 = vrot.lane.b32.xlu0 %v5510_v35, %s5784_s21  ;;  %v4111_v35 = vld [vmem:[%s5713_s6 + $0x3c] sm:$0xf] }
0x2b82   : > { %v3639_v21 = vsel %vm686_vm3, %v4111_v35, 0 }
0x2b83   : > { %4608 = vmatpush3.bf16.msra.mxu0 %v3639_v21 }
0x2b84   : > { %4621 = vmatprep.subr.bf16.mxu0 %v4846_v8 }
0x2bf4   : > { %v3574_v14 = vpop.xlane.xlu0 %3573 }
0x2bf5   : > { %v3575_v15 = vsub.f32 %v3567_v7, %v3574_v14 }
0x2bf7   : > { %v3576_v16 = vmul.f32 1.442695, %v3575_v15 }
0x2bf8   : > { %v3585_v17 = vpop.permute.xlu0 %3584 }
0x2bf9   : > { %4775 = vpow2.f32 %v3576_v16  ;;  %v3590_v40 = vsel %vm686_vm3, %v3585_v17, 0 }
0x2bfa   : > { %4602 = vmatpush3.bf16.msra.mxu1 %v3590_v40 }
0x2bfb   : > { %4613 = vmatprep.subr.bf16.mxu1 %v4846_v8 }
0x2c06   : > { %v4776_v10 = vpop.eup %4775 }
0x2c07   : > { %v3578_v24 = vsel %vm622_vm2, %v4776_v10, 0.0 }
0x2c08   : > { %3579 = vadd.xlane.f32.xlu1 %v3578_v24 }
0x2c22   : > { %v3515_v18 = vpop.f32.mrf.mxu1 }
0x2c23   : > { %v3521_v19 = vadd.f32 %v3515_v18, %v5574_v39  ;;  %v4114_v39 = vld [vmem:[%s5714_s7 + $0x3] ss:$0 sm:$0xff] }
0x2c24   : > { %v4593_v20 = vpop.f32.mrf.mxu1 }
0x2c26   : > { %v3518_v22 = vpop.f32.mrf.mxu1 }
0x2c28   : > { %v4594_v23 = vpop.f32.mrf.mxu1 }
0x2c91   : > { %v3580_v25 = vpop.xlane.xlu1 %3579 }
0x2c92   : > { %4777 = vrcp.f32 %v3580_v25  ;;  %v4143_v25 = vld [vmem:[%s5789_s30] ss:$0 sm:$0xff]  ;;  %s4788_s30 = sshll.u32 %s4859_s20, 4  ;;  %s4789_s30 = int_to_ptr.vmem [resolvable:$false] %s4788_s30 }
0x2c93   : > { %s4790_s14 = scalar_lea.vmem %s4789_s30, 256  ;;  %p4791_p0 = scmp.lt.s32.totalorder %s3924_s27, %s4789_s30 }
0x2c94   : > { %p4792_p1 = scmp.lt.s32.totalorder %s4790_s14, %s4784_s26 }
0x2c96   : > { %p4793_p2 = por %p4792_p1, %p4791_p0 }
0x2c98   : > { %p4794_p3 = pnand %p4793_p2, %p4787_p13 }
0x2c9f   : > { %v4778_v26 = vpop.eup %4777 }
0x2ca0   : > { %v3582_v27 = vmul.f32 %v4778_v26, %v4776_v10 }
0x2ca2   : > { %v3583_v28 = vpack.c.bf16 %v3582_v27, %v3582_v27  ;;  %v4144_v27 = vld [vmem:[%s5790_s28] ss:$0 sm:$0xff] }
0x2ca4   : > { %4604 = vmatmul.mubr.msk.bf16.vlgmr.msra.gmra.mxu1 %vm622_vm2, %v3583_v28 }
0x2ca5   : > { %4617 = vmatprep.mubr.msk.bf16.mxu1 %vm4847_vm1, %v4846_v8  ;;  %4614 = vmatpush3.bf16.msra.mxu1 %v4699_v49 }
0x2ca6   : > { %4615 = vmatprep.subr.bf16.mxu1 %v4846_v8 }
0x2d64   : > { %v3626_v29 = vpop.f32.mrf.mxu1 }
0x2d65   : > { %v3632_v30 = vpack.c.bf16 %v3626_v29, %v3626_v29 }
0x2d66   : > { %v4605_v31 = vpop.f32.mrf.mxu1 }
0x2d67   : > { %4610 = vmatmul.mubr.msk.bf16.vlgmr.msra.gmra.mxu0 %vm622_vm2, %v3632_v30 }
0x2d68   : > { %v3629_v33 = vpop.f32.mrf.mxu1  ;;  %4629 = vmatprep.mubr.msk.bf16.mxu0 %vm4847_vm1, %v4846_v8  ;;  %4622 = vmatpush3.bf16.msra.mxu0 %v4701_v50 }
0x2d69   : > { %4623 = vmatprep.subr.bf16.mxu0 %v4846_v8 }
0x2d6a   : > { %v4606_v36 = vpop.f32.mrf.mxu1 }
0x2d6c   : > { %4624 = vmatpush3.bf16.msra.mxu0 %v4702_v51 }
0x2d6d   : > { %4625 = vmatprep.subr.bf16.mxu0 %v4846_v8 }
0x2d70   : > { %4626 = vmatpush3.bf16.msra.mxu0 %v4703_v62 }
0x2d71   : > { %4627 = vmatprep.subr.bf16.mxu0 %v4846_v8  ;;  %v4137_v8 = vld [vmem:[%s5720_s13 + $0x1] ss:$0 sm:$0xff] }
0x2d74   : > { %4628 = vmatpush3.bf16.msra.mxu0 %v4704_v1 }
0x2e27   : > { %v3675_v37 = vpop.f32.mrf.mxu0 }
0x2e28   : > { %v3681_v38 = vadd.f32 %v3675_v37, %v3521_v19 }
0x2e29   : > { %v4611_v41 = vpop.f32.mrf.mxu0 }
0x2e2a   : > { %v3682_v0 = vadd.f32 %v3681_v38, %v5484_v11  ;;  %v4700_v11 = vld [vmem:[%s5717_s10 + $0x10] sm:$0xff]  }
0x2e2b   : > { %v3678_v32 = vpop.f32.mrf.mxu0  ;;  %4616 = vmatpush3.bf16.msra.mxu1 %v4700_v11 }
0x2e2c   : > { %v3691_v42 = vadd.f32 %v4114_v39, %v3682_v0 }
0x2e2d   : > { %v4612_v43 = vpop.f32.mrf.mxu0 }
0x2e2e   : > { %v3696_v44 = vsel %vm522_vm0, %v3691_v42, 0.0 }
0x2e2f   : > { %3697 = vadd.xlane.f32.xlu1 %v3696_v44 }
0x2eb8   : > { %v3698_v45 = vpop.xlane.xlu1 %3697 }
0x2eb9   : > { %v3699_v57 = vmul.f32 0.03125, %v3698_v45 }
0x2ebb   : > { %v3700_v46 = vsub.f32 %v3691_v42, %v3699_v57 }
0x2ebd   : > { %v3701_v47 = vmul.f32 %v3700_v46, %v3700_v46 }
0x2ebf   : > { %v3702_v48 = vsel %vm522_vm0, %v3701_v47, 0.0 }
0x2ec0   : > { %3703 = vadd.xlane.f32.xlu1 %v3702_v48 }
0x2f49   : > { %v3704_v52 = vpop.xlane.xlu1 %3703 }
0x2f4a   : > { %v3705_v53 = vmul.f32 0.03125, %v3704_v52 }
0x2f4c   : > { %v3706_v54 = vadd.f32 1e-05, %v3705_v53 }
0x2f4e   : > { %4779 = vrsqrt.f32 %v3706_v54 }
0x2f5b   : > { %v4780_v55 = vpop.eup %4779 }
0x2f5c   : > { %v3708_v56 = vmul.f32 %v4780_v55, %v3700_v46 }
0x2f5e   : > { %v3715_v59 = vmul.f32 %v4117_v63, %v3708_v56 }
0x2f60   : > { %v3722_v60 = vadd.f32 %v4118_v58, %v3715_v59 }
0x2f62   : > { %v3723_v61 = vpack.c.bf16 %v3722_v60, %v3722_v60 }
0x2f64   : > { %4618 = vmatmul.mubr.msk.bf16.vlgmr.msra.gmra.mxu1 %vm522_vm0, %v3723_v61 }
0x3024   : > { %v3786_v3 = vpop.f32.mrf.mxu1 }
0x3025   : > { %v3787_v4 = vadd.f32 %v4124_v2, %v3786_v3 }
0x3026   : > { %v4619_v5 = vpop.f32.mrf.mxu1 }
0x3027   : > { %v3792_v6 = vmax.f32 %v3787_v4, 0.0 }
0x3028   : > { %v3789_v7 = vpop.f32.mrf.mxu1 }
0x3029   : > { %v3793_v9 = vpack.c.bf16 %v3792_v6, %v3792_v6 }
0x302a   : > { %v4620_v34 = vpop.f32.mrf.mxu1 }
0x302b   : > { %4630 = vmatmul.mubr.msk.bf16.vlgmr.msra.gmra.mxu0 %vm2151_vm4, %v3793_v9 }
0x30eb   : > { %v3872_v12 = vpop.f32.mrf.mxu0 }
0x30ec   : > { %v3873_v13 = vadd.f32 %v4137_v8, %v3872_v12 }
0x30ed   : > { %v4631_v14 = vpop.f32.mrf.mxu0 }
0x30ee   : > { %v3878_v15 = vadd.f32 %v3873_v13, %v3691_v42 }
0x30ef   : > { %v3875_v16 = vpop.f32.mrf.mxu0 }
0x30f0   : > { %v3881_v17 = vsel %vm522_vm0, %v3878_v15, 0.0 }
0x30f1   : > { %3882 = vadd.xlane.f32.xlu1 %v3881_v17  ;;  %v4632_v40 = vpop.f32.mrf.mxu0 }
0x317a   : > { %v3883_v10 = vpop.xlane.xlu1 %3882 }
0x317b   : > { %v3884_v24 = vmul.f32 0.03125, %v3883_v10 }
0x317d   : > { %v3885_v18 = vsub.f32 %v3878_v15, %v3884_v24 }
0x317f   : > { %v3886_v19 = vmul.f32 %v3885_v18, %v3885_v18 }
0x3181   : > { %v3887_v20 = vsel %vm522_vm0, %v3886_v19, 0.0 }
0x3182   : > { %3888 = vadd.xlane.f32.xlu1 %v3887_v20 }
0x320b   : > { %v3889_v35 = vpop.xlane.xlu1 %3888 }
0x320c   : > { %v3890_v21 = vmul.f32 0.03125, %v3889_v35 }
0x320e   : > { %v3891_v22 = vadd.f32 1e-05, %v3890_v21 }
0x3210   : > { %4781 = vrsqrt.f32 %v3891_v22 }
0x321d   : > { %v4782_v23 = vpop.eup %4781 }
0x321e   : > { %v3893_v26 = vmul.f32 %v4782_v23, %v3885_v18 }
0x3220   : > { %v3900_v28 = vmul.f32 %v4143_v25, %v3893_v26 }
0x3222   : > { %v3907_v29 = vadd.f32 %v4144_v27, %v3900_v28 }
0x3224   : > { %3908 = vst.msk [vmem:[%s512_s23] sm:$0xff] %vm522_vm0, %v3907_v29 }
0x3225   : > { %4797 = shalt.err (!%p4794_p3)
}
0x3226   : > { %s4798_s22 = scalar_lea.hbm %s3921_s16, 128  ;;  %s4802_s29 = scalar_lea.hbm %s5792_s15, 256 }
0x3227   : > { %p4799_p4 = scmp.ne.s32.totalorder %s3921_s16, %s4798_s22  ;;  %p4803_p9 = scmp.lt.s32.totalorder %s3921_s16, %s5792_s15 }
0x3228   : > { %p4804_p10 = scmp.lt.s32.totalorder %s4802_s29, %s4798_s22 }
0x3229   : > { %p4800_p7 = pnand %p4799_p4, %p4983_p5 }
0x322a   : > { %p4805_p11 = por %p4804_p10, %p4803_p9 }
0x322b   : > { %p4801_p8 = pneg %p4800_p7 }
0x322d   : > { %p4806_p12 = pnand %p4805_p11, %p4801_p8 }
0x322f   : > { %4809 = shalt.err (!%p4806_p12)
}
0x3230   : > { %4633 = dma.vmem_to_hbm [thread:$0]  (%p4983_p5), %s3924_s27, 128, %s3921_s16, %s3910_s1  }
0x3231 PF: > { %s5793_s23 = sld [smem:[#allocation8_spill]] }
0x3232   : > { %s5794_s17 = sld [smem:[#allocation5_spill]] }
0x3237   : > { %p4639_p13 = scmp.ge.s32.totalorder %s5793_s23, 2 }
0x3238   : > { %s3935_s24 = sand.u32 1, %s5794_s17  }
0x3239   : > { %p4636_p0 = pnand %p4639_p13, %p4987_p6  ;;  %s3936_s26 = scalar_lea.sflag [#allocation3], %s3935_s24 }
0x323b   : > { %p4637_p1 = pneg %p4636_p0 }
0x323d   : > { %4827 = dma.done.wait (%p4637_p1), %s3936_s26, 128  }
0x323e   : > { %4829 = vsyncadd (%p4637_p1), %s3936_s26, 4294967168  ;;  %s5796_s24 = sld [smem:[#allocation10_spill]] }
0x323f   : > { %s5797_s21 = sld [smem:[#allocation6_spill]] }
0x3240   : > { %s5798_s22 = sld [smem:[#allocation7_spill]] }
0x3241   : > { %s5799_s23 = sld [smem:[#allocation11_spill]] }
0x3244   : > { %p26_p2 = scmp.ge.s32.totalorder %s5796_s24, 4  }
0x3246   :  { %28 = sbr.rel (!%p26_p2) target bundleno = 9 (0x9), region = 155 }
0x324b   :  { %3941 = vsyncpa [#allocation3], 1 }
0x324c   :  { %3943 = vsyncpa [#allocation3 + $0x1], 1 }

</bundles_post_ra>
